<compile_context>
chip_gen: v7x
topology: tpu7x:2x2x1
jax: 0.10.0
libtpu: 0.0.40
codegen_flags: <defaults>
</compile_context>

<pallas_src>
import math
import functools

import jax
import jax.numpy as jnp
from jax import lax
from jax.experimental import pallas as pl
from jax.experimental.pallas import tpu as pltpu


def _pos_embed_sine_kernel(mask_ref, tri_h_ref, tri_w_ref, inv_dim_ref,
                           phase_ref, is_y_ref, out_ref, *, tile_h,
                           normalize, scale):
    """One (batch, H-tile) grid step.

    mask_ref   : (1, H, W)     int32  full-H padding mask (1 = padded)
    tri_h_ref  : (TH, H)       bf16   rows of the lower-triangular cumsum matrix
    tri_w_ref  : (W, W)        bf16   upper-triangular cumsum matrix
    inv_dim_ref: (1, 1, 2F)    f32    1 / dim_t, tiled twice (y half | x half)
    phase_ref  : (1, 1, 2F)    f32    0 for even features, pi/2 for odd ones
    is_y_ref   : (1, 1, 2F)    int32  1 on the y half, 0 on the x half
    out_ref    : (1, TH, W, 2F) f32
    """
    h = pl.program_id(1)
    H = mask_ref.shape[1]

    # not_mask (0/1) — full H for the column cumsum, this tile's rows for the
    # row cumsum.  bf16 inputs + f32 MXU accumulation are exact for 0/1 data.
    nm_full = (1 - mask_ref[0]).astype(jnp.bfloat16)                    # (H, W)
    if tile_h == H:
        rows_i32 = mask_ref[0]                                          # (H, W)
    else:
        row0 = pl.multiple_of(h * tile_h, tile_h)
        rows_i32 = mask_ref[0, pl.ds(row0, tile_h), :]                  # (TH, W)
    nm_rows = (1 - rows_i32).astype(jnp.bfloat16)                       # (TH, W)

    # cumsum over H for this tile's rows: (TH, H) @ (H, W) on the MXU.
    y_tile = jnp.dot(tri_h_ref[...], nm_full,
                     preferred_element_type=jnp.float32)                # (TH, W)
    # cumsum over W for this tile's rows: (TH, W) @ (W, W) on the MXU.
    x_tile = jnp.dot(nm_rows, tri_w_ref[...],
                     preferred_element_type=jnp.float32)                # (TH, W)

    if normalize:
        eps = 1e-6
        # y_embed[-1, :] == column sums; x_embed[:, -1] == row sums.
        y_last = jnp.sum(nm_full.astype(jnp.float32), axis=0,
                         keepdims=True)                                 # (1, W)
        x_last = jnp.sum(nm_rows.astype(jnp.float32), axis=1,
                         keepdims=True)                                 # (TH, 1)
        y_tile = y_tile * (scale / (y_last + eps))
        x_tile = x_tile * (scale / (x_last + eps))

    # Lane-dense (TH, W, 2F) expansion.  Single transcendental per element:
    # even feature -> sin(a), odd feature -> cos(a) == sin(a + pi/2).
    base = jnp.where(is_y_ref[...] != 0,
                     y_tile[:, :, None], x_tile[:, :, None])            # (TH, W, 2F)
    out_ref[0] = jnp.sin(base * inv_dim_ref[...] + phase_ref[...])


def _choose_tile_h(H, W, two_f, budget_bytes=2 << 20):
    """Largest H-tile whose f32 output block stays under `budget_bytes`."""
    bytes_per_row = W * two_f * 4
    max_rows = max(1, budget_bytes // bytes_per_row)
    if max_rows >= H:
        return H
    for th in range(int(min(H, max_rows)), 7, -1):
        if H % th == 0 and th % 8 == 0:
            return th
    return H  # no clean divisor -> single full-H tile (still correct)


def position_embedding_sine(mask, *, num_pos_feats=64, temperature=10000,
                            normalize=False, scale=None, channels_last=False):
    """mask: (B, H, W) bool (True = padded).

    Returns (B, 2*num_pos_feats, H, W) f32 (PyTorch convention), or the
    lane-dense (B, H, W, 2*num_pos_feats) tensor if channels_last=True.
    """
    if scale is not None and normalize is False:
        raise ValueError('normalize should be True if scale is passed')
    if scale is None:
        scale = 2 * math.pi

    B, H, W = mask.shape
    F = num_pos_feats
    two_f = 2 * F
    mask_i32 = mask.astype(jnp.int32)

    # ---- loop-invariant constants, built once and reused by every grid step.
    r = jnp.arange(H)
    lower_tri = (r[None, :] <= r[:, None]).astype(jnp.bfloat16)         # (H, H)
    c = jnp.arange(W)
    upper_tri = (c[:, None] <= c[None, :]).astype(jnp.bfloat16)         # (W, W)

    jidx = jnp.arange(F)
    dim_t = jnp.asarray(temperature, jnp.float32) ** (
        2.0 * (jidx // 2).astype(jnp.float32) / F)                      # (F,)
    inv_dim_2f = jnp.tile(1.0 / dim_t, 2).reshape(1, 1, two_f)          # (1,1,2F)
    phase_2f = jnp.tile((jidx % 2).astype(jnp.float32) * (math.pi / 2.0),
                        2).reshape(1, 1, two_f)                         # (1,1,2F)
    is_y_2f = (jnp.arange(two_f) < F).astype(jnp.int32).reshape(1, 1, two_f)

    tile_h = _choose_tile_h(H, W, two_f)
    n_h = H // tile_h

    kernel = functools.partial(_pos_embed_sine_kernel, tile_h=tile_h,
                               normalize=normalize, scale=scale)

    out_bhwc = pl.pallas_call(
        kernel,
        out_shape=jax.ShapeDtypeStruct((B, H, W, two_f), jnp.float32),
        grid_spec=pltpu.PrefetchScalarGridSpec(
            num_scalar_prefetch=0,
            grid=(B, n_h),
            in_specs=[
                pl.BlockSpec((1, H, W), lambda b, h: (b, 0, 0)),        # mask
                pl.BlockSpec((tile_h, H), lambda b, h: (h, 0)),         # tri_h rows
                pl.BlockSpec((W, W), lambda b, h: (0, 0)),              # tri_w
                pl.BlockSpec((1, 1, two_f), lambda b, h: (0, 0, 0)),    # 1/dim_t
                pl.BlockSpec((1, 1, two_f), lambda b, h: (0, 0, 0)),    # phase
                pl.BlockSpec((1, 1, two_f), lambda b, h: (0, 0, 0)),    # is_y
            ],
            out_specs=pl.BlockSpec((1, tile_h, W, two_f),
                                   lambda b, h: (b, h, 0, 0)),
        ),
        compiler_params=pltpu.CompilerParams(
            dimension_semantics=("parallel", "parallel"),
            vmem_limit_bytes=32 * 1024 * 1024),
    )(mask_i32, lower_tri, upper_tri, inv_dim_2f, phase_2f, is_y_2f)

    if channels_last:
        return out_bhwc
    # Match the PyTorch module's NCHW output.  Consumers that flatten HW
    # anyway should pass channels_last=True and skip this extra HBM round trip.
    return jnp.transpose(out_bhwc, (0, 3, 1, 2))


def _reference(mask, *, num_pos_feats, temperature, normalize, scale):
    """Pure-JAX port of the PyTorch forward, used as a correctness check."""
    not_mask = (~mask).astype(jnp.float32)
    y_embed = jnp.cumsum(not_mask, axis=1)
    x_embed = jnp.cumsum(not_mask, axis=2)
    if normalize:
        eps = 1e-6
        y_embed = y_embed / (y_embed[:, -1:, :] + eps) * scale
        x_embed = x_embed / (x_embed[:, :, -1:] + eps) * scale
    dim_t = jnp.arange(num_pos_feats, dtype=jnp.float32)
    dim_t = temperature ** (2 * (dim_t // 2) / num_pos_feats)
    pos_x = x_embed[:, :, :, None] / dim_t
    pos_y = y_embed[:, :, :, None] / dim_t
    B, H, W = mask.shape
    pos_x = jnp.stack((jnp.sin(pos_x[..., 0::2]), jnp.cos(pos_x[..., 1::2])),
                      axis=4).reshape(B, H, W, -1)
    pos_y = jnp.stack((jnp.sin(pos_y[..., 0::2]), jnp.cos(pos_y[..., 1::2])),
                      axis=4).reshape(B, H, W, -1)
    pos = jnp.concatenate((pos_y, pos_x), axis=3).transpose(0, 3, 1, 2)
    return pos


if __name__ == "__main__":
    key = jax.random.PRNGKey(0)
    kx, km = jax.random.split(key)

    B, C, H, W = 2, 4, 16, 16
    F = 64  # num_pos_feats (module default)

    # x is only used for device/dtype in the PyTorch module; made for fidelity.
    x = jax.random.normal(kx, (B, C, H, W), dtype=jnp.float32)
    mask = jax.random.bernoulli(km, 0.25, (B, H, W))  # True = padding

    for normalize in (False, True):
        scale = 2 * math.pi if normalize else None
        out = position_embedding_sine(
            mask, num_pos_feats=F, temperature=10000,
            normalize=normalize, scale=scale)
        out = jax.block_until_ready(out)
        ref = _reference(mask, num_pos_feats=F, temperature=10000,
                         normalize=normalize,
                         scale=(2 * math.pi if scale is None else scale))
        assert out.shape == (B, 2 * F, H, W), out.shape
        err = float(jnp.max(jnp.abs(out - ref)))
        assert err < 1e-4, err

    print("KERNEL_OK")
</pallas_src>

<mosaic_0001>
module attributes {stable_mosaic.version = 11 : i64} {
  func.func @_pos_embed_sine_kernel(%arg0: i32, %arg1: i32, %arg2: memref<1x16x16xi32, #tpu.memory_space<vmem>>, %arg3: memref<16x16xbf16, #tpu.memory_space<vmem>>, %arg4: memref<16x16xbf16, #tpu.memory_space<vmem>>, %arg5: memref<1x1x128xf32, #tpu.memory_space<vmem>>, %arg6: memref<1x1x128xf32, #tpu.memory_space<vmem>>, %arg7: memref<1x1x128xi32, #tpu.memory_space<vmem>>, %arg8: memref<1x16x16x128xf32, #tpu.memory_space<vmem>>) attributes {dimension_semantics = [#tpu.dimension_semantics<parallel>, #tpu.dimension_semantics<parallel>], iteration_bounds = array<i64: 2, 1>, scalar_prefetch = 0 : i64, scratch_operands = 0 : i64, tpu.core_type = #tpu.core_type<tc>, window_params = [{transform_indices = @transform_0, window_bounds = array<i64: 1, 16, 16>}, {transform_indices = @transform_1, window_bounds = array<i64: 16, 16>}, {pipeline_mode = #tpu.pipeline_mode<synchronous>, transform_indices = @transform_2, window_bounds = array<i64: 16, 16>}, {pipeline_mode = #tpu.pipeline_mode<synchronous>, transform_indices = @transform_3, window_bounds = array<i64: 1, 1, 128>}, {pipeline_mode = #tpu.pipeline_mode<synchronous>, transform_indices = @transform_4, window_bounds = array<i64: 1, 1, 128>}, {pipeline_mode = #tpu.pipeline_mode<synchronous>, transform_indices = @transform_5, window_bounds = array<i64: 1, 1, 128>}, {transform_indices = @transform_6, window_bounds = array<i64: 1, 16, 16, 128>}]} {
    %c0 = arith.constant 0 : index
    %c0_0 = arith.constant 0 : index
    %c0_1 = arith.constant 0 : index
    %0 = vector.load %arg2[%c0, %c0_0, %c0_1] : memref<1x16x16xi32, #tpu.memory_space<vmem>>, vector<1x16x16xi32>
    %1 = vector.shape_cast %0 : vector<1x16x16xi32> to vector<16x16xi32>
    %c1_i32 = arith.constant 1 : i32
    %2 = vector.broadcast %c1_i32 : i32 to vector<16x16xi32>
    %3 = arith.subi %2, %1 : vector<16x16xi32>
    %4 = arith.sitofp %3 : vector<16x16xi32> to vector<16x16xbf16>
    %c0_2 = arith.constant 0 : index
    %c0_3 = arith.constant 0 : index
    %c0_4 = arith.constant 0 : index
    %5 = vector.load %arg2[%c0_2, %c0_3, %c0_4] : memref<1x16x16xi32, #tpu.memory_space<vmem>>, vector<1x16x16xi32>
    %6 = vector.shape_cast %5 : vector<1x16x16xi32> to vector<16x16xi32>
    %c1_i32_5 = arith.constant 1 : i32
    %7 = vector.broadcast %c1_i32_5 : i32 to vector<16x16xi32>
    %8 = arith.subi %7, %6 : vector<16x16xi32>
    %9 = arith.sitofp %8 : vector<16x16xi32> to vector<16x16xbf16>
    %c0_6 = arith.constant 0 : index
    %c0_7 = arith.constant 0 : index
    %10 = vector.load %arg3[%c0_6, %c0_7] : memref<16x16xbf16, #tpu.memory_space<vmem>>, vector<16x16xbf16>
    %cst = arith.constant dense<0.000000e+00> : vector<16x16xf32>
    %11 = tpu.matmul %10, %4, %cst {dimension_numbers = #tpu.dot_dimension_numbers<[1], [0], [0], [1], [0, 0, 1, 1], [], []>} : vector<16x16xbf16>, vector<16x16xbf16>, vector<16x16xf32> -> vector<16x16xf32>
    %c0_8 = arith.constant 0 : index
    %c0_9 = arith.constant 0 : index
    %12 = vector.load %arg4[%c0_8, %c0_9] : memref<16x16xbf16, #tpu.memory_space<vmem>>, vector<16x16xbf16>
    %cst_10 = arith.constant dense<0.000000e+00> : vector<16x16xf32>
    %13 = tpu.matmul %9, %12, %cst_10 {dimension_numbers = #tpu.dot_dimension_numbers<[1], [0], [0], [1], [0, 0, 1, 1], [], []>} : vector<16x16xbf16>, vector<16x16xbf16>, vector<16x16xf32> -> vector<16x16xf32>
    %c0_11 = arith.constant 0 : index
    %c0_12 = arith.constant 0 : index
    %c0_13 = arith.constant 0 : index
    %14 = vector.load %arg7[%c0_11, %c0_12, %c0_13] : memref<1x1x128xi32, #tpu.memory_space<vmem>>, vector<1x1x128xi32>
    %c0_i32 = arith.constant 0 : i32
    %15 = vector.broadcast %c0_i32 : i32 to vector<1x1x128xi32>
    %16 = arith.cmpi ne, %14, %15 : vector<1x1x128xi32>
    %17 = vector.shape_cast %11 : vector<16x16xf32> to vector<16x16x1xf32>
    %18 = vector.shape_cast %13 : vector<16x16xf32> to vector<16x16x1xf32>
    %19 = vector.shape_cast %16 : vector<1x1x128xi1> to vector<1x1x128xi1>
    %20 = vector.broadcast %19 : vector<1x1x128xi1> to vector<16x16x128xi1>
    %21 = vector.shape_cast %17 : vector<16x16x1xf32> to vector<16x16x1xf32>
    %22 = vector.broadcast %21 : vector<16x16x1xf32> to vector<16x16x128xf32>
    %23 = vector.shape_cast %18 : vector<16x16x1xf32> to vector<16x16x1xf32>
    %24 = vector.broadcast %23 : vector<16x16x1xf32> to vector<16x16x128xf32>
    %25 = arith.select %20, %22, %24 : vector<16x16x128xi1>, vector<16x16x128xf32>
    %c0_14 = arith.constant 0 : index
    %c0_15 = arith.constant 0 : index
    %c0_16 = arith.constant 0 : index
    %26 = vector.load %arg5[%c0_14, %c0_15, %c0_16] : memref<1x1x128xf32, #tpu.memory_space<vmem>>, vector<1x1x128xf32>
    %27 = vector.broadcast %26 : vector<1x1x128xf32> to vector<16x16x128xf32>
    %28 = arith.mulf %25, %27 : vector<16x16x128xf32>
    %c0_17 = arith.constant 0 : index
    %c0_18 = arith.constant 0 : index
    %c0_19 = arith.constant 0 : index
    %29 = vector.load %arg6[%c0_17, %c0_18, %c0_19] : memref<1x1x128xf32, #tpu.memory_space<vmem>>, vector<1x1x128xf32>
    %30 = vector.broadcast %29 : vector<1x1x128xf32> to vector<16x16x128xf32>
    %31 = arith.addf %28, %30 : vector<16x16x128xf32>
    %32 = math.sin %31 : vector<16x16x128xf32>
    %c0_20 = arith.constant 0 : index
    %c0_21 = arith.constant 0 : index
    %c0_22 = arith.constant 0 : index
    %c0_23 = arith.constant 0 : index
    %33 = vector.load %arg8[%c0_20, %c0_21, %c0_22, %c0_23] : memref<1x16x16x128xf32, #tpu.memory_space<vmem>>, vector<1x16x16x128xf32>
    %34 = vector.shape_cast %33 : vector<1x16x16x128xf32> to vector<16x16x128xf32>
    %35 = vector.shape_cast %32 : vector<16x16x128xf32> to vector<1x16x16x128xf32>
    tpu.vector_store %arg8[%c0_20, %c0_21, %c0_22, %c0_23], %35 {strides = array<i32>} : memref<1x16x16x128xf32, #tpu.memory_space<vmem>>, vector<1x16x16x128xf32>,
    return
  }
  func.func @transform_0(%arg0: i32, %arg1: i32) -> (i32, i32, i32) {
    %c0_i32 = arith.constant 0 : i32
    %c0_i32_0 = arith.constant 0 : i32
    %c0_i32_1 = arith.constant 0 : i32
    return %arg0, %c0_i32, %c0_i32_0 : i32, i32, i32
  }
  func.func @transform_1(%arg0: i32, %arg1: i32) -> (i32, i32) {
    %c0_i32 = arith.constant 0 : i32
    %c0_i32_0 = arith.constant 0 : i32
    return %arg1, %c0_i32 : i32, i32
  }
  func.func @transform_2(%arg0: i32, %arg1: i32) -> (i32, i32) {
    %c0_i32 = arith.constant 0 : i32
    %c0_i32_0 = arith.constant 0 : i32
    %c0_i32_1 = arith.constant 0 : i32
    return %c0_i32, %c0_i32_0 : i32, i32
  }
  func.func @transform_3(%arg0: i32, %arg1: i32) -> (i32, i32, i32) {
    %c0_i32 = arith.constant 0 : i32
    %c0_i32_0 = arith.constant 0 : i32
    %c0_i32_1 = arith.constant 0 : i32
    %c0_i32_2 = arith.constant 0 : i32
    return %c0_i32, %c0_i32_0, %c0_i32_1 : i32, i32, i32
  }
  func.func @transform_4(%arg0: i32, %arg1: i32) -> (i32, i32, i32) {
    %c0_i32 = arith.constant 0 : i32
    %c0_i32_0 = arith.constant 0 : i32
    %c0_i32_1 = arith.constant 0 : i32
    %c0_i32_2 = arith.constant 0 : i32
    return %c0_i32, %c0_i32_0, %c0_i32_1 : i32, i32, i32
  }
  func.func @transform_5(%arg0: i32, %arg1: i32) -> (i32, i32, i32) {
    %c0_i32 = arith.constant 0 : i32
    %c0_i32_0 = arith.constant 0 : i32
    %c0_i32_1 = arith.constant 0 : i32
    %c0_i32_2 = arith.constant 0 : i32
    return %c0_i32, %c0_i32_0, %c0_i32_1 : i32, i32, i32
  }
  func.func @transform_6(%arg0: i32, %arg1: i32) -> (i32, i32, i32, i32) {
    %c0_i32 = arith.constant 0 : i32
    %c0_i32_0 = arith.constant 0 : i32
    %c0_i32_1 = arith.constant 0 : i32
    return %arg0, %arg1, %c0_i32, %c0_i32_0 : i32, i32, i32, i32
  }
}

</mosaic_0001>

<bundles_post_ra>
// kernel: tpu_custom_call.1
= control target key start
LH: loop header
LB: loop body
LE: loop exit
PB: predicated region body
PF: predicated region fallthrough
CT: control target
= control target key end

     0   :  { %11 = vsyncpa [#allocation3], 0  ;;  %s8362_s0 = inlined_call_operand.hbm [shape: s32[2,16,16], index: 0, kind: input, shape index: {}]   ;;  %s8363_s1 = inlined_call_operand.hbm [shape: bf16[16,16], index: 1, kind: input, shape index: {}]   ;;  %s8364_s2 = inlined_call_operand.hbm [shape: bf16[16,16], index: 2, kind: input, shape index: {}]   ;;  %s8365_s3 = inlined_call_operand.vmem [shape: f32[1,1,128], index: 3, kind: input, shape index: {}]   ;;  %s8366_s4 = inlined_call_operand.vmem [shape: f32[1,1,128], index: 4, kind: input, shape index: {}]   ;;  %s8367_s5 = inlined_call_operand.vmem [shape: s32[1,1,128], index: 5, kind: input, shape index: {}]   ;;  %s8368_s6 = inlined_call_operand.hbm [shape: f32[2,16,16,128], index: 6, kind: output, shape index: {}]  }
   0x1   :  { %13 = vsyncpa [#allocation3 + $0x1], 0 }
   0x2   :  { %14 = vsyncpa [#allocation6], 0 }
   0x3   :  { %15 = vsyncpa [#allocation4], 0 }
   0x4   :  { %17 = vsyncpa [#allocation4 + $0x1], 0  ;;  %s5152_s21 = smov 0   ;;  %s5154_s22 = smov 0  }
   0x5   :  { %s5156_s23 = smov 0   ;;  %s5158_s24 = smov 0  }
   0x6   :  { %s5160_s25 = smov 0   ;;  %s5162_s26 = smov 0  }
   0x7 LB: > { %s4387_s27 = sadd.s32 4294967295, %s5096_s26   ;;  %s4388_s28 = sadd.s32 4294967294, %s5096_s26   ;;  %s5096_s26 = sphi %s5162_s26, %s23_s26   ;;  %s5092_s25 = sphi %s5160_s25, %s8506_s25   ;;  %s5088_s24 = sphi %s5158_s24, %s8505_s24   ;;  %s5084_s23 = sphi %s5156_s23, %s8504_s23   ;;  %s5080_s22 = sphi %s5154_s22, %s8503_s22   ;;  %s5076_s21 = sphi %s5152_s21, %s8502_s21  }
   0x8   : > { %p55_p0 = scmp.ne.s32.totalorder %s5080_s22, %s5076_s21  ;;  %p5186_p1 = scmp.eq.s32.totalorder %s4387_s27, 0 }
   0x9   : > { %p5190_p2 = scmp.eq.s32.totalorder %s4387_s27, 1  ;;  %p197_p3 = scmp.eq.s32.totalorder %s4388_s28, 1 }
   0xa   : > { %s8391_s29 = scalar_select %p5186_p1, 1, 0 }
   0xb   : > { %p5196_p4 = por %p5186_p1, %p55_p0  ;;  %p4389_p5 = scmp.ge.s32.totalorder %s5096_s26, 1 }
   0xc   : > { %p5201_p6 = por %p197_p3, %p55_p0  ;;  %p204_p7 = scmp.lt.s32.totalorder %s5096_s26, 3 }
   0xd   : > { %s8393_s7 = scalar_select %p5196_p4, 1, 0 }
   0xe   : > { %s8394_s8 = scalar_select %p5201_p6, 1, 0 }
   0xf   : > { %p5206_p8 = pnand %p4389_p5, %p204_p7  ;;  %s5098_s10 = smov [#allocation5]  }
  0x10   : > { %8395 = sst [smem:[#allocation12_spill]] %s8394_s8  ;;  %s219_s11 = sshll.u32 %s5098_s10, 4  ;;  %s5210_s11 = int_to_ptr.vmem [resolvable:$true] %s219_s11 }
  0x11   : > { %p4698_p9 = pneg %p5206_p8  ;;  %s5099_s13 = smov [#allocation7]  }
  0x12   : > { %s232_s14 = sshll.u32 %s5099_s13, 4  ;;  %s4924_s17 = scalar_lea.hbm %s8363_s1, 128  ;;  %s5221_s14 = int_to_ptr.vmem [resolvable:$true] %s232_s14 }
  0x13   : > { %p5217_p11 = pnand %p4698_p9, %p5186_p1  ;;  %p4925_p12 = scmp.ne.s32.totalorder %s8363_s1, %s4924_s17 }
  0x14   : > { %p4931_p5 = scmp.lt.u32.totalorder %s4924_s17, %s8363_s1 }
  0x15   : > { %p4926_p13 = pneg %p5217_p11 }
  0x17   : > { %p4927_p0 = pnand %p4926_p13, %p4925_p12 }
  0x19   : > { %p4928_p3 = pneg %p4927_p0 }
  0x1b   : > { %p4933_p7 = pnand %p4931_p5, %p4928_p3 }
  0x1d   : > { %4936 = shalt.err (!%p4933_p7)
}
  0x1e   : > { %s4937_s28 = scalar_lea.vmem %s5210_s11, 128  ;;  %p4945_p1 = scmp.lt.s32.totalorder %s5210_s11, %s5210_s11 }
  0x1f   : > { %p4938_p9 = scmp.ne.s32.totalorder %s5210_s11, %s4937_s28  ;;  %p4946_p12 = scmp.lt.s32.totalorder %s4937_s28, %s4937_s28 }
  0x21   : > { %p4940_p10 = pnand %p4938_p9, %p4926_p13  ;;  %p4947_p0 = por %p4946_p12, %p4945_p1 }
  0x23   : > { %p4941_p6 = pneg %p4940_p10 }
  0x25   : > { %p4948_p4 = pnand %p4947_p0, %p4941_p6 }
  0x27   : > { %4951 = shalt.err (!%p4948_p4)
}
  0x28   : > { %s5100_s10 = smov 64   ;;  %s5101_s13 = smov 4  }
  0x29   : > { %4701 = dma.hbm_to_vmem [thread:$0]  (!%p5217_p11), %s8363_s1, 128, %s5210_s11, [#allocation6], %s5100_s10, %s5100_s10, %s5101_s13  }
  0x2a   : > { %s4952_s19 = scalar_lea.hbm %s8364_s2, 128 }
  0x2b   : > { %p4953_p1 = scmp.ne.s32.totalorder %s8364_s2, %s4952_s19  ;;  %p4959_p10 = scmp.lt.u32.totalorder %s4952_s19, %s8364_s2 }
  0x2d   : > { %p4955_p4 = pnand %p4953_p1, %p4926_p13 }
  0x2f   : > { %p4956_p6 = pneg %p4955_p4 }
  0x31   : > { %p4961_p3 = pnand %p4959_p10, %p4956_p6 }
  0x33   : > { %4964 = shalt.err (!%p4961_p3)
}
  0x34   : > { %s4965_s11 = scalar_lea.vmem %s5221_s14, 128  ;;  %p4973_p12 = scmp.lt.s32.totalorder %s5221_s14, %s5221_s14 }
  0x35   : > { %p4966_p5 = scmp.ne.s32.totalorder %s5221_s14, %s4965_s11  ;;  %p4974_p0 = scmp.lt.s32.totalorder %s4965_s11, %s4965_s11 }
  0x37   : > { %p4968_p7 = pnand %p4966_p5, %p4926_p13  ;;  %p4975_p1 = por %p4974_p0, %p4973_p12 }
  0x39   : > { %p4969_p9 = pneg %p4968_p7 }
  0x3b   : > { %p4976_p4 = pnand %p4975_p1, %p4969_p9 }
  0x3d   : > { %4979 = shalt.err (!%p4976_p4)
}
  0x3e   : > { %4704 = dma.hbm_to_vmem [thread:$0]  (!%p5217_p11), %s8364_s2, 128, %s5221_s14, [#allocation6], %s5100_s10, %s5100_s10, %s5101_s13  }
  0x3f   : > { %s35_s16 = sadd.s32 1, %s5092_s25  ;;  %s42_s17 = sadd.s32 1, %s5084_s23 }
  0x40   : > { %p37_p13 = scmp.ge.s32.totalorder %s35_s16, 2  ;;  %p49_p6 = scmp.ne.s32.totalorder %s5084_s23, %s5080_s22 }
  0x41   : > { %p50_p10 = scmp.eq.s32.totalorder %s5096_s26, 0  ;;  %p4715_p3 = scmp.lt.s32.totalorder %s5096_s26, 2 }
  0x42   : > { %s8508_s16 = smov (%p37_p13, %s35_s16), 0  ;;  %p5285_p7 = por %p5190_p2, %p49_p6 }
  0x43   : > { %p51_p5 = por %p50_p10, %p49_p6  ;;  %s39_s18 = ssub.s32 %s5092_s25, %s8508_s16 }
  0x44   : > { %s8398_s12 = scalar_select %p5285_p7, 1, 0 }
  0x45   : > { %s255_s19 = sand.u32 1, %s5084_s23   ;;  %p40_p9 = scmp.eq.s32.totalorder %s39_s18, 0 }
  0x46   : > { %s4393_s14 = sshll.u32 %s255_s19, 4  ;;  %s4540_s10 = sshll.u32 %s5092_s25, 8 }
  0x47   : > { %s5294_s13 = scalar_select %p40_p9, %s5084_s23, %s42_s17  }
  0x48   : > { %s5299_s28 = scalar_lea.hbm %s8362_s0, %s4540_s10  ;;  %s259_s30 = scalar_lea.vmem [#allocation2], %s4393_s14 }
  0x49   : > { %s266_s11 = sshll.u32 %s259_s30, 4  ;;  %p5303_p2 = pnand %p4715_p3, %p51_p5  ;;  %s5307_s11 = int_to_ptr.vmem [resolvable:$true] %s266_s11 }
  0x4a   : > { %s5309_s15 = scalar_lea.sflag [#allocation3], %s255_s19  ;;  %s4980_s17 = scalar_lea.hbm %s5299_s28, 256 }
  0x4b   : > { %p4981_p11 = scmp.ne.s32.totalorder %s5299_s28, %s4980_s17  ;;  %p4982_p12 = pneg %p5303_p2 }
  0x4c   : > { %s4985_s10 = scalar_lea.hbm %s8362_s0, 512  ;;  %p4986_p4 = scmp.lt.u32.totalorder %s5299_s28, %s8362_s0 }
  0x4d   : > { %p4983_p0 = pnand %p4982_p12, %p4981_p11  ;;  %p4987_p13 = scmp.lt.u32.totalorder %s4985_s10, %s4980_s17 }
  0x4e   : > { %p4989_p10 = scmp.lt.u32.totalorder %s4980_s17, %s5299_s28 }
  0x4f   : > { %p4984_p1 = pneg %p4983_p0  ;;  %p4988_p6 = por %p4987_p13, %p4986_p4 }
  0x51   : > { %p4990_p3 = por %p4989_p10, %p4988_p6 }
  0x53   : > { %p4991_p5 = pnand %p4990_p3, %p4984_p1 }
  0x55   : > { %4994 = shalt.err (!%p4991_p5)
}
  0x56   : > { %s4995_s19 = scalar_lea.vmem %s5307_s11, 256  ;;  %s5102_s30 = smov [#allocation2]  }
  0x57   : > { %p4996_p9 = scmp.ne.s32.totalorder %s5307_s11, %s4995_s19  ;;  %s5000_s18 = sshll.u32 %s5102_s30, 4  ;;  %s5001_s18 = int_to_ptr.vmem [resolvable:$false] %s5000_s18 }
  0x58   : > { %s5002_s14 = scalar_lea.vmem %s5001_s18, 512  ;;  %p5003_p7 = scmp.lt.s32.totalorder %s5307_s11, %s5001_s18 }
  0x59   : > { %p4998_p11 = pnand %p4996_p9, %p4982_p12  ;;  %p5004_p4 = scmp.lt.s32.totalorder %s5002_s14, %s4995_s19 }
  0x5b   : > { %p4999_p0 = pneg %p4998_p11  ;;  %p5005_p13 = por %p5004_p4, %p5003_p7 }
  0x5d   : > { %p5006_p6 = pnand %p5005_p13, %p4999_p0 }
  0x5f   : > { %5009 = shalt.err (!%p5006_p6)
}
  0x60   : > { %s5103_s17 = smov 128   ;;  %s5104_s10 = smov 8  }
  0x61   : > { %4708 = dma.hbm_to_vmem [thread:$0]  (!%p5303_p2), %s5299_s28, 256, %s5307_s11, %s5309_s15, %s5103_s17, %s5103_s17, %s5104_s10  }
  0x62   : > { %278 = sbr.rel (%p5206_p8) target bundleno = 1374 (0x55e), region = 44 }
  0x69   : > { %s5340_s20 = sand.u32 1, %s5080_s22   ;;  %p8400_p7 = scmp.ne.s32.totalorder %s8393_s7, 0 }
  0x6a   : > { %s4397_s27 = sshll.u32 %s5340_s20, 4  ;;  %s281_s19 = scalar_lea.sflag [#allocation3], %s5340_s20 }
  0x6b   : > { %s284_s30 = scalar_lea.vmem [#allocation2], %s4397_s27 }
  0x6c   : > { %5063 = dma.done.wait (%p8400_p7), %s281_s19, 256  }
  0x6d   : > { %5065 = vsyncadd (%p8400_p7), %s281_s19, 4294967040  ;;  %p8401_p12 = scmp.ne.s32.totalorder %s8391_s29, 0 }
  0x6f   : > { %5067 = dma.done.wait (%p8401_p12), [#allocation6], 256  }
  0x70   : > { %5069 = vsyncadd (%p8401_p12), [#allocation6], 4294967040  ;;  %v5105_v0 = vmov 0.0   ;;  %vm5106_vm0 = vmmov 0   ;;  %v4784_v1 = vld [vmem:[#allocation7] sm:$0xff]   ;;  %v324_v2 = vld [vmem:[%s284_s30] sm:$0xff]  ;;  %v437_v10 = vlaneseq }
  0x71   : > { %4552 = vmatprep.subr.bf16.mxu1 %v5105_v0  ;;  %4554 = vmatprep.mubr.msk.bf16.mxu1 %vm5106_vm0, %v5105_v0  ;;  %v325_v3 = vld [vmem:[%s284_s30 + $0x8] sm:$0xff]  ;;  %v326_v4 = vsub.s32 1, %v324_v2  ;;  %vm338_vm1 = vcmask 130048   ;;  %v4785_v9 = vld [vmem:[#allocation5] sm:$0xff]   ;;  %s4400_s15 = sshll.u32 %s5340_s20, 8  ;;  %s4541_s7 = sshll.u32 %s5088_s24, 12 }
  0x72   : > { %4546 = vmatprep.subr.bf16.mxu0 %v5105_v0  ;;  %4548 = vmatprep.mubr.msk.bf16.mxu0 %vm5106_vm0, %v5105_v0  ;;  %v327_v5 = vsub.s32 1, %v325_v3  ;;  %v438_v11 = vshrl.u32 %v437_v10, 7  ;;  %s5813_s18 = scalar_lea.vmem [#allocation8], %s4400_s15  ;;  %s8309_s8 = scalar_lea.hbm %s8368_s6, %s4541_s7 }
  0x73   : > { %4553 = vmatpush3.bf16.msra.mxu1 %v4784_v1  ;;  %v328_v6 = vcvt.s32.f32 %v326_v4  ;;  %s4282_s9 = sshll.u32 %s5813_s18, 4  ;;  %s4266_s24 = scalar_lea.sflag [#allocation4], %s5340_s20  ;;  %s8311_s9 = int_to_ptr.vmem [resolvable:$true] %s4282_s9 }
  0x74   : > { %v329_v7 = vcvt.s32.f32 %v327_v5  ;;  %v5352_v12 = vsub.s32 0, %v438_v11  ;;  %v5355_v16 = vsub.s32 1, %v438_v11  ;;  %v5360_v22 = vsub.s32 2, %v438_v11  ;;  %s5010_s15 = scalar_lea.vmem %s8311_s9, 4096  ;;  %p8498_p2 = scmp.ne.s32.totalorder %s8398_s12, 0 }
  0x75   : > { %v5364_v24 = vsub.s32 3, %v438_v11  ;;  %v5366_v25 = vsub.s32 4, %v438_v11  ;;  %v5368_v26 = vsub.s32 5, %v438_v11  ;;  %v5370_v27 = vsub.s32 6, %v438_v11  ;;  %p5011_p8 = scmp.ne.s32.totalorder %s8311_s9, %s5010_s15  ;;  %s5114_s14 = smov [#allocation8]  }
  0x76   : > { %v330_v8 = vpack.c.bf16 %v329_v7, %v328_v6  ;;  %v5372_v29 = vsub.s32 7, %v438_v11  ;;  %s5014_s17 = sshll.u32 %s5114_s14, 4  ;;  %s5015_s17 = int_to_ptr.vmem [resolvable:$false] %s5014_s17 }
  0x77   : > { %p5012_p1 = pnand %p5011_p8, %p8498_p2  ;;  %s5016_s10 = scalar_lea.vmem %s5015_s17, 8192 }
  0x78   : > { %4555 = vmatmul.mubr.msk.bf16.vlgmr.msra.gmra.mrb[0].mxu1 %vm338_vm1, %v330_v8  ;;  %4547 = vmatpush3.bf16.msra.mxu0 %v330_v8  ;;  %p5017_p3 = scmp.lt.s32.totalorder %s8311_s9, %s5015_s17  ;;  %p5018_p5 = scmp.lt.s32.totalorder %s5016_s10, %s5010_s15 }
  0x79   : > { %p5013_p10 = pneg %p5012_p1 }
  0x7a   : > { %p5019_p9 = por %p5018_p5, %p5017_p3 }
  0x7b   : > { %4549 = vmatmul.mubr.msk.bf16.vlgmr.msra.gmra.mrb[0].mxu0 %vm338_vm1, %v4785_v9 }
  0x7c   : > { %p5020_p11 = pnand %p5019_p9, %p5013_p10 }
 0x14b   : > { %v428_v13 = vpop.f32.mrb[0].mxu1 }
 0x14c   : > { %v4556_v14 = vpop.f32.mrb[1].mxu1  ;;  %v616_v15 = vrot.slane %v428_v13, %v5352_v12  ;;  %v627_v21 = vrot.slane %v428_v13, %v5355_v16  ;;  %v638_v36 = vrot.slane %v428_v13, %v5360_v22  ;;  %v649_v39 = vrot.slane %v428_v13, %v5364_v24 }
 0x14d   : > { %v431_v17 = vpop.f32.mrb[2].mxu1  ;;  %v660_v40 = vrot.slane %v428_v13, %v5366_v25  ;;  %v671_v41 = vrot.slane %v428_v13, %v5368_v26  ;;  %v682_v42 = vrot.slane %v428_v13, %v5370_v27  ;;  %v693_v43 = vrot.slane %v428_v13, %v5372_v29 }
 0x14e   : > { %622 = vbcast.lane.b32.xlu1 %v616_v15, 264  ;;  %618 = vbcast.lane.b32.xlu0 %v616_v15, 256  ;;  %v4557_v18 = vpop.f32.mrb[3].mxu1  ;;  %v5357_v19 = vpop.f32.mrb[0].mxu0  ;;  %v5404_v38 = vrot.slane %v431_v17, %v5372_v29  ;;  %v704_v44 = vrot.slane %v431_v17, %v5352_v12  ;;  %v715_v45 = vrot.slane %v431_v17, %v5355_v16 }
 0x14f   : > { %v4550_v20 = vpop.f32.mrb[1].mxu0  ;;  %v726_v46 = vrot.slane %v431_v17, %v5360_v22  ;;  %v737_v47 = vrot.slane %v431_v17, %v5364_v24  ;;  %v748_v48 = vrot.slane %v431_v17, %v5366_v25  ;;  %v759_v49 = vrot.slane %v431_v17, %v5368_v26 }
 0x150   : > { %v5362_v23 = vpop.f32.mrb[2].mxu0  ;;  %v770_v50 = vrot.slane %v431_v17, %v5370_v27  ;;  %v451_v51 = vrot.slane %v5357_v19, %v5355_v16  ;;  %v440_v52 = vrot.slane %v5357_v19, %v5352_v12  ;;  %v462_v53 = vrot.slane %v5357_v19, %v5360_v22 }
 0x151   : > { %v4551_v28 = vpop.f32.mrb[3].mxu0  ;;  %v5376_v30 = vrot.slane %v5362_v23, %v5355_v16  ;;  %v5380_v31 = vrot.slane %v5362_v23, %v5360_v22  ;;  %v5384_v32 = vrot.slane %v5362_v23, %v5364_v24  ;;  %v5388_v33 = vrot.slane %v5362_v23, %v5366_v25 }
 0x152   : > { %633 = vbcast.lane.b32.xlu1 %v627_v21, 264  ;;  %629 = vbcast.lane.b32.xlu0 %v627_v21, 256  ;;  %v5392_v34 = vrot.slane %v5362_v23, %v5368_v26  ;;  %v5396_v35 = vrot.slane %v5362_v23, %v5370_v27  ;;  %v5401_v37 = vrot.slane %v5362_v23, %v5372_v29  ;;  %v435_v21 = vld [vmem:[%s8367_s5] sm:$0x1] }
 0x153   : > { %v473_v54 = vrot.slane %v5357_v19, %v5364_v24  ;;  %v484_v55 = vrot.slane %v5357_v19, %v5366_v25  ;;  %v495_v56 = vrot.slane %v5357_v19, %v5368_v26  ;;  %v506_v57 = vrot.slane %v5357_v19, %v5370_v27 }
 0x154   : > { %v517_v58 = vrot.slane %v5357_v19, %v5372_v29  ;;  %v528_v59 = vrot.slane %v5362_v23, %v5352_v12  ;;  %vm436_vm2 = vcmp.ne.s32.totalorder %v435_v21, 0  ;;  %v5107_v24 = vmov 0  }
 0x155   : > { %v789_v25 = vsel %vm436_vm2, 1, %v5107_v24 }
 0x156   : > { %644 = vbcast.lane.b32.xlu1 %v638_v36, 264  ;;  %640 = vbcast.lane.b32.xlu0 %v638_v36, 256  ;;  %v793_v28 = vrot.slane %v789_v25, %v5352_v12 }
 0x158   : > { %vm5510_vm3 = vcmp.eq.s32.totalorder %v793_v28, 1 }
 0x15a   : > { %655 = vbcast.lane.b32.xlu1 %v649_v39, 264  ;;  %651 = vbcast.lane.b32.xlu0 %v649_v39, 256 }
 0x15e   : > { %666 = vbcast.lane.b32.xlu1 %v660_v40, 264  ;;  %662 = vbcast.lane.b32.xlu0 %v660_v40, 256 }
 0x162   : > { %677 = vbcast.lane.b32.xlu1 %v671_v41, 264  ;;  %673 = vbcast.lane.b32.xlu0 %v671_v41, 256 }
 0x166   : > { %688 = vbcast.lane.b32.xlu1 %v682_v42, 264  ;;  %684 = vbcast.lane.b32.xlu0 %v682_v42, 256 }
 0x16a   : > { %699 = vbcast.lane.b32.xlu1 %v693_v43, 264  ;;  %695 = vbcast.lane.b32.xlu0 %v693_v43, 256 }
 0x16e   : > { %710 = vbcast.lane.b32.xlu1 %v704_v44, 264  ;;  %706 = vbcast.lane.b32.xlu0 %v704_v44, 256 }
 0x172   : > { %721 = vbcast.lane.b32.xlu1 %v715_v45, 264  ;;  %717 = vbcast.lane.b32.xlu0 %v715_v45, 256 }
 0x176   : > { %732 = vbcast.lane.b32.xlu1 %v726_v46, 264  ;;  %728 = vbcast.lane.b32.xlu0 %v726_v46, 256 }
 0x17a   : > { %743 = vbcast.lane.b32.xlu1 %v737_v47, 264  ;;  %739 = vbcast.lane.b32.xlu0 %v737_v47, 256 }
 0x17e   : > { %754 = vbcast.lane.b32.xlu1 %v748_v48, 264  ;;  %750 = vbcast.lane.b32.xlu0 %v748_v48, 256 }
 0x182   : > { %765 = vbcast.lane.b32.xlu1 %v759_v49, 264  ;;  %761 = vbcast.lane.b32.xlu0 %v759_v49, 256 }
 0x186   : > { %776 = vbcast.lane.b32.xlu1 %v770_v50, 264  ;;  %772 = vbcast.lane.b32.xlu0 %v770_v50, 256 }
 0x18a   : > { %453 = vbcast.lane.b32.xlu1 %v451_v51, 256  ;;  %442 = vbcast.lane.b32.xlu0 %v440_v52, 256 }
 0x18e   : > { %457 = vbcast.lane.b32.xlu1 %v451_v51, 264  ;;  %446 = vbcast.lane.b32.xlu0 %v440_v52, 264 }
 0x192   : > { %468 = vbcast.lane.b32.xlu1 %v462_v53, 264  ;;  %464 = vbcast.lane.b32.xlu0 %v462_v53, 256 }
 0x196   : > { %479 = vbcast.lane.b32.xlu1 %v473_v54, 264  ;;  %475 = vbcast.lane.b32.xlu0 %v473_v54, 256 }
 0x19a   : > { %490 = vbcast.lane.b32.xlu1 %v484_v55, 264  ;;  %486 = vbcast.lane.b32.xlu0 %v484_v55, 256 }
 0x19e   : > { %501 = vbcast.lane.b32.xlu1 %v495_v56, 264  ;;  %497 = vbcast.lane.b32.xlu0 %v495_v56, 256 }
 0x1a2   : > { %512 = vbcast.lane.b32.xlu1 %v506_v57, 264  ;;  %508 = vbcast.lane.b32.xlu0 %v506_v57, 256 }
 0x1a6   : > { %523 = vbcast.lane.b32.xlu1 %v517_v58, 264  ;;  %519 = vbcast.lane.b32.xlu0 %v517_v58, 256 }
 0x1aa   : > { %534 = vbcast.lane.b32.xlu1 %v528_v59, 264  ;;  %530 = vbcast.lane.b32.xlu0 %v528_v59, 256 }
 0x1ae   : > { %545 = vbcast.lane.b32.xlu1 %v5376_v30, 264  ;;  %541 = vbcast.lane.b32.xlu0 %v5376_v30, 256 }
 0x1b2   : > { %556 = vbcast.lane.b32.xlu1 %v5380_v31, 264  ;;  %552 = vbcast.lane.b32.xlu0 %v5380_v31, 256 }
 0x1b6   : > { %567 = vbcast.lane.b32.xlu1 %v5384_v32, 264  ;;  %563 = vbcast.lane.b32.xlu0 %v5384_v32, 256  ;;  %v5517_v32 = vld [vmem:[%s8365_s3] ss:$0 sm:$0xff] }
 0x1ba   : > { %578 = vbcast.lane.b32.xlu1 %v5388_v33, 264  ;;  %574 = vbcast.lane.b32.xlu0 %v5388_v33, 256 }
 0x1be   : > { %589 = vbcast.lane.b32.xlu1 %v5392_v34, 264  ;;  %585 = vbcast.lane.b32.xlu0 %v5392_v34, 256 }
 0x1c0   : > { %v5446_v60 = vpop.permute.xlu1 %622  ;;  %v619_v61 = vpop.permute.xlu0 %618 }
 0x1c2   : > { %600 = vbcast.lane.b32.xlu1 %v5396_v35, 264  ;;  %596 = vbcast.lane.b32.xlu0 %v5396_v35, 256  ;;  %v5522_v35 = vld [vmem:[%s8366_s4] ss:$0 sm:$0xff] }
 0x1c4   : > { %v634_v62 = vpop.permute.xlu1 %633  ;;  %v630_v63 = vpop.permute.xlu0 %629 }
 0x1c6   : > { %611 = vbcast.lane.b32.xlu1 %v5401_v37, 264  ;;  %607 = vbcast.lane.b32.xlu0 %v5401_v37, 256 }
 0x1c8   : > { %v5452_v0 = vpop.permute.xlu1 %644  ;;  %v5454_v1 = vpop.permute.xlu0 %640 }
 0x1ca   : > { %787 = vbcast.lane.b32.xlu1 %v5404_v38, 264  ;;  %783 = vbcast.lane.b32.xlu0 %v5404_v38, 256 }
 0x1cc   : > { %v5458_v2 = vpop.permute.xlu1 %655  ;;  %v5460_v3 = vpop.permute.xlu0 %651 }
 0x1d0   : > { %v5462_v4 = vpop.permute.xlu1 %666  ;;  %v5464_v5 = vpop.permute.xlu0 %662 }
 0x1d4   : > { %v5466_v6 = vpop.permute.xlu1 %677  ;;  %v5468_v7 = vpop.permute.xlu0 %673 }
 0x1d8   : > { %v5470_v8 = vpop.permute.xlu1 %688  ;;  %v5472_v9 = vpop.permute.xlu0 %684 }
 0x1dc   : > { %v5474_v10 = vpop.permute.xlu1 %699  ;;  %v5476_v11 = vpop.permute.xlu0 %695 }
 0x1e0   : > { %v5478_v13 = vpop.permute.xlu1 %710  ;;  %v5480_v14 = vpop.permute.xlu0 %706 }
 0x1e4   : > { %v5482_v15 = vpop.permute.xlu1 %721  ;;  %v5484_v16 = vpop.permute.xlu0 %717 }
 0x1e5   : > { %8402 = vst [vmem:[#allocation13_spill] sm:$0xff] %v5484_v16 }
 0x1e8   : > { %v5486_v17 = vpop.permute.xlu1 %732  ;;  %v5488_v18 = vpop.permute.xlu0 %728 }
 0x1e9   : > { %8403 = vst [vmem:[#allocation14_spill] sm:$0xff] %v5486_v17  ;;  %8404 = vst [vmem:[#allocation15_spill] sm:$0xff] %v5488_v18 }
 0x1ec   : > { %v5490_v19 = vpop.permute.xlu1 %743  ;;  %v5492_v20 = vpop.permute.xlu0 %739 }
 0x1ed   : > { %8405 = vst [vmem:[#allocation16_spill] sm:$0xff] %v5490_v19  ;;  %8406 = vst [vmem:[#allocation17_spill] sm:$0xff] %v5492_v20 }
 0x1f0   : > { %v5497_v22 = vpop.permute.xlu1 %754  ;;  %v5499_v23 = vpop.permute.xlu0 %750 }
 0x1f1   : > { %8407 = vst [vmem:[#allocation18_spill] sm:$0xff] %v5497_v22  ;;  %8408 = vst [vmem:[#allocation19_spill] sm:$0xff] %v5499_v23 }
 0x1f4   : > { %v5501_v26 = vpop.permute.xlu1 %765  ;;  %v5503_v27 = vpop.permute.xlu0 %761 }
 0x1f5   : > { %8409 = vst [vmem:[#allocation20_spill] sm:$0xff] %v5501_v26  ;;  %8410 = vst [vmem:[#allocation21_spill] sm:$0xff] %v5503_v27 }
 0x1f8   : > { %v5506_v29 = vpop.permute.xlu1 %776  ;;  %v5508_v30 = vpop.permute.xlu0 %772 }
 0x1f9   : > { %8411 = vst [vmem:[#allocation22_spill] sm:$0xff] %v5506_v29  ;;  %8412 = vst [vmem:[#allocation23_spill] sm:$0xff] %v5508_v30 }
 0x1fc   : > { %v454_v33 = vpop.permute.xlu1 %453  ;;  %v443_v34 = vpop.permute.xlu0 %442 }
 0x1fd   : > { %v797_v12 = vsel %vm5510_vm3, %v454_v33, %v630_v63  ;;  %v795_v36 = vsel %vm5510_vm3, %v443_v34, %v619_v61 }
 0x1fe   : > { %v836_v37 = vmul.f32 %v5517_v32, %v797_v12  ;;  %v834_v38 = vmul.f32 %v5517_v32, %v795_v36 }
 0x200   : > { %v5531_v39 = vadd.f32 %v5522_v35, %v836_v37  ;;  %v5534_v40 = vadd.f32 %v5522_v35, %v834_v38  ;;  %v458_v41 = vpop.permute.xlu1 %457  ;;  %v447_v52 = vpop.permute.xlu0 %446  ;;  %v8384_v38 = vmov 683565275  }
 0x201   : > { %v798_v42 = vsel %vm5510_vm3, %v458_v41, %v634_v62  ;;  %v796_v57 = vsel %vm5510_vm3, %v447_v52, %v5446_v60  ;;  %v8382_v52 = vmov 920167782  }
 0x202   : > { %v8375_v43 = vand.u32 2147483647, %v5531_v39  ;;  %v1116_v44 = vand.u32 2139095040, %v5531_v39  ;;  %v8374_v45 = vand.u32 2147483647, %v5534_v40  ;;  %v908_v46 = vand.u32 2139095040, %v5534_v40 }
 0x203   : > { %v837_v48 = vmul.f32 %v5517_v32, %v798_v42  ;;  %v5555_v33 = vmul.f32 %v5517_v32, %v796_v57  ;;  %vm1115_vm1 = vcmp.lt.s32.totalorder %v5531_v39, 0  ;;  %vm907_vm2 = vcmp.lt.s32.totalorder %v5534_v40, 0 }
 0x204   : > { %v1117_v47 = vshrl.u32 %v1116_v44, 23  ;;  %v1120_v49 = vand.u32 8388607, %v8375_v43  ;;  %v909_v50 = vshrl.u32 %v908_v46, 23  ;;  %v912_v51 = vand.u32 8388607, %v8374_v45 }
 0x205   : > { %v5548_v54 = vadd.f32 %v5522_v35, %v837_v48  ;;  %v8380_v46 = vmov 2475754826   ;;  %v8378_v48 = vmov 2131351028  }
 0x206   : > { %v4415_v53 = vadd.s32 4294967169, %v1117_v47  ;;  %v4407_v55 = vadd.s32 4294967169, %v909_v50  ;;  %v1121_v58 = vor.u32 8388608, %v1120_v49  ;;  %v913_v59 = vor.u32 8388608, %v912_v51 }
 0x207   : > { %v1220_v62 = vand.u32 2139095040, %v5548_v54  ;;  %v8376_v50 = vmov 2102212464  }
 0x208   : > { %v1123_v56 = vadd.s32 1, %v4415_v53  ;;  %v915_v61 = vadd.s32 1, %v4407_v55  ;;  %v5557_v34 = vshll.u32 %v1121_v58, 8  ;;  %v5561_v60 = vshll.u32 %v913_v59, 8 }
 0x209   : > { %v1221_v21 = vshrl.u32 %v1220_v62, 23 }
 0x20a   : > { %vm1124_vm4 = vcmp.gt.s32.totalorder %v1123_v56, 0  ;;  %vm916_vm5 = vcmp.gt.s32.totalorder %v915_v61, 0 }
 0x20b   : > { %v1125_v63 = vsel %vm1124_vm4, %v1123_v56, 0  ;;  %v917_v28 = vsel %vm916_vm5, %v915_v61, 0  ;;  %v5565_v44 = vadd.s32 4294967169, %v1221_v21  ;;  %v8387_v61 = vmov 1326507024  }
 0x20c   : > { %v1126_v24 = vshrl.u32 %v1125_v63, 5  ;;  %v1127_v25 = vand.u32 31, %v1125_v63  ;;  %v5559_v12 = vshrl.u32 %v917_v28, 5  ;;  %v919_v42 = vand.u32 31, %v917_v28 }
 0x20e   : > { %v1128_v37 = vsub.s32 32, %v1127_v25  ;;  %v1130_v41 = vshll.u32 %v8384_v38, %v1127_v25  ;;  %v1133_v47 = vshll.u32 %v8380_v46, %v1127_v25  ;;  %v1136_v49 = vshll.u32 %v8378_v48, %v1127_v25 }
 0x20f   : > { %v1139_v51 = vshll.u32 %v8376_v50, %v1127_v25  ;;  %v1142_v53 = vshll.u32 %v8382_v52, %v1127_v25  ;;  %vm1145_vm6 = vcmp.lt.s32.totalorder %v1126_v24, 1  ;;  %vm1146_vm7 = vcmp.lt.s32.totalorder %v1126_v24, 2 }
 0x210   : > { %v1131_v55 = vshrl.u32 %v8380_v46, %v1128_v37  ;;  %v1134_v56 = vshrl.u32 %v8378_v48, %v1128_v37  ;;  %v1137_v57 = vshrl.u32 %v8376_v50, %v1128_v37  ;;  %v1129_v58 = vshrl.u32 %v8384_v38, %v1128_v37 }
 0x211   : > { %v1140_v59 = vshrl.u32 %v8382_v52, %v1128_v37  ;;  %v1143_v62 = vshrl.u32 %v8387_v61, %v1128_v37  ;;  %v920_v45 = vsub.s32 32, %v919_v42  ;;  %vm1147_vm8 = vcmp.lt.s32.totalorder %v1126_v24, 3 }
 0x212   : > { %v1132_v63 = vor.u32 %v1131_v55, %v1130_v41  ;;  %v1135_v21 = vor.u32 %v1134_v56, %v1133_v47  ;;  %v1138_v28 = vor.u32 %v1137_v57, %v1136_v49  ;;  %vm1148_vm9 = vcmp.lt.s32.totalorder %v1126_v24, 4 }
 0x213   : > { %v1141_v25 = vor.u32 %v1140_v59, %v1139_v51  ;;  %v1144_v43 = vor.u32 %v1143_v62, %v1142_v53  ;;  %v8415_v37 = vmov 683565275   ;;  %v8416_v49 = vmov 2475754826  }
 0x214   : > { %v1149_v36 = vsel %vm1145_vm6, %v1129_v58, %v1132_v63  ;;  %v1150_v50 = vsel %vm1148_vm9, %v1138_v28, 2102212464  ;;  %v1153_v48 = vsel %vm1145_vm6, %v1132_v63, %v1135_v21  ;;  %v1157_v46 = vsel %vm1145_vm6, %v1135_v21, %v1138_v28 }
 0x215   : > { %v1151_v52 = vsel %vm1147_vm8, %v1135_v21, %v1150_v50  ;;  %v1154_v38 = vsel %vm1148_vm9, %v1141_v25, 920167782  ;;  %v1158_v30 = vsel %vm1148_vm9, %v1144_v43, 1326507024  ;;  %v922_v61 = vshll.u32 %v8415_v37, %v919_v42 }
 0x216   : > { %v1155_v41 = vsel %vm1147_vm8, %v1138_v28, %v1154_v38  ;;  %v1159_v47 = vsel %vm1147_vm8, %v1141_v25, %v1158_v30  ;;  %v923_v55 = vshrl.u32 %v8416_v49, %v920_v45  ;;  %v925_v51 = vshll.u32 %v8416_v49, %v919_v42 }
 0x217   : > { %v1152_v53 = vsel %vm1146_vm7, %v1149_v36, %v1151_v52  ;;  %v1156_v56 = vsel %vm1146_vm7, %v1153_v48, %v1155_v41  ;;  %v1160_v57 = vsel %vm1146_vm7, %v1157_v46, %v1159_v47  ;;  %v8417_v58 = vmov 2131351028  }
 0x218   : > { %v926_v59 = vshrl.u32 %v8417_v58, %v920_v45  ;;  %v5588_v50 = vmul.u32.u64.low %v5557_v34, %v1160_v57  ;;  %v5589_v62 = vmul.u32.u64.high %v5557_v34, %v1160_v57, %v5588_v50  ;;  %v924_v30 = vor.u32 %v923_v55, %v922_v61 }
 0x219   : > { %v5592_v43 = vmul.u32.u64.low %v5557_v34, %v1156_v56  ;;  %v5593_v38 = vmul.u32.u64.high %v5557_v34, %v1156_v56, %v5592_v43  ;;  %v928_v21 = vshll.u32 %v8417_v58, %v919_v42  ;;  %v8418_v28 = vmov 2102212464  }
 0x21a   : > { %v927_v63 = vor.u32 %v926_v59, %v925_v51  ;;  %v929_v36 = vshrl.u32 %v8418_v28, %v920_v45  ;;  %v921_v48 = vshrl.u32 %v8415_v37, %v920_v45  ;;  %v931_v24 = vshll.u32 %v8418_v28, %v919_v42 }
 0x21b   : > { %v8419_v46 = vmov 920167782   ;;  %v8420_v25 = vmov 1326507024   ;;  %v1168_v47 = vmul.u32 %v5557_v34, %v1152_v53  ;;  %vm937_vm10 = vcmp.lt.s32.totalorder %v5559_v12, 1 }
 0x21c   : > { %v932_v52 = vshrl.u32 %v8419_v46, %v920_v45  ;;  %v935_v41 = vshrl.u32 %v8420_v25, %v920_v45  ;;  %v930_v57 = vor.u32 %v929_v36, %v928_v21  ;;  %v934_v56 = vshll.u32 %v8419_v46, %v919_v42 }
 0x21d   : > { %vm1170_vm11 = vc.u32 %v5589_v62, %v5592_v43  ;;  %v1171_v61 = vadd.s32 1, %v5593_v38  ;;  %vm938_vm12 = vcmp.lt.s32.totalorder %v5559_v12, 2  ;;  %vm939_vm13 = vcmp.lt.s32.totalorder %v5559_v12, 3 }
 0x21e   : > { %v933_v55 = vor.u32 %v932_v52, %v931_v24  ;;  %v936_v51 = vor.u32 %v935_v41, %v934_v56  ;;  %vm940_vm14 = vcmp.lt.s32.totalorder %v5559_v12, 4  ;;  %v945_v45 = vsel %vm937_vm10, %v924_v30, %v927_v63 }
 0x21f   : > { %v1172_v34 = vsel %vm1170_vm11, %v1171_v61, %v5593_v38  ;;  %v942_v53 = vsel %vm940_vm14, %v930_v57, 2102212464  ;;  %v949_v42 = vsel %vm937_vm10, %v927_v63, %v930_v57  ;;  %v941_v21 = vsel %vm937_vm10, %v921_v48, %v924_v30 }
 0x220   : > { %v946_v59 = vsel %vm940_vm14, %v933_v55, 920167782  ;;  %v1173_v50 = vadd.s32 %v1172_v34, %v1168_v47  ;;  %v950_v29 = vsel %vm940_vm14, %v936_v51, 1326507024  ;;  %v943_v27 = vsel %vm939_vm13, %v927_v63, %v942_v53 }
 0x221   : > { %v947_v36 = vsel %vm939_vm13, %v930_v57, %v946_v59  ;;  %v951_v52 = vsel %vm939_vm13, %v933_v55, %v950_v29  ;;  %v1227_v41 = vadd.s32 1, %v5565_v44  ;;  %v8421_v63 = vand.u32 2147483647, %v5548_v54  ;;  %v469_v29 = vpop.permute.xlu1 %468 }
 0x222   : > { %v948_v24 = vsel %vm938_vm12, %v945_v45, %v947_v36  ;;  %v1174_v56 = vadd.s32 536870912, %v1173_v50  ;;  %v952_v26 = vsel %vm938_vm12, %v949_v42, %v951_v52  ;;  %v944_v44 = vsel %vm938_vm12, %v941_v21, %v943_v27 }
 0x223   : > { %v5616_v38 = vmul.u32.u64.low %v5561_v60, %v948_v24  ;;  %v5617_v61 = vmul.u32.u64.high %v5561_v60, %v948_v24, %v5616_v38  ;;  %v5621_v30 = vmul.u32.u64.low %v5561_v60, %v952_v26  ;;  %v5622_v48 = vmul.u32.u64.high %v5561_v60, %v952_v26, %v5621_v30 }
 0x224   : > { %v1224_v47 = vand.u32 8388607, %v8421_v63  ;;  %vm1228_vm15 = vcmp.gt.s32.totalorder %v1227_v41, 0  ;;  %v1175_v57 = vshrl.u32 %v1174_v56, 30  ;;  %v5631_v53 = vadd.f32 %v5522_v35, %v5555_v33 }
 0x225   : > { %v1229_v55 = vsel %vm1228_vm15, %v1227_v41, 0  ;;  %v963_v34 = vadd.s32 1, %v5617_v61  ;;  %v800_v26 = vsel %vm5510_vm3, %v469_v29, %v5452_v0  ;;  %v960_v59 = vmul.u32 %v5561_v60, %v944_v44 }
 0x226   : > { %v1231_v51 = vand.u32 31, %v1229_v55  ;;  %v1176_v45 = vshll.u32 %v1175_v57, 30  ;;  %vm962_vm0 = vc.u32 %v5622_v48, %v5616_v38  ;;  %v1225_v12 = vor.u32 8388608, %v1224_v47 }
 0x227   : > { %v964_v21 = vsel %vm962_vm0, %v963_v34, %v5617_v61  ;;  %v1169_v33 = vadd.s32 %v5592_v43, %v5589_v62  ;;  %v5647_v60 = vmul.f32 %v5517_v32, %v800_v26  ;;  %v5654_v30 = vshrl.u32 %v1229_v55, 5 }
 0x228   : > { %v1232_v27 = vsub.s32 32, %v1231_v51  ;;  %v5639_v42 = vsub.s32 %v1173_v50, %v1176_v45  ;;  %v965_v36 = vadd.s32 %v964_v21, %v960_v59  ;;  %v5650_v56 = vshll.u32 %v1225_v12, 8 }
 0x229   : > { %v1012_v50 = vand.u32 2139095040, %v5631_v53  ;;  %v1199_v63 = vsub.s32 4, %v1175_v57  ;;  %v1234_v29 = vshll.u32 %v8415_v37, %v1231_v51  ;;  %v1237_v34 = vshll.u32 %v8416_v49, %v1231_v51 }
 0x22a   : > { %v1179_v24 = vsub.s32 0, %v5639_v42  ;;  %v966_v52 = vadd.s32 536870912, %v965_v36  ;;  %v1235_v41 = vshrl.u32 %v8416_v49, %v1232_v27  ;;  %v1238_v62 = vshrl.u32 %v8417_v58, %v1232_v27 }
 0x22b   : > { %v1241_v43 = vshrl.u32 %v8418_v28, %v1232_v27  ;;  %v1244_v44 = vshrl.u32 %v8419_v46, %v1232_v27  ;;  %v1240_v26 = vshll.u32 %v8417_v58, %v1231_v51  ;;  %v1247_v59 = vshrl.u32 %v8420_v25, %v1232_v27 }
 0x22c   : > { %v4416_v61 = vmin.u32 %v1179_v24, %v5639_v42  ;;  %v967_v47 = vshrl.u32 %v966_v52, 30  ;;  %v1236_v55 = vor.u32 %v1235_v41, %v1234_v29  ;;  %v1243_v21 = vshll.u32 %v8418_v28, %v1231_v51 }
 0x22d   : > { %v1013_v24 = vshrl.u32 %v1012_v50, 23  ;;  %v1239_v23 = vor.u32 %v1238_v62, %v1237_v34  ;;  %v1242_v22 = vor.u32 %v1241_v43, %v1240_v26  ;;  %v1246_v52 = vshll.u32 %v8419_v46, %v1231_v51 }
 0x22e   : > { %v1181_v45 = vclz %v4416_v61  ;;  %v968_v12 = vshll.u32 %v967_v47, 30  ;;  %v5667_v20 = vsel %vm1115_vm1, %v1199_v63, %v1175_v57  ;;  %v1233_v19 = vshrl.u32 %v8415_v37, %v1232_v27 }
 0x22f   : > { %v1245_v18 = vor.u32 %v1244_v44, %v1243_v21  ;;  %v991_v41 = vsub.s32 4, %v967_v47  ;;  %v1248_v29 = vor.u32 %v1247_v59, %v1246_v52  ;;  %vm1249_vm5 = vcmp.lt.s32.totalorder %v5654_v30, 1 }
 0x230   : > { %v4417_v0 = vadd.s32 4294967294, %v1181_v45  ;;  %v5670_v61 = vsub.s32 %v965_v36, %v968_v12  ;;  %v8422_v50 = vand.u32 2147483647, %v5531_v39  ;;  %vm1251_vm7 = vcmp.lt.s32.totalorder %v5654_v30, 3 }
 0x231   : > { %vm1252_vm8 = vcmp.lt.s32.totalorder %v5654_v30, 4  ;;  %v8425_v43 = vand.u32 2147483647, %v5534_v40  ;;  %v1257_v45 = vsel %vm1249_vm5, %v1236_v55, %v1239_v23  ;;  %v1261_v59 = vsel %vm1249_vm5, %v1239_v23, %v1242_v22 }
 0x232   : > { %vm4418_vm4 = vcmp.lt.s32.totalorder %v4417_v0, 0  ;;  %vm5676_vm6 = vcmp.le.f32.partialorder %v8422_v50, 0.7853982  ;;  %v971_v62 = vsub.s32 0, %v5670_v61  ;;  %v1254_v44 = vsel %vm1252_vm8, %v1242_v22, 2102212464 }
 0x233   : > { %v1184_v57 = vsel %vm4418_vm4, 0, %v4417_v0  ;;  %vm5685_vm9 = vcmp.le.f32.partialorder %v8425_v43, 0.7853982  ;;  %v1258_v26 = vsel %vm1252_vm8, %v1245_v18, 920167782  ;;  %vm1250_vm10 = vcmp.lt.s32.totalorder %v5654_v30, 2 }
 0x234   : > { %v1185_v27 = vsub.s32 32, %v1184_v57  ;;  %v1189_v36 = vsub.s32 4294967266, %v1184_v57  ;;  %v1186_v0 = vshll.u32 %v5639_v42, %v1184_v57  ;;  %v4408_v34 = vmin.u32 %v971_v62, %v5670_v61 }
 0x235   : > { %v1259_v52 = vsel %vm1251_vm7, %v1242_v22, %v1258_v26  ;;  %v1262_v50 = vsel %vm1252_vm8, %v1248_v29, 1326507024  ;;  %v1253_v17 = vsel %vm1249_vm5, %v1233_v19, %v1236_v55  ;;  %v1255_v42 = vsel %vm1251_vm7, %v1239_v23, %v1254_v44 }
 0x236   : > { %v1187_v12 = vshrl.u32 %v1169_v33, %v1185_v27  ;;  %v1190_v21 = vadd.s32 127, %v1189_v36  ;;  %v973_v43 = vclz %v4408_v34  ;;  %v1260_v16 = vsel %vm1250_vm10, %v1257_v45, %v1259_v52 }
 0x237   : > { %v1263_v33 = vsel %vm1251_vm7, %v1245_v18, %v1262_v50  ;;  %v5705_v22 = vmul.u32.u64.low %v5650_v56, %v1260_v16  ;;  %v5706_v29 = vmul.u32.u64.high %v5650_v56, %v1260_v16, %v5705_v22  ;;  %v992_v26 = vsel %vm907_vm2, %v991_v41, %v967_v47 }
 0x238   : > { %v1188_v57 = vor.u32 %v1187_v12, %v1186_v0  ;;  %v1191_v62 = vshll.u32 %v1190_v21, 23  ;;  %v4409_v27 = vadd.s32 4294967294, %v973_v43  ;;  %v1264_v36 = vsel %vm1250_vm10, %v1261_v59, %v1263_v33 }
 0x239   : > { %v5711_v19 = vmul.u32.u64.low %v5650_v56, %v1264_v36  ;;  %v5712_v55 = vmul.u32.u64.high %v5650_v56, %v1264_v36, %v5711_v19  ;;  %v961_v23 = vadd.s32 %v5616_v38, %v5622_v48  ;;  %v1256_v30 = vsel %vm1250_vm10, %v1253_v17, %v1255_v42 }
 0x23a   : > { %v1192_v34 = vor.u32 4788187, %v1191_v62  ;;  %vm4410_vm11 = vcmp.lt.s32.totalorder %v4409_v27, 0  ;;  %v4411_v18 = vadd.s32 4294967169, %v1013_v24  ;;  %v1195_v45 = vcvt.s32.f32 %v1188_v57 }
 0x23b   : > { %v1202_v16 = vsel %vm5676_vm6, 0, %v5667_v20  ;;  %v976_v0 = vsel %vm4410_vm11, 0, %v4409_v27  ;;  %v994_v47 = vsel %vm5685_vm9, 0, %v992_v26  ;;  %v1275_v41 = vadd.s32 1, %v5706_v29 }
 0x23c   : > { %v1193_v44 = vand.u32 2147483647, %v1192_v34  ;;  %v977_v59 = vsub.s32 32, %v976_v0  ;;  %v981_v12 = vsub.s32 4294967266, %v976_v0  ;;  %v1272_v38 = vmul.u32 %v5650_v56, %v1256_v30 }
 0x23d   : > { %vm1274_vm12 = vc.u32 %v5712_v55, %v5705_v22  ;;  %v1019_v17 = vadd.s32 1, %v4411_v18  ;;  %v978_v48 = vshll.u32 %v5670_v61, %v976_v0  ;;  %v1206_v43 = vadd.s32 3, %v1202_v16 }
 0x23e   : > { %v1196_v21 = vmul.f32 %v1195_v45, %v1193_v44  ;;  %v979_v24 = vshrl.u32 %v961_v23, %v977_v59  ;;  %v982_v52 = vadd.s32 127, %v981_v12  ;;  %v1276_v20 = vsel %vm1274_vm12, %v1275_v41, %v5706_v29 }
 0x23f   : > { %v1277_v42 = vadd.s32 %v1276_v20, %v1272_v38  ;;  %vm1020_vm13 = vcmp.gt.s32.totalorder %v1019_v17, 0  ;;  %v998_v33 = vadd.s32 3, %v994_v47  ;;  %v8428_v34 = vand.u32 2147483647, %v5631_v53 }
 0x240   : > { %v1197_v50 = vxor.u32 2147483648, %v1196_v21  ;;  %v980_v57 = vor.u32 %v979_v24, %v978_v48  ;;  %v983_v62 = vshll.u32 %v982_v52, 23  ;;  %v1021_v27 = vsel %vm1020_vm13, %v1019_v17, 0 }
 0x241   : > { %v1278_v36 = vadd.s32 536870912, %v1277_v42  ;;  %v1016_v26 = vand.u32 8388607, %v8428_v34  ;;  %v1023_v61 = vand.u32 31, %v1021_v27  ;;  %v5733_v23 = vand.u32 3, %v1206_v43 }
 0x242   : > { %v1198_v56 = vsel %vm1115_vm1, %v1197_v50, %v1196_v21  ;;  %v984_v19 = vor.u32 4788187, %v983_v62  ;;  %vm1219_vm14 = vcmp.lt.s32.totalorder %v5548_v54, 0  ;;  %v987_v45 = vcvt.s32.f32 %v980_v57 }
 0x243   : > { %v1201_v29 = vsel %vm5676_vm6, %v5531_v39, %v1198_v56  ;;  %v1279_v30 = vshrl.u32 %v1278_v36, 30  ;;  %v1024_v18 = vsub.s32 32, %v1023_v61  ;;  %v5736_v16 = vand.u32 3, %v998_v33 }
 0x244   : > { %4786 = vcosq.f32 %v1201_v29  ;;  %v985_v44 = vand.u32 2147483647, %v984_v19  ;;  %v1017_v59 = vor.u32 8388608, %v1016_v26  ;;  %v5741_v51 = vadd.f32 %v5522_v35, %v5647_v60 }
 0x245   : > { %4788 = vsinq.f32 %v1201_v29  ;;  %v1280_v0 = vshll.u32 %v1279_v30, 30  ;;  %v1027_v12 = vshrl.u32 %v8416_v49, %v1024_v18  ;;  %v5744_v41 = vadd.s32 %v5705_v22, %v5712_v55 }
 0x246   : > { %v988_v47 = vmul.f32 %v987_v45, %v985_v44  ;;  %v1030_v21 = vshrl.u32 %v8417_v58, %v1024_v18  ;;  %v1033_v38 = vshrl.u32 %v8418_v28, %v1024_v18  ;;  %vm1212_vm15 = vcmp.eq.s32.totalorder %v5733_v23, 2 }
 0x247   : > { %v5749_v17 = vsub.s32 %v1277_v42, %v1280_v0  ;;  %v5751_v48 = vshrl.u32 %v1021_v27, 5  ;;  %v1026_v24 = vshll.u32 %v8415_v37, %v1023_v61  ;;  %v1036_v52 = vshrl.u32 %v8419_v46, %v1024_v18 }
 0x248   : > { %vm1209_vm0 = vcmp.eq.s32.totalorder %v5733_v23, 0  ;;  %v989_v60 = vxor.u32 2147483648, %v988_v47  ;;  %v1303_v20 = vsub.s32 4, %v1279_v30  ;;  %v1029_v22 = vshll.u32 %v8416_v49, %v1023_v61 }
 0x249   : > { %v1032_v55 = vshll.u32 %v8417_v58, %v1023_v61  ;;  %vm1208_vm1 = vcmp.lt.s32.totalorder %v5733_v23, 2  ;;  %v1283_v50 = vsub.s32 0, %v5749_v17  ;;  %v1028_v43 = vor.u32 %v1027_v12, %v1026_v24 }
 0x24a   : > { %v1035_v42 = vshll.u32 %v8418_v28, %v1023_v61  ;;  %v5761_v57 = vshll.u32 %v1017_v59, 8  ;;  %vm1205_vm4 = vweird.f32 %v5531_v39  ;;  %v990_v62 = vsel %vm907_vm2, %v989_v60, %v988_v47 }
 0x24b   : > { %v1031_v33 = vor.u32 %v1030_v21, %v1029_v22  ;;  %v1034_v27 = vor.u32 %v1033_v38, %v1032_v55  ;;  %v1039_v56 = vshrl.u32 %v8420_v25, %v1024_v18  ;;  %v993_v36 = vsel %vm5685_vm9, %v5534_v40, %v990_v62 }
 0x24c   : > { %v4420_v34 = vmin.u32 %v1283_v50, %v5749_v17  ;;  %v1037_v26 = vor.u32 %v1036_v52, %v1035_v42  ;;  %v1038_v29 = vshll.u32 %v8419_v46, %v1023_v61  ;;  %4790 = vcosq.f32 %v993_v36 }
 0x24d   : > { %v5774_v19 = vsel %vm1219_vm14, %v1303_v20, %v1279_v30  ;;  %v1025_v44 = vshrl.u32 %v8415_v37, %v1024_v18  ;;  %vm1041_vm2 = vcmp.lt.s32.totalorder %v5751_v48, 1  ;;  %4792 = vsinq.f32 %v993_v36 }
 0x24e   : > { %v4787_v45 = vpop.eup %4786  ;;  %v8429_v63 = vand.u32 2147483647, %v5548_v54  ;;  %v1285_v59 = vclz %v4420_v34  ;;  %v1040_v12 = vor.u32 %v1039_v56, %v1038_v29  ;;  %vm1042_vm6 = vcmp.lt.s32.totalorder %v5751_v48, 2 }
 0x24f   : > { %v4789_v61 = vpop.eup %4788  ;;  %v1213_v30 = vxor.u32 2147483648, %v4787_v45  ;;  %vm1043_vm7 = vcmp.lt.s32.totalorder %v5751_v48, 3  ;;  %vm1044_vm8 = vcmp.lt.s32.totalorder %v5751_v48, 4  ;;  %v1049_v18 = vsel %vm1041_vm2, %v1028_v43, %v1031_v33 }
 0x250   : > { %vm5780_vm5 = vcmp.le.f32.partialorder %v8429_v63, 0.7853982  ;;  %v1210_v47 = vxor.u32 2147483648, %v4789_v61  ;;  %v4421_v21 = vadd.s32 4294967294, %v1285_v59  ;;  %v1046_v38 = vsel %vm1044_vm8, %v1034_v27, 2102212464 }
 0x251   : > { %v1050_v24 = vsel %vm1044_vm8, %v1037_v26, 920167782  ;;  %v1214_v52 = vsel %vm1212_vm15, %v1213_v30, %v4789_v61  ;;  %v1045_v60 = vsel %vm1041_vm2, %v1025_v44, %v1028_v43  ;;  %v1053_v22 = vsel %vm1041_vm2, %v1031_v33, %v1034_v27 }
 0x252   : > { %v1051_v20 = vsel %vm1043_vm7, %v1034_v27, %v1050_v24  ;;  %v1211_v55 = vsel %vm1209_vm0, %v4787_v45, %v1210_v47  ;;  %vm4422_vm9 = vcmp.lt.s32.totalorder %v4421_v21, 0  ;;  %v1054_v42 = vsel %vm1044_vm8, %v1040_v12, 1326507024 }
 0x253   : > { %v1052_v50 = vsel %vm1042_vm6, %v1049_v18, %v1051_v20  ;;  %v1215_v62 = vsel %vm1208_vm1, %v1211_v55, %v1214_v52  ;;  %vm1000_vm10 = vcmp.lt.s32.totalorder %v5736_v16, 2  ;;  %v1288_v43 = vsel %vm4422_vm9, 0, %v4421_v21  ;;  %v465_v18 = vpop.permute.xlu0 %464 }
 0x254   : > { %v1047_v56 = vsel %vm1043_vm7, %v1031_v33, %v1046_v38  ;;  %v1055_v27 = vsel %vm1043_vm7, %v1037_v26, %v1054_v42  ;;  %v1216_v36 = vsel %vm1205_vm4, nan, %v1215_v62  ;;  %vm997_vm11 = vweird.f32 %v5534_v40 }
 0x255   : > { %v1289_v34 = vsub.s32 32, %v1288_v43  ;;  %v1290_v29 = vshll.u32 %v5749_v17, %v1288_v43  ;;  %v1293_v44 = vsub.s32 4294967266, %v1288_v43  ;;  %4235 = vst [vmem:[%s5813_s18 + $0x10] sm:$0xff] %v1216_v36  ;;  %v1056_v23 = vsel %vm1042_vm6, %v1053_v22, %v1055_v27 }
 0x256   : > { %v5819_v33 = vmul.u32.u64.low %v5761_v57, %v1052_v50  ;;  %v5820_v45 = vmul.u32.u64.high %v5761_v57, %v1052_v50, %v5819_v33  ;;  %v1428_v39 = vand.u32 2139095040, %v5741_v51  ;;  %v4791_v12 = vpop.eup %4790  ;;  %vm1001_vm12 = vcmp.eq.s32.totalorder %v5736_v16, 0 }
 0x257   : > { %v1291_v26 = vshrl.u32 %v5744_v41, %v1289_v34  ;;  %v1294_v63 = vadd.s32 127, %v1293_v44  ;;  %v5826_v17 = vmul.u32.u64.low %v5761_v57, %v1056_v23  ;;  %v5827_v59 = vmul.u32.u64.high %v5761_v57, %v1056_v23, %v5826_v17  ;;  %v4793_v47 = vpop.eup %4792 }
 0x258   : > { %vm1004_vm13 = vcmp.eq.s32.totalorder %v5736_v16, 2  ;;  %v1306_v61 = vsel %vm5780_vm5, 0, %v5774_v19  ;;  %v1429_v30 = vshrl.u32 %v1428_v39, 23  ;;  %v1005_v21 = vxor.u32 2147483648, %v4791_v12 }
 0x259   : > { %v1292_v38 = vor.u32 %v1291_v26, %v1290_v29  ;;  %v1295_v41 = vshll.u32 %v1294_v63, 23  ;;  %v1048_v24 = vsel %vm1042_vm6, %v1045_v60, %v1047_v56  ;;  %v1002_v52 = vxor.u32 2147483648, %v4793_v47  ;;  %v480_v26 = vpop.permute.xlu1 %479 }
 0x25a   : > { %v1067_v20 = vadd.s32 1, %v5820_v45  ;;  %v1425_v22 = vand.u32 2147483647, %v5741_v51  ;;  %v4427_v55 = vadd.s32 4294967169, %v1429_v30  ;;  %v1006_v50 = vsel %vm1004_vm13, %v1005_v21, %v4793_v47 }
 0x25b   : > { %v1296_v42 = vor.u32 4788187, %v1295_v41  ;;  %v1310_v62 = vadd.s32 3, %v1306_v61  ;;  %v799_v19 = vsel %vm5510_vm3, %v465_v18, %v5454_v1  ;;  %v1003_v43 = vsel %vm1001_vm12, %v4791_v12, %v1002_v52 }
 0x25c   : > { %v1064_v48 = vmul.u32 %v5761_v57, %v1048_v24  ;;  %vm1066_vm15 = vc.u32 %v5827_v59, %v5819_v33  ;;  %v1435_v60 = vadd.s32 1, %v4427_v55  ;;  %v1007_v56 = vsel %vm1000_vm10, %v1003_v43, %v1006_v50 }
 0x25d   : > { %v1297_v27 = vand.u32 2147483647, %v1296_v42  ;;  %v1299_v36 = vcvt.s32.f32 %v1292_v38  ;;  %v1068_v34 = vsel %vm1066_vm15, %v1067_v20, %v5820_v45  ;;  %v1008_v29 = vsel %vm997_vm11, nan, %v1007_v56 }
 0x25e   : > { %v1069_v1 = vadd.s32 %v1068_v34, %v1064_v48  ;;  %v1432_v44 = vand.u32 8388607, %v1425_v22  ;;  %vm1436_vm0 = vcmp.gt.s32.totalorder %v1435_v60, 0  ;;  %4233 = vst [vmem:[%s5813_s18] sm:$0xff] %v1008_v29  ;;  %v838_v39 = vmul.f32 %v5517_v32, %v799_v19 }
 0x25f   : > { %v1300_v57 = vmul.f32 %v1299_v36, %v1297_v27  ;;  %v1437_v23 = vsel %vm1436_vm0, %v1435_v60, 0  ;;  %v5855_v12 = vand.u32 3, %v1310_v62  ;;  %vm1011_vm1 = vcmp.lt.s32.totalorder %v5631_v53, 0 }
 0x260   : > { %v1070_v16 = vadd.s32 536870912, %v1069_v1  ;;  %v1439_v63 = vand.u32 31, %v1437_v23  ;;  %v1433_v45 = vor.u32 8388608, %v1432_v44  ;;  %v802_v30 = vsel %vm5510_vm3, %v480_v26, %v5458_v2 }
 0x261   : > { %v1301_v17 = vxor.u32 2147483648, %v1300_v57  ;;  %v5863_v47 = vshrl.u32 %v1437_v23, 5  ;;  %v5867_v38 = vadd.f32 %v5522_v35, %v838_v39  ;;  %v1065_v29 = vadd.s32 %v5819_v33, %v5827_v59 }
 0x262   : > { %v1071_v40 = vshrl.u32 %v1070_v16, 30  ;;  %v1440_v61 = vsub.s32 32, %v1439_v63  ;;  %v1442_v21 = vshll.u32 %v8415_v37, %v1439_v63  ;;  %v1445_v52 = vshll.u32 %v8416_v49, %v1439_v63 }
 0x263   : > { %v1302_v18 = vsel %vm1219_vm14, %v1301_v17, %v1300_v57  ;;  %v1448_v20 = vshll.u32 %v8417_v58, %v1439_v63  ;;  %v1451_v62 = vshll.u32 %v8418_v28, %v1439_v63  ;;  %v1454_v60 = vshll.u32 %v8419_v46, %v1439_v63 }
 0x264   : > { %v1305_v41 = vsel %vm5780_vm5, %v5548_v54, %v1302_v18  ;;  %v1072_v24 = vshll.u32 %v1071_v40, 30  ;;  %v1443_v2 = vshrl.u32 %v8416_v49, %v1440_v61  ;;  %v1446_v55 = vshrl.u32 %v8417_v58, %v1440_v61 }
 0x265   : > { %4794 = vcosq.f32 %v1305_v41  ;;  %v1449_v50 = vshrl.u32 %v8418_v28, %v1440_v61  ;;  %v1452_v0 = vshrl.u32 %v8419_v46, %v1440_v61  ;;  %v1095_v19 = vsub.s32 4, %v1071_v40 }
 0x266   : > { %4796 = vsinq.f32 %v1305_v41  ;;  %v5877_v42 = vsub.s32 %v1069_v1, %v1072_v24  ;;  %v1444_v43 = vor.u32 %v1443_v2, %v1442_v21  ;;  %v1447_v48 = vor.u32 %v1446_v55, %v1445_v52 }
 0x267   : > { %v1450_v27 = vor.u32 %v1449_v50, %v1448_v20  ;;  %v1453_v36 = vor.u32 %v1452_v0, %v1451_v62  ;;  %v1455_v34 = vshrl.u32 %v8420_v25, %v1440_v61  ;;  %vm1316_vm14 = vcmp.eq.s32.totalorder %v5855_v12, 2 }
 0x268   : > { %v1075_v56 = vsub.s32 0, %v5877_v42  ;;  %v5887_v1 = vshll.u32 %v1433_v45, 8  ;;  %v1324_v44 = vand.u32 2139095040, %v5867_v38  ;;  %v5891_v57 = vmul.f32 %v5517_v32, %v802_v30 }
 0x269   : > { %vm1313_vm4 = vcmp.eq.s32.totalorder %v5855_v12, 0  ;;  %v8432_v23 = vand.u32 2147483647, %v5631_v53  ;;  %v1456_v16 = vor.u32 %v1455_v34, %v1454_v60  ;;  %vm1457_vm5 = vcmp.lt.s32.totalorder %v5863_v47, 1 }
 0x26a   : > { %v4412_v26 = vmin.u32 %v1075_v56, %v5877_v42  ;;  %vm1460_vm6 = vcmp.lt.s32.totalorder %v5863_v47, 4  ;;  %vm1312_vm7 = vcmp.lt.s32.totalorder %v5855_v12, 2  ;;  %v1096_v32 = vsel %vm1011_vm1, %v1095_v19, %v1071_v40 }
 0x26b   : > { %vm5896_vm2 = vcmp.le.f32.partialorder %v8432_v23, 0.7853982  ;;  %v1441_v33 = vshrl.u32 %v8415_v37, %v1440_v61  ;;  %v1465_v59 = vsel %vm1457_vm5, %v1444_v43, %v1447_v48  ;;  %v1466_v63 = vsel %vm1460_vm6, %v1453_v36, 920167782 }
 0x26c   : > { %vm1309_vm8 = vweird.f32 %v5548_v54  ;;  %v1077_v17 = vclz %v4412_v26  ;;  %vm1459_vm9 = vcmp.lt.s32.totalorder %v5863_v47, 3  ;;  %v1462_v45 = vsel %vm1460_vm6, %v1450_v27, 2102212464 }
 0x26d   : > { %v1469_v30 = vsel %vm1457_vm5, %v1447_v48, %v1450_v27  ;;  %vm1458_vm10 = vcmp.lt.s32.totalorder %v5863_v47, 2  ;;  %v1467_v18 = vsel %vm1459_vm9, %v1450_v27, %v1466_v63  ;;  %v1470_v21 = vsel %vm1460_vm6, %v1456_v16, 1326507024 }
 0x26e   : > { %v1325_v40 = vshrl.u32 %v1324_v44, 23  ;;  %v4413_v41 = vadd.s32 4294967294, %v1077_v17  ;;  %v1461_v61 = vsel %vm1457_vm5, %v1441_v33, %v1444_v43  ;;  %v1468_v24 = vsel %vm1458_vm10, %v1465_v59, %v1467_v18 }
 0x26f   : > { %v1471_v52 = vsel %vm1459_vm9, %v1453_v36, %v1470_v21  ;;  %v4795_v20 = vpop.eup %4794  ;;  %v1463_v2 = vsel %vm1459_vm9, %v1447_v48, %v1462_v45  ;;  %v5921_v50 = vmul.u32.u64.low %v5887_v1, %v1468_v24  ;;  %v5922_v62 = vmul.u32.u64.high %v5887_v1, %v1468_v24, %v5921_v50 }
 0x270   : > { %v1472_v55 = vsel %vm1458_vm10, %v1469_v30, %v1471_v52  ;;  %v4797_v0 = vpop.eup %4796  ;;  %v1317_v19 = vxor.u32 2147483648, %v4795_v20  ;;  %vm4414_vm11 = vcmp.lt.s32.totalorder %v4413_v41, 0  ;;  %v1321_v36 = vand.u32 2147483647, %v5867_v38 }
 0x271   : > { %v5926_v60 = vmul.u32.u64.low %v5887_v1, %v1472_v55  ;;  %v5927_v43 = vmul.u32.u64.high %v5887_v1, %v1472_v55, %v5926_v60  ;;  %v1314_v56 = vxor.u32 2147483648, %v4797_v0  ;;  %v1080_v27 = vsel %vm4414_vm11, 0, %v4413_v41 }
 0x272   : > { %v4423_v48 = vadd.s32 4294967169, %v1325_v40  ;;  %v1318_v34 = vsel %vm1316_vm14, %v1317_v19, %v4797_v0  ;;  %v1081_v44 = vsub.s32 32, %v1080_v27  ;;  %v1085_v23 = vsub.s32 4294967266, %v1080_v27 }
 0x273   : > { %v1464_v26 = vsel %vm1458_vm10, %v1461_v61, %v1463_v2  ;;  %v1315_v16 = vsel %vm1313_vm4, %v4795_v20, %v1314_v56  ;;  %v1098_v33 = vsel %vm5896_vm2, 0, %v1096_v32  ;;  %v1483_v59 = vadd.s32 1, %v5922_v62 }
 0x274   : > { %v1331_v63 = vadd.s32 1, %v4423_v48  ;;  %v1319_v17 = vsel %vm1312_vm7, %v1315_v16, %v1318_v34  ;;  %v1082_v45 = vshll.u32 %v5877_v42, %v1080_v27  ;;  %v1083_v30 = vshrl.u32 %v1065_v29, %v1081_v44 }
 0x275   : > { %v1086_v18 = vadd.s32 127, %v1085_v23  ;;  %v1320_v47 = vsel %vm1309_vm8, nan, %v1319_v17  ;;  %v1480_v21 = vmul.u32 %v5887_v1, %v1464_v26  ;;  %vm1482_vm12 = vc.u32 %v5927_v43, %v5921_v50 }
 0x276   : > { %vm1332_vm13 = vcmp.gt.s32.totalorder %v1331_v63, 0  ;;  %4236 = vst [vmem:[%s5813_s18 + $0x18] sm:$0xff] %v1320_v47  ;;  %v1084_v32 = vor.u32 %v1083_v30, %v1082_v45  ;;  %v1484_v41 = vsel %vm1482_vm12, %v1483_v59, %v5922_v62  ;;  %v1102_v29 = vadd.s32 3, %v1098_v33 }
 0x277   : > { %v1087_v40 = vshll.u32 %v1086_v18, 23  ;;  %v1333_v12 = vsel %vm1332_vm13, %v1331_v63, 0  ;;  %v1485_v61 = vadd.s32 %v1484_v41, %v1480_v21  ;;  %v1328_v54 = vand.u32 8388607, %v1321_v36 }
 0x278   : > { %v1335_v24 = vand.u32 31, %v1333_v12  ;;  %v1091_v2 = vcvt.s32.f32 %v1084_v32  ;;  %v5951_v55 = vshrl.u32 %v1333_v12, 5  ;;  %v5955_v0 = vadd.f32 %v5522_v35, %v5891_v57 }
 0x279   : > { %v1088_v42 = vor.u32 4788187, %v1087_v40  ;;  %v1486_v52 = vadd.s32 536870912, %v1485_v61  ;;  %v5966_v33 = vand.u32 3, %v1102_v29  ;;  %vm1427_vm15 = vcmp.lt.s32.totalorder %v5741_v51, 0 }
 0x27a   : > { %v1336_v20 = vsub.s32 32, %v1335_v24  ;;  %v1347_v56 = vshll.u32 %v8418_v28, %v1335_v24  ;;  %v1338_v26 = vshll.u32 %v8415_v37, %v1335_v24  ;;  %v1341_v35 = vshll.u32 %v8416_v49, %v1335_v24 }
 0x27b   : > { %v1089_v1 = vand.u32 2147483647, %v1088_v42  ;;  %v1487_v19 = vshrl.u32 %v1486_v52, 30  ;;  %v1344_v57 = vshll.u32 %v8417_v58, %v1335_v24  ;;  %v1350_v63 = vshll.u32 %v8419_v46, %v1335_v24 }
 0x27c   : > { %v1339_v62 = vshrl.u32 %v8416_v49, %v1336_v20  ;;  %v1342_v60 = vshrl.u32 %v8417_v58, %v1336_v20  ;;  %v1345_v48 = vshrl.u32 %v8418_v28, %v1336_v20  ;;  %v1348_v34 = vshrl.u32 %v8419_v46, %v1336_v20 }
 0x27d   : > { %v1092_v27 = vmul.f32 %v1091_v2, %v1089_v1  ;;  %v1351_v44 = vshrl.u32 %v8420_v25, %v1336_v20  ;;  %v1488_v23 = vshll.u32 %v1487_v19, 30  ;;  %v1329_v21 = vor.u32 8388608, %v1328_v54 }
 0x27e   : > { %v1349_v59 = vor.u32 %v1348_v34, %v1347_v56  ;;  %v1340_v45 = vor.u32 %v1339_v62, %v1338_v26  ;;  %v1343_v30 = vor.u32 %v1342_v60, %v1341_v35  ;;  %v1346_v18 = vor.u32 %v1345_v48, %v1344_v57 }
 0x27f   : > { %v1093_v16 = vxor.u32 2147483648, %v1092_v27  ;;  %v5970_v17 = vsub.s32 %v1485_v61, %v1488_v23  ;;  %v1352_v32 = vor.u32 %v1351_v44, %v1350_v63  ;;  %v1636_v40 = vand.u32 2139095040, %v5955_v0 }
 0x280   : > { %v1337_v24 = vshrl.u32 %v8415_v37, %v1336_v20  ;;  %vm1356_vm0 = vcmp.lt.s32.totalorder %v5951_v55, 4  ;;  %vm1353_vm14 = vcmp.lt.s32.totalorder %v5951_v55, 1  ;;  %vm1355_vm4 = vcmp.lt.s32.totalorder %v5951_v55, 3 }
 0x281   : > { %v1094_v47 = vsel %vm1011_vm1, %v1093_v16, %v1092_v27  ;;  %v1491_v12 = vsub.s32 0, %v5970_v17  ;;  %v1362_v61 = vsel %vm1356_vm0, %v1349_v59, 920167782  ;;  %v1358_v29 = vsel %vm1356_vm0, %v1346_v18, 2102212464 }
 0x282   : > { %v1097_v41 = vsel %vm5896_vm2, %v5631_v53, %v1094_v47  ;;  %v1361_v52 = vsel %vm1353_vm14, %v1340_v45, %v1343_v30  ;;  %v1511_v54 = vsub.s32 4, %v1487_v19  ;;  %v1363_v39 = vsel %vm1355_vm4, %v1346_v18, %v1362_v61 }
 0x283   : > { %4798 = vcosq.f32 %v1097_v41  ;;  %v4428_v42 = vmin.u32 %v1491_v12, %v5970_v17  ;;  %v1365_v1 = vsel %vm1353_vm14, %v1343_v30, %v1346_v18  ;;  %v1366_v2 = vsel %vm1356_vm0, %v1352_v32, 1326507024 }
 0x284   : > { %4800 = vsinq.f32 %v1097_v41  ;;  %vm5988_vm1 = vcmp.le.f32.partialorder %v1425_v22, 0.7853982  ;;  %vm1354_vm2 = vcmp.lt.s32.totalorder %v5951_v55, 2  ;;  %v1369_v60 = vshll.u32 %v1329_v21, 8 }
 0x285   : > { %v1493_v62 = vclz %v4428_v42  ;;  %v1357_v56 = vsel %vm1353_vm14, %v1337_v24, %v1340_v45  ;;  %v1359_v27 = vsel %vm1355_vm4, %v1343_v30, %v1358_v29  ;;  %v1364_v48 = vsel %vm1354_vm2, %v1361_v52, %v1363_v39 }
 0x286   : > { %v1367_v34 = vsel %vm1355_vm4, %v1349_v59, %v1366_v2  ;;  %v6001_v23 = vmul.u32.u64.low %v1369_v60, %v1364_v48  ;;  %v6002_v26 = vmul.u32.u64.high %v1369_v60, %v1364_v48, %v6001_v23  ;;  %vm1104_vm5 = vcmp.lt.s32.totalorder %v5966_v33, 2 }
 0x287   : > { %v4429_v44 = vadd.s32 4294967294, %v1493_v62  ;;  %v1368_v22 = vsel %vm1354_vm2, %v1365_v1, %v1367_v34  ;;  %v1512_v35 = vsel %vm1427_vm15, %v1511_v54, %v1487_v19  ;;  %v1637_v63 = vshrl.u32 %v1636_v40, 23  ;;  %v476_v34 = vpop.permute.xlu0 %475 }
 0x288   : > { %v6008_v57 = vmul.u32.u64.low %v1369_v60, %v1368_v22  ;;  %v6009_v16 = vmul.u32.u64.high %v1369_v60, %v1368_v22, %v6008_v57  ;;  %vm1105_vm6 = vcmp.eq.s32.totalorder %v5966_v33, 0  ;;  %vm1108_vm7 = vcmp.eq.s32.totalorder %v5966_v33, 2 }
 0x289   : > { %vm4430_vm8 = vcmp.lt.s32.totalorder %v4429_v44, 0  ;;  %v1360_v59 = vsel %vm1354_vm2, %v1357_v56, %v1359_v27  ;;  %v1481_v45 = vadd.s32 %v5921_v50, %v5927_v43  ;;  %v1633_v18 = vand.u32 2147483647, %v5955_v0 }
 0x28a   : > { %v1496_v30 = vsel %vm4430_vm8, 0, %v4429_v44  ;;  %v4435_v47 = vadd.s32 4294967169, %v1637_v63  ;;  %v1514_v32 = vsel %vm5988_vm1, 0, %v1512_v35  ;;  %v1379_v40 = vadd.s32 1, %v6002_v26 }
 0x28b   : > { %v1497_v19 = vsub.s32 32, %v1496_v30  ;;  %v1501_v21 = vsub.s32 4294967266, %v1496_v30  ;;  %v1498_v12 = vshll.u32 %v5970_v17, %v1496_v30  ;;  %v1376_v24 = vmul.u32 %v1369_v60, %v1360_v59 }
 0x28c   : > { %vm1378_vm9 = vc.u32 %v6009_v16, %v6001_v23  ;;  %v1643_v55 = vadd.s32 1, %v4435_v47  ;;  %v1518_v54 = vadd.s32 3, %v1514_v32  ;;  %v1640_v27 = vand.u32 8388607, %v1633_v18 }
 0x28d   : > { %v4799_v41 = vpop.eup %4798  ;;  %v1499_v61 = vshrl.u32 %v1481_v45, %v1497_v19  ;;  %v1502_v42 = vadd.s32 127, %v1501_v21  ;;  %v1380_v29 = vsel %vm1378_vm9, %v1379_v40, %v6002_v26  ;;  %vm1101_vm11 = vweird.f32 %v5631_v53 }
 0x28e   : > { %v4801_v50 = vpop.eup %4800  ;;  %v1109_v43 = vxor.u32 2147483648, %v4799_v41  ;;  %v1381_v39 = vadd.s32 %v1380_v29, %v1376_v24  ;;  %vm1644_vm10 = vcmp.gt.s32.totalorder %v1643_v55, 0  ;;  %v6037_v45 = vand.u32 3, %v1518_v54 }
 0x28f   : > { %v1106_v52 = vxor.u32 2147483648, %v4801_v50  ;;  %v1500_v17 = vor.u32 %v1499_v61, %v1498_v12  ;;  %v1503_v2 = vshll.u32 %v1502_v42, 23  ;;  %v1645_v62 = vsel %vm1644_vm10, %v1643_v55, 0 }
 0x290   : > { %v1110_v1 = vsel %vm1108_vm7, %v1109_v43, %v4801_v50  ;;  %v1382_v56 = vadd.s32 536870912, %v1381_v39  ;;  %v1647_v48 = vand.u32 31, %v1645_v62  ;;  %v801_v30 = vsel %vm5510_vm3, %v476_v34, %v5460_v3  ;;  %v6054_v3 = vld [vmem:[%s8365_s3] ss:$0 sm:$0xff] }
 0x291   : > { %v1107_v60 = vsel %vm1105_vm6, %v4799_v41, %v1106_v52  ;;  %v1504_v22 = vor.u32 4788187, %v1503_v2  ;;  %v1507_v59 = vcvt.s32.f32 %v1500_v17  ;;  %v1641_v53 = vor.u32 8388608, %v1640_v27 }
 0x292   : > { %v1111_v44 = vsel %vm1104_vm5, %v1107_v60, %v1110_v1  ;;  %v6034_v35 = vshrl.u32 %v1382_v56, 30  ;;  %v1648_v57 = vsub.s32 32, %v1647_v48  ;;  %v1650_v33 = vshll.u32 %v8415_v37, %v1647_v48 }
 0x293   : > { %v1112_v26 = vsel %vm1101_vm11, nan, %v1111_v44  ;;  %v1505_v63 = vand.u32 2147483647, %v1504_v22  ;;  %v1646_v24 = vshrl.u32 %v1645_v62, 5  ;;  %v1653_v55 = vshll.u32 %v8416_v49, %v1647_v48 }
 0x294   : > { %4234 = vst [vmem:[%s5813_s18 + $0x8] sm:$0xff] %v1112_v26  ;;  %v1384_v47 = vshll.u32 %v6034_v35, 30  ;;  %v1651_v19 = vshrl.u32 %v8416_v49, %v1648_v57  ;;  %v1654_v32 = vshrl.u32 %v8417_v58, %v1648_v57  ;;  %v1657_v40 = vshrl.u32 %v8418_v28, %v1648_v57 }
 0x295   : > { %v1508_v21 = vmul.f32 %v1507_v59, %v1505_v63  ;;  %v1660_v41 = vshrl.u32 %v8419_v46, %v1648_v57  ;;  %v840_v50 = vmul.f32 %v6054_v3, %v801_v30  ;;  %v1656_v42 = vshll.u32 %v8417_v58, %v1647_v48 }
 0x296   : > { %v6048_v12 = vsub.s32 %v1381_v39, %v1384_v47  ;;  %v1652_v61 = vor.u32 %v1651_v19, %v1650_v33  ;;  %v1659_v29 = vshll.u32 %v8418_v28, %v1647_v48  ;;  %v1655_v54 = vor.u32 %v1654_v32, %v1653_v55 }
 0x297   : > { %v1509_v43 = vxor.u32 2147483648, %v1508_v21  ;;  %v1662_v39 = vshll.u32 %v8419_v46, %v1647_v48  ;;  %v1663_v1 = vshrl.u32 %v8420_v25, %v1648_v57  ;;  %v1658_v2 = vor.u32 %v1657_v40, %v1656_v42  ;;  %v6072_v48 = vld [vmem:[%s8366_s4] ss:$0 sm:$0xff] }
 0x298   : > { %v1387_v52 = vsub.s32 0, %v6048_v12  ;;  %v1661_v62 = vor.u32 %v1660_v41, %v1659_v29  ;;  %v1681_v60 = vshll.u32 %v1641_v53, 8  ;;  %vm1323_vm12 = vcmp.lt.s32.totalorder %v5867_v38, 0 }
 0x299   : > { %v1510_v17 = vsel %vm1427_vm15, %v1509_v43, %v1508_v21  ;;  %v1664_v34 = vor.u32 %v1663_v1, %v1662_v39  ;;  %v6075_v44 = vadd.f32 %v6072_v48, %v840_v50  ;;  %v1407_v22 = vsub.s32 4, %v6034_v35  ;;  %v491_v43 = vpop.permute.xlu1 %490 }
 0x29a   : > { %v1513_v56 = vsel %vm5988_vm1, %v5741_v51, %v1510_v17  ;;  %v4424_v27 = vmin.u32 %v1387_v52, %v6048_v12  ;;  %v1649_v26 = vshrl.u32 %v8415_v37, %v1648_v57  ;;  %vm1665_vm13 = vcmp.lt.s32.totalorder %v1646_v24, 1 }
 0x29b   : > { %4802 = vcosq.f32 %v1513_v56  ;;  %vm1668_vm15 = vcmp.lt.s32.totalorder %v1646_v24, 4  ;;  %v1673_v63 = vsel %vm1665_vm13, %v1652_v61, %v1655_v54  ;;  %vm1667_vm0 = vcmp.lt.s32.totalorder %v1646_v24, 3 }
 0x29c   : > { %4804 = vsinq.f32 %v1513_v56  ;;  %v1389_v20 = vclz %v4424_v27  ;;  %v1670_v59 = vsel %vm1668_vm15, %v1658_v2, 2102212464  ;;  %v1674_v30 = vsel %vm1668_vm15, %v1661_v62, 920167782 }
 0x29d   : > { %v1677_v47 = vsel %vm1665_vm13, %v1655_v54, %v1658_v2  ;;  %vm1666_vm14 = vcmp.lt.s32.totalorder %v1646_v24, 2  ;;  %v1675_v33 = vsel %vm1667_vm0, %v1658_v2, %v1674_v30  ;;  %v1678_v19 = vsel %vm1668_vm15, %v1664_v34, 1326507024 }
 0x29e   : > { %v4425_v53 = vadd.s32 4294967294, %v1389_v20  ;;  %v1669_v21 = vsel %vm1665_vm13, %v1649_v26, %v1652_v61  ;;  %v1671_v32 = vsel %vm1667_vm0, %v1655_v54, %v1670_v59  ;;  %v1676_v40 = vsel %vm1666_vm14, %v1673_v63, %v1675_v33 }
 0x29f   : > { %v1679_v41 = vsel %vm1667_vm0, %v1661_v62, %v1678_v19  ;;  %v6081_v55 = vmul.u32.u64.low %v1681_v60, %v1676_v40  ;;  %v6082_v50 = vmul.u32.u64.high %v1681_v60, %v1676_v40, %v6081_v55  ;;  %vm6086_vm1 = vcmp.le.f32.partialorder %v1321_v36, 0.7853982 }
 0x2a0   : > { %vm4426_vm4 = vcmp.lt.s32.totalorder %v4425_v53, 0  ;;  %v1680_v57 = vsel %vm1666_vm14, %v1677_v47, %v1679_v41  ;;  %vm1517_vm2 = vweird.f32 %v5741_v51  ;;  %v1377_v54 = vadd.s32 %v6001_v23, %v6009_v16 }
 0x2a1   : > { %v1392_v29 = vsel %vm4426_vm4, 0, %v4425_v53  ;;  %v6090_v52 = vmul.u32.u64.low %v1681_v60, %v1680_v57  ;;  %v6091_v61 = vmul.u32.u64.high %v1681_v60, %v1680_v57, %v6090_v52  ;;  %v1672_v17 = vsel %vm1666_vm14, %v1669_v21, %v1671_v32 }
 0x2a2   : > { %v1393_v39 = vsub.s32 32, %v1392_v29  ;;  %v1397_v1 = vsub.s32 4294967266, %v1392_v29  ;;  %vm1524_vm5 = vcmp.eq.s32.totalorder %v6037_v45, 2  ;;  %v1408_v36 = vsel %vm1323_vm12, %v1407_v22, %v6034_v35 }
 0x2a3   : > { %v1532_v2 = vand.u32 2139095040, %v6075_v44  ;;  %v804_v62 = vsel %vm5510_vm3, %v491_v43, %v5462_v4  ;;  %v1394_v56 = vshll.u32 %v6048_v12, %v1392_v29  ;;  %v1691_v16 = vadd.s32 1, %v6082_v50 }
 0x2a4   : > { %v1395_v27 = vshrl.u32 %v1377_v54, %v1393_v39  ;;  %v1398_v23 = vadd.s32 127, %v1397_v1  ;;  %v1688_v34 = vmul.u32 %v1681_v60, %v1672_v17  ;;  %vm1690_vm6 = vc.u32 %v6091_v61, %v6081_v55  ;;  %v6121_v39 = vpop.permute.xlu0 %486 }
 0x2a5   : > { %v4803_v24 = vpop.eup %4802  ;;  %v1529_v26 = vand.u32 2147483647, %v6075_v44  ;;  %v1533_v20 = vshrl.u32 %v1532_v2, 23  ;;  %v1692_v30 = vsel %vm1690_vm6, %v1691_v16, %v6082_v50  ;;  %v1410_v12 = vsel %vm6086_vm1, 0, %v1408_v36 }
 0x2a6   : > { %v4805_v35 = vpop.eup %4804  ;;  %v1525_v22 = vxor.u32 2147483648, %v4803_v24  ;;  %v1396_v63 = vor.u32 %v1395_v27, %v1394_v56  ;;  %v1399_v59 = vshll.u32 %v1398_v23, 23  ;;  %v1693_v47 = vadd.s32 %v1692_v30, %v1688_v34 }
 0x2a7   : > { %v1522_v4 = vxor.u32 2147483648, %v4805_v35  ;;  %v4431_v53 = vadd.s32 4294967169, %v1533_v20  ;;  %vm1521_vm7 = vcmp.eq.s32.totalorder %v6037_v45, 0  ;;  %v843_v19 = vmul.f32 %v6054_v3, %v804_v62 }
 0x2a8   : > { %v1526_v60 = vsel %vm1524_vm5, %v1525_v22, %v4805_v35  ;;  %v1400_v33 = vor.u32 4788187, %v1399_v59  ;;  %vm1520_vm8 = vcmp.lt.s32.totalorder %v6037_v45, 2  ;;  %v1694_v32 = vadd.s32 536870912, %v1693_v47 }
 0x2a9   : > { %v1523_v21 = vsel %vm1521_vm7, %v4803_v24, %v1522_v4  ;;  %v1539_v40 = vadd.s32 1, %v4431_v53  ;;  %v1403_v50 = vcvt.s32.f32 %v1396_v63  ;;  %v1414_v43 = vadd.s32 3, %v1410_v12 }
 0x2aa   : > { %v1527_v41 = vsel %vm1520_vm8, %v1523_v21, %v1526_v60  ;;  %v1401_v57 = vand.u32 2147483647, %v1400_v33  ;;  %v1695_v52 = vshrl.u32 %v1694_v32, 30  ;;  %v1536_v54 = vand.u32 8388607, %v1529_v26 }
 0x2ab   : > { %v1528_v29 = vsel %vm1517_vm2, nan, %v1527_v41  ;;  %vm1540_vm9 = vcmp.gt.s32.totalorder %v1539_v40, 0  ;;  %v6125_v17 = vadd.f32 %v6072_v48, %v843_v19  ;;  %vm6129_vm10 = vcmp.le.f32.partialorder %v1633_v18, 0.7853982 }
 0x2ac   : > { %4238 = vst [vmem:[%s5813_s18 + $0x28] sm:$0xff] %v1528_v29  ;;  %v1404_v1 = vmul.f32 %v1403_v50, %v1401_v57  ;;  %v1541_v45 = vsel %vm1540_vm9, %v1539_v40, 0  ;;  %vm1635_vm11 = vcmp.lt.s32.totalorder %v5955_v0, 0  ;;  %v1696_v51 = vshll.u32 %v1695_v52, 30 }
 0x2ad   : > { %v1543_v2 = vand.u32 31, %v1541_v45  ;;  %v6134_v56 = vand.u32 3, %v1414_v43  ;;  %v6137_v27 = vadd.s32 %v6081_v55, %v6091_v61  ;;  %v803_v23 = vsel %vm5510_vm3, %v6121_v39, %v5464_v5 }
 0x2ae   : > { %v1405_v62 = vxor.u32 2147483648, %v1404_v1  ;;  %v6143_v16 = vsub.s32 %v1693_v47, %v1696_v51  ;;  %v1719_v18 = vsub.s32 4, %v1695_v52  ;;  %v1537_v24 = vor.u32 8388608, %v1536_v54 }
 0x2af   : > { %v1544_v34 = vsub.s32 32, %v1543_v2  ;;  %v6147_v35 = vshrl.u32 %v1541_v45, 5  ;;  %v1546_v22 = vshll.u32 %v8415_v37, %v1543_v2  ;;  %v1844_v55 = vand.u32 2139095040, %v6125_v17 }
 0x2b0   : > { %v1406_v20 = vsel %vm1323_vm12, %v1405_v62, %v1404_v1  ;;  %v1699_v63 = vsub.s32 0, %v6143_v16  ;;  %v1549_v59 = vshll.u32 %v8416_v49, %v1543_v2  ;;  %v1552_v30 = vshll.u32 %v8417_v58, %v1543_v2 }
 0x2b1   : > { %v1409_v61 = vsel %vm6086_vm1, %v5867_v38, %v1406_v20  ;;  %v1547_v4 = vshrl.u32 %v8416_v49, %v1544_v34  ;;  %v1550_v12 = vshrl.u32 %v8417_v58, %v1544_v34  ;;  %v1553_v47 = vshrl.u32 %v8418_v28, %v1544_v34 }
 0x2b2   : > { %4806 = vcosq.f32 %v1409_v61  ;;  %v4436_v53 = vmin.u32 %v1699_v63, %v6143_v16  ;;  %v1720_v42 = vsel %vm1635_vm11, %v1719_v18, %v1695_v52  ;;  %v1555_v60 = vshll.u32 %v8418_v28, %v1543_v2 }
 0x2b3   : > { %4808 = vsinq.f32 %v1409_v61  ;;  %v1548_v33 = vor.u32 %v1547_v4, %v1546_v22  ;;  %v1551_v19 = vor.u32 %v1550_v12, %v1549_v59  ;;  %v1554_v21 = vor.u32 %v1553_v47, %v1552_v30 }
 0x2b4   : > { %v1556_v32 = vshrl.u32 %v8419_v46, %v1544_v34  ;;  %v1701_v40 = vclz %v4436_v53  ;;  %v6165_v41 = vshll.u32 %v1537_v24, 8  ;;  %v1841_v57 = vand.u32 2147483647, %v6125_v17 }
 0x2b5   : > { %v1845_v50 = vshrl.u32 %v1844_v55, 23  ;;  %vm1420_vm12 = vcmp.eq.s32.totalorder %v6134_v56, 2  ;;  %v1722_v43 = vsel %vm6129_vm10, 0, %v1720_v42  ;;  %v1558_v52 = vshll.u32 %v8419_v46, %v1543_v2 }
 0x2b6   : > { %v1557_v29 = vor.u32 %v1556_v32, %v1555_v60  ;;  %v1559_v54 = vshrl.u32 %v8420_v25, %v1544_v34  ;;  %vm1417_vm13 = vcmp.eq.s32.totalorder %v6134_v56, 0  ;;  %v4437_v1 = vadd.s32 4294967294, %v1701_v40 }
 0x2b7   : > { %v1545_v45 = vshrl.u32 %v8415_v37, %v1544_v34  ;;  %vm1561_vm15 = vcmp.lt.s32.totalorder %v6147_v35, 1  ;;  %vm1564_vm0 = vcmp.lt.s32.totalorder %v6147_v35, 4  ;;  %vm1416_vm14 = vcmp.lt.s32.totalorder %v6134_v56, 2 }
 0x2b8   : > { %v1560_v51 = vor.u32 %v1559_v54, %v1558_v52  ;;  %vm1562_vm4 = vcmp.lt.s32.totalorder %v6147_v35, 2  ;;  %v1566_v62 = vsel %vm1564_vm0, %v1554_v21, 2102212464  ;;  %v1569_v18 = vsel %vm1561_vm15, %v1548_v33, %v1551_v19 }
 0x2b9   : > { %vm1413_vm1 = vweird.f32 %v5867_v38  ;;  %vm4438_vm2 = vcmp.lt.s32.totalorder %v4437_v1, 0  ;;  %vm1563_vm5 = vcmp.lt.s32.totalorder %v6147_v35, 3  ;;  %v1565_v2 = vsel %vm1561_vm15, %v1545_v45, %v1548_v33 }
 0x2ba   : > { %v1570_v24 = vsel %vm1564_vm0, %v1557_v29, 920167782  ;;  %v1704_v20 = vsel %vm4438_vm2, 0, %v4437_v1  ;;  %v1573_v22 = vsel %vm1561_vm15, %v1551_v19, %v1554_v21  ;;  %v1574_v55 = vsel %vm1564_vm0, %v1560_v51, 1326507024 }
 0x2bb   : > { %v1571_v34 = vsel %vm1563_vm5, %v1554_v21, %v1570_v24  ;;  %v1705_v61 = vsub.s32 32, %v1704_v20  ;;  %v1709_v63 = vsub.s32 4294967266, %v1704_v20  ;;  %v1567_v59 = vsel %vm1563_vm5, %v1551_v19, %v1566_v62 }
 0x2bc   : > { %v1572_v30 = vsel %vm1562_vm4, %v1569_v18, %v1571_v34  ;;  %v4807_v4 = vpop.eup %4806  ;;  %v1706_v12 = vshll.u32 %v6143_v16, %v1704_v20  ;;  %v1575_v47 = vsel %vm1563_vm5, %v1557_v29, %v1574_v55  ;;  %v4443_v16 = vadd.s32 4294967169, %v1845_v50 }
 0x2bd   : > { %v6185_v53 = vmul.u32.u64.low %v6165_v41, %v1572_v30  ;;  %v6186_v42 = vmul.u32.u64.high %v6165_v41, %v1572_v30, %v6185_v53  ;;  %v4809_v60 = vpop.eup %4808  ;;  %v1421_v33 = vxor.u32 2147483648, %v4807_v4  ;;  %v1707_v21 = vshrl.u32 %v6137_v27, %v1705_v61 }
 0x2be   : > { %v1710_v32 = vadd.s32 127, %v1709_v63  ;;  %v1576_v19 = vsel %vm1562_vm4, %v1573_v22, %v1575_v47  ;;  %v1418_v40 = vxor.u32 2147483648, %v4809_v60  ;;  %v1568_v51 = vsel %vm1562_vm4, %v1565_v2, %v1567_v59 }
 0x2bf   : > { %v6193_v52 = vmul.u32.u64.low %v6165_v41, %v1576_v19  ;;  %v6194_v54 = vmul.u32.u64.high %v6165_v41, %v1576_v19, %v6193_v52  ;;  %v1422_v29 = vsel %vm1420_vm12, %v1421_v33, %v4809_v60  ;;  %v1708_v1 = vor.u32 %v1707_v21, %v1706_v12 }
 0x2c0   : > { %v1711_v45 = vshll.u32 %v1710_v32, 23  ;;  %v1419_v27 = vsel %vm1417_vm13, %v4807_v4, %v1418_v40  ;;  %v1587_v62 = vadd.s32 1, %v6186_v42  ;;  %v1851_v18 = vadd.s32 1, %v4443_v16 }
 0x2c1   : > { %v842_v50 = vmul.f32 %v6054_v3, %v803_v23  ;;  %v1423_v24 = vsel %vm1416_vm14, %v1419_v27, %v1422_v29  ;;  %v1726_v34 = vadd.s32 3, %v1722_v43  ;;  %v1848_v35 = vand.u32 8388607, %v1841_v57 }
 0x2c2   : > { %v1712_v20 = vor.u32 4788187, %v1711_v45  ;;  %v1424_v2 = vsel %vm1413_vm1, nan, %v1423_v24  ;;  %v1584_v22 = vmul.u32 %v6165_v41, %v1568_v51  ;;  %vm1586_vm6 = vc.u32 %v6194_v54, %v6185_v53 }
 0x2c3   : > { %vm1852_vm7 = vcmp.gt.s32.totalorder %v1851_v18, 0  ;;  %4237 = vst [vmem:[%s5813_s18 + $0x20] sm:$0xff] %v1424_v2  ;;  %v1715_v39 = vcvt.s32.f32 %v1708_v1  ;;  %v1588_v56 = vsel %vm1586_vm6, %v1587_v62, %v6186_v42  ;;  %v6220_v63 = vand.u32 3, %v1726_v34 }
 0x2c4   : > { %v1713_v5 = vand.u32 2147483647, %v1712_v20  ;;  %v1853_v23 = vsel %vm1852_vm7, %v1851_v18, 0  ;;  %v1589_v55 = vadd.s32 %v1588_v56, %v1584_v22  ;;  %v1849_v59 = vor.u32 8388608, %v1848_v35 }
 0x2c5   : > { %v1855_v43 = vand.u32 31, %v1853_v23  ;;  %v6222_v30 = vshrl.u32 %v1853_v23, 5  ;;  %v6225_v4 = vadd.f32 %v6072_v48, %v842_v50  ;;  %vm1531_vm8 = vcmp.lt.s32.totalorder %v6075_v44, 0 }
 0x2c6   : > { %v1716_v61 = vmul.f32 %v1715_v39, %v1713_v5  ;;  %v1590_v38 = vadd.s32 536870912, %v1589_v55  ;;  %v6245_v34 = vshll.u32 %v1849_v59, 8  ;;  %vm6250_vm9 = vcmp.le.f32.partialorder %v1529_v26, 0.7853982 }
 0x2c7   : > { %v1856_v41 = vsub.s32 32, %v1855_v43  ;;  %v1858_v47 = vshll.u32 %v8415_v37, %v1855_v43  ;;  %v1861_v60 = vshll.u32 %v8416_v49, %v1855_v43  ;;  %v1864_v42 = vshll.u32 %v8417_v58, %v1855_v43 }
 0x2c8   : > { %v1717_v12 = vxor.u32 2147483648, %v1716_v61  ;;  %v1591_v33 = vshrl.u32 %v1590_v38, 30  ;;  %v1867_v19 = vshll.u32 %v8418_v28, %v1855_v43  ;;  %v1870_v27 = vshll.u32 %v8419_v46, %v1855_v43  ;;  %v502_v43 = vpop.permute.xlu1 %501 }
 0x2c9   : > { %v1859_v21 = vshrl.u32 %v8416_v49, %v1856_v41  ;;  %v1862_v32 = vshrl.u32 %v8417_v58, %v1856_v41  ;;  %v1865_v52 = vshrl.u32 %v8418_v28, %v1856_v41  ;;  %v1868_v16 = vshrl.u32 %v8419_v46, %v1856_v41 }
 0x2ca   : > { %v1718_v40 = vsel %vm1635_vm11, %v1717_v12, %v1716_v61  ;;  %v1871_v29 = vshrl.u32 %v8420_v25, %v1856_v41  ;;  %v1592_v45 = vshll.u32 %v1591_v33, 30  ;;  %v1740_v35 = vand.u32 2139095040, %v6225_v4 }
 0x2cb   : > { %v1721_v1 = vsel %vm6129_vm10, %v5955_v0, %v1718_v40  ;;  %v1860_v51 = vor.u32 %v1859_v21, %v1858_v47  ;;  %v1863_v62 = vor.u32 %v1862_v32, %v1861_v60  ;;  %v1866_v18 = vor.u32 %v1865_v52, %v1864_v42 }
 0x2cc   : > { %4810 = vcosq.f32 %v1721_v1  ;;  %v1869_v50 = vor.u32 %v1868_v16, %v1867_v19  ;;  %v6242_v24 = vsub.s32 %v1589_v55, %v1592_v45  ;;  %v1872_v20 = vor.u32 %v1871_v29, %v1870_v27 }
 0x2cd   : > { %4812 = vsinq.f32 %v1721_v1  ;;  %v1857_v22 = vshrl.u32 %v8415_v37, %v1856_v41  ;;  %vm1873_vm10 = vcmp.lt.s32.totalorder %v6222_v30, 1  ;;  %vm1876_vm11 = vcmp.lt.s32.totalorder %v6222_v30, 4 }
 0x2ce   : > { %v1595_v2 = vsub.s32 0, %v6242_v24  ;;  %vm1732_vm12 = vcmp.eq.s32.totalorder %v6220_v63, 2  ;;  %vm1875_vm13 = vcmp.lt.s32.totalorder %v6222_v30, 3  ;;  %v1878_v5 = vsel %vm1876_vm11, %v1866_v18, 2102212464 }
 0x2cf   : > { %v1881_v39 = vsel %vm1873_vm10, %v1860_v51, %v1863_v62  ;;  %v1882_v26 = vsel %vm1876_vm11, %v1869_v50, 920167782  ;;  %vm1729_vm15 = vcmp.eq.s32.totalorder %v6220_v63, 0  ;;  %v1615_v23 = vsub.s32 4, %v1591_v33 }
 0x2d0   : > { %v4432_v56 = vmin.u32 %v1595_v2, %v6242_v24  ;;  %vm1874_vm0 = vcmp.lt.s32.totalorder %v6222_v30, 2  ;;  %v1883_v55 = vsel %vm1875_vm13, %v1866_v18, %v1882_v26  ;;  %vm1728_vm14 = vcmp.lt.s32.totalorder %v6220_v63, 2 }
 0x2d1   : > { %v1884_v61 = vsel %vm1874_vm0, %v1881_v39, %v1883_v55  ;;  %v1885_v59 = vsel %vm1873_vm10, %v1863_v62, %v1866_v18  ;;  %v1886_v38 = vsel %vm1876_vm11, %v1872_v20, 1326507024  ;;  %v1741_v41 = vshrl.u32 %v1740_v35, 23 }
 0x2d2   : > { %vm1725_vm4 = vweird.f32 %v5955_v0  ;;  %v1597_v12 = vclz %v4432_v56  ;;  %v1877_v47 = vsel %vm1873_vm10, %v1857_v22, %v1860_v51  ;;  %v1879_v60 = vsel %vm1875_vm13, %v1863_v62, %v1878_v5 }
 0x2d3   : > { %v1737_v42 = vand.u32 2147483647, %v6225_v4  ;;  %v1887_v21 = vsel %vm1875_vm13, %v1869_v50, %v1886_v38  ;;  %v6281_v32 = vmul.u32.u64.low %v6245_v34, %v1884_v61  ;;  %v6282_v19 = vmul.u32.u64.high %v6245_v34, %v1884_v61, %v6281_v32 }
 0x2d4   : > { %v806_v40 = vsel %vm5510_vm3, %v502_v43, %v5466_v6  ;;  %v4433_v52 = vadd.s32 4294967294, %v1597_v12  ;;  %v1616_v16 = vsel %vm1531_vm8, %v1615_v23, %v1591_v33  ;;  %v1888_v29 = vsel %vm1874_vm0, %v1885_v59, %v1887_v21 }
 0x2d5   : > { %v4439_v1 = vadd.s32 4294967169, %v1741_v41  ;;  %v1585_v51 = vadd.s32 %v6185_v53, %v6194_v54  ;;  %v1880_v27 = vsel %vm1874_vm0, %v1877_v47, %v1879_v60  ;;  %v1744_v33 = vand.u32 8388607, %v1737_v42 }
 0x2d6   : > { %v4811_v45 = vpop.eup %4810  ;;  %v6297_v62 = vmul.u32.u64.low %v6245_v34, %v1888_v29  ;;  %v6298_v18 = vmul.u32.u64.high %v6245_v34, %v1888_v29, %v6297_v62  ;;  %vm4434_vm1 = vcmp.lt.s32.totalorder %v4433_v52, 0  ;;  %v1618_v22 = vsel %vm6250_vm9, 0, %v1616_v16 }
 0x2d7   : > { %v4813_v6 = vpop.eup %4812  ;;  %v1733_v50 = vxor.u32 2147483648, %v4811_v45  ;;  %v1747_v20 = vadd.s32 1, %v4439_v1  ;;  %v1600_v2 = vsel %vm4434_vm1, 0, %v4433_v52  ;;  %v1899_v53 = vadd.s32 1, %v6282_v19 }
 0x2d8   : > { %v1730_v35 = vxor.u32 2147483648, %v4813_v6  ;;  %v1601_v30 = vsub.s32 32, %v1600_v2  ;;  %v1605_v5 = vsub.s32 4294967266, %v1600_v2  ;;  %v1896_v39 = vmul.u32 %v6245_v34, %v1880_v27 }
 0x2d9   : > { %v1734_v54 = vsel %vm1732_vm12, %v1733_v50, %v4813_v6  ;;  %v1602_v56 = vshll.u32 %v6242_v24, %v1600_v2  ;;  %vm1898_vm2 = vc.u32 %v6298_v18, %v6281_v32  ;;  %vm1748_vm5 = vcmp.gt.s32.totalorder %v1747_v20, 0 }
 0x2da   : > { %v1731_v26 = vsel %vm1729_vm15, %v4811_v45, %v1730_v35  ;;  %v1603_v55 = vshrl.u32 %v1585_v51, %v1601_v30  ;;  %v1606_v43 = vadd.s32 127, %v1605_v5  ;;  %v1900_v61 = vsel %vm1898_vm2, %v1899_v53, %v6282_v19 }
 0x2db   : > { %v1735_v23 = vsel %vm1728_vm14, %v1731_v26, %v1734_v54  ;;  %v1901_v34 = vadd.s32 %v1900_v61, %v1896_v39  ;;  %v1749_v38 = vsel %vm1748_vm5, %v1747_v20, 0  ;;  %v845_v41 = vmul.f32 %v6054_v3, %v806_v40 }
 0x2dc   : > { %v1736_v59 = vsel %vm1725_vm4, nan, %v1735_v23  ;;  %v1604_v24 = vor.u32 %v1603_v55, %v1602_v56  ;;  %v1607_v12 = vshll.u32 %v1606_v43, 23  ;;  %v1751_v47 = vand.u32 31, %v1749_v38 }
 0x2dd   : > { %4240 = vst [vmem:[%s5813_s18 + $0x38] sm:$0xff] %v1736_v59  ;;  %v1902_v60 = vadd.s32 536870912, %v1901_v34  ;;  %v1622_v52 = vadd.s32 3, %v1618_v22  ;;  %v1745_v1 = vor.u32 8388608, %v1744_v33  ;;  %v6323_v19 = vadd.f32 %v6072_v48, %v845_v41 }
 0x2de   : > { %v1608_v21 = vor.u32 4788187, %v1607_v12  ;;  %v1752_v63 = vsub.s32 32, %v1751_v47  ;;  %v1611_v16 = vcvt.s32.f32 %v1604_v24  ;;  %v1754_v45 = vshll.u32 %v8415_v37, %v1751_v47 }
 0x2df   : > { %v6320_v29 = vshrl.u32 %v1902_v60, 30  ;;  %v1757_v62 = vshll.u32 %v8416_v49, %v1751_v47  ;;  %v1750_v33 = vshrl.u32 %v1749_v38, 5  ;;  %v1760_v35 = vshll.u32 %v8417_v58, %v1751_v47 }
 0x2e0   : > { %v1609_v0 = vand.u32 2147483647, %v1608_v21  ;;  %v1755_v40 = vshrl.u32 %v8416_v49, %v1752_v63  ;;  %v1758_v51 = vshrl.u32 %v8417_v58, %v1752_v63  ;;  %v1761_v6 = vshrl.u32 %v8418_v28, %v1752_v63 }
 0x2e1   : > { %v1904_v27 = vshll.u32 %v6320_v29, 30  ;;  %v1764_v50 = vshrl.u32 %v8419_v46, %v1752_v63  ;;  %v1763_v2 = vshll.u32 %v8418_v28, %v1751_v47  ;;  %v1767_v26 = vshrl.u32 %v8420_v25, %v1752_v63 }
 0x2e2   : > { %v1612_v20 = vmul.f32 %v1611_v16, %v1609_v0  ;;  %v1756_v53 = vor.u32 %v1755_v40, %v1754_v45  ;;  %v1759_v54 = vor.u32 %v1758_v51, %v1757_v62  ;;  %v1762_v5 = vor.u32 %v1761_v6, %v1760_v35 }
 0x2e3   : > { %v6334_v22 = vsub.s32 %v1901_v34, %v1904_v27  ;;  %v1765_v39 = vor.u32 %v1764_v50, %v1763_v2  ;;  %v6337_v56 = vand.u32 3, %v1622_v52  ;;  %v1766_v55 = vshll.u32 %v8419_v46, %v1751_v47 }
 0x2e4   : > { %v1613_v30 = vxor.u32 2147483648, %v1612_v20  ;;  %v6341_v43 = vshll.u32 %v1745_v1, 8  ;;  %vm1843_vm6 = vcmp.lt.s32.totalorder %v6125_v17, 0  ;;  %v1753_v59 = vshrl.u32 %v8415_v37, %v1752_v63 }
 0x2e5   : > { %v1907_v23 = vsub.s32 0, %v6334_v22  ;;  %vm1769_vm7 = vcmp.lt.s32.totalorder %v1750_v33, 1  ;;  %v2052_v34 = vand.u32 2139095040, %v6323_v19  ;;  %v1768_v24 = vor.u32 %v1767_v26, %v1766_v55 }
 0x2e6   : > { %v1614_v61 = vsel %vm1531_vm8, %v1613_v30, %v1612_v20  ;;  %vm1772_vm10 = vcmp.lt.s32.totalorder %v1750_v33, 4  ;;  %v1777_v47 = vsel %vm1769_vm7, %v1756_v53, %v1759_v54  ;;  %v1927_v52 = vsub.s32 4, %v6320_v29 }
 0x2e7   : > { %v1617_v38 = vsel %vm6250_vm9, %v6075_v44, %v1614_v61  ;;  %v4444_v41 = vmin.u32 %v1907_v23, %v6334_v22  ;;  %v1774_v12 = vsel %vm1772_vm10, %v1762_v5, 2102212464  ;;  %v1778_v60 = vsel %vm1772_vm10, %v1765_v39, 920167782 }
 0x2e8   : > { %4814 = vcosq.f32 %v1617_v38  ;;  %vm1771_vm8 = vcmp.lt.s32.totalorder %v1750_v33, 3  ;;  %vm1770_vm11 = vcmp.lt.s32.totalorder %v1750_v33, 2  ;;  %v1773_v36 = vsel %vm1769_vm7, %v1753_v59, %v1756_v53 }
 0x2e9   : > { %4816 = vsinq.f32 %v1617_v38  ;;  %v1909_v21 = vclz %v4444_v41  ;;  %v1779_v63 = vsel %vm1771_vm8, %v1762_v5, %v1778_v60  ;;  %v1781_v16 = vsel %vm1769_vm7, %v1759_v54, %v1762_v5 }
 0x2ea   : > { %v1775_v0 = vsel %vm1771_vm8, %v1759_v54, %v1774_v12  ;;  %v1780_v45 = vsel %vm1770_vm11, %v1777_v47, %v1779_v63  ;;  %v1782_v40 = vsel %vm1772_vm10, %v1768_v24, 1326507024  ;;  %v2053_v6 = vshrl.u32 %v2052_v34, 23  ;;  %v498_v47 = vpop.permute.xlu0 %497 }
 0x2eb   : > { %v4445_v1 = vadd.s32 4294967294, %v1909_v21  ;;  %v1783_v51 = vsel %vm1771_vm8, %v1765_v39, %v1782_v40  ;;  %v6361_v27 = vmul.u32.u64.low %v6341_v43, %v1780_v45  ;;  %v6362_v62 = vmul.u32.u64.high %v6341_v43, %v1780_v45, %v6361_v27 }
 0x2ec   : > { %vm6367_vm9 = vcmp.le.f32.partialorder %v1841_v57, 0.7853982  ;;  %v1897_v20 = vadd.s32 %v6281_v32, %v6298_v18  ;;  %v1784_v35 = vsel %vm1770_vm11, %v1781_v16, %v1783_v51  ;;  %v4451_v30 = vadd.s32 4294967169, %v2053_v6 }
 0x2ed   : > { %vm4446_vm12 = vcmp.lt.s32.totalorder %v4445_v1, 0  ;;  %v6375_v53 = vmul.u32.u64.low %v6341_v43, %v1784_v35  ;;  %v6376_v54 = vmul.u32.u64.high %v6341_v43, %v1784_v35, %v6375_v53  ;;  %v1928_v57 = vsel %vm1843_vm6, %v1927_v52, %v6320_v29 }
 0x2ee   : > { %v1912_v2 = vsel %vm4446_vm12, 0, %v4445_v1  ;;  %v1776_v26 = vsel %vm1770_vm11, %v1773_v36, %v1775_v0  ;;  %vm1624_vm13 = vcmp.lt.s32.totalorder %v6337_v56, 2  ;;  %vm1625_vm15 = vcmp.eq.s32.totalorder %v6337_v56, 0 }
 0x2ef   : > { %v1913_v5 = vsub.s32 32, %v1912_v2  ;;  %v1917_v39 = vsub.s32 4294967266, %v1912_v2  ;;  %v1795_v32 = vadd.s32 1, %v6362_v62  ;;  %v2059_v18 = vadd.s32 1, %v4451_v30 }
 0x2f0   : > { %v1914_v23 = vshll.u32 %v6334_v22, %v1912_v2  ;;  %v2049_v59 = vand.u32 2147483647, %v6323_v19  ;;  %v1930_v38 = vsel %vm6367_vm9, 0, %v1928_v57  ;;  %v1792_v29 = vmul.u32 %v6341_v43, %v1776_v26 }
 0x2f1   : > { %v1915_v55 = vshrl.u32 %v1897_v20, %v1913_v5  ;;  %v1918_v61 = vadd.s32 127, %v1917_v39  ;;  %vm1794_vm0 = vc.u32 %v6376_v54, %v6361_v27  ;;  %vm2060_vm14 = vcmp.gt.s32.totalorder %v2059_v18, 0 }
 0x2f2   : > { %v4815_v34 = vpop.eup %4814  ;;  %v1796_v22 = vsel %vm1794_vm0, %v1795_v32, %v6362_v62  ;;  %vm1628_vm4 = vcmp.eq.s32.totalorder %v6337_v56, 2  ;;  %v2061_v52 = vsel %vm2060_vm14, %v2059_v18, 0  ;;  %v1934_v43 = vadd.s32 3, %v1930_v38 }
 0x2f3   : > { %v4817_v33 = vpop.eup %4816  ;;  %v1629_v41 = vxor.u32 2147483648, %v4815_v34  ;;  %v1916_v24 = vor.u32 %v1915_v55, %v1914_v23  ;;  %v1919_v12 = vshll.u32 %v1918_v61, 23  ;;  %v1797_v21 = vadd.s32 %v1796_v22, %v1792_v29 }
 0x2f4   : > { %v1626_v60 = vxor.u32 2147483648, %v4817_v33  ;;  %v2056_v16 = vand.u32 8388607, %v2049_v59  ;;  %v2063_v45 = vand.u32 31, %v2061_v52  ;;  %v805_v40 = vsel %vm5510_vm3, %v498_v47, %v5468_v7 }
 0x2f5   : > { %v1630_v36 = vsel %vm1628_vm4, %v1629_v41, %v4817_v33  ;;  %v1920_v63 = vor.u32 4788187, %v1919_v12  ;;  %v1798_v0 = vadd.s32 536870912, %v1797_v21  ;;  %vm1621_vm1 = vweird.f32 %v6075_v44 }
 0x2f6   : > { %v1627_v1 = vsel %vm1625_vm15, %v4815_v34, %v1626_v60  ;;  %v1923_v6 = vcvt.s32.f32 %v1916_v24  ;;  %v2064_v2 = vsub.s32 32, %v2063_v45  ;;  %v6405_v30 = vand.u32 3, %v1934_v43 }
 0x2f7   : > { %v1631_v51 = vsel %vm1624_vm13, %v1627_v1, %v1630_v36  ;;  %v1921_v62 = vand.u32 2147483647, %v1920_v63  ;;  %v1799_v35 = vshrl.u32 %v1798_v0, 30  ;;  %v2057_v5 = vor.u32 8388608, %v2056_v16 }
 0x2f8   : > { %v1632_v20 = vsel %vm1621_vm1, nan, %v1631_v51  ;;  %v844_v39 = vmul.f32 %v6054_v3, %v805_v40  ;;  %v2066_v7 = vshll.u32 %v8415_v37, %v2063_v45  ;;  %v2067_v44 = vshrl.u32 %v8416_v49, %v2064_v2 }
 0x2f9   : > { %4239 = vst [vmem:[%s5813_s18 + $0x30] sm:$0xff] %v1632_v20  ;;  %v1924_v53 = vmul.f32 %v1923_v6, %v1921_v62  ;;  %v1800_v57 = vshll.u32 %v1799_v35, 30  ;;  %v2069_v56 = vshll.u32 %v8416_v49, %v2063_v45  ;;  %v2070_v32 = vshrl.u32 %v8417_v58, %v2064_v2 }
 0x2fa   : > { %v2073_v18 = vshrl.u32 %v8418_v28, %v2064_v2  ;;  %v2076_v23 = vshrl.u32 %v8419_v46, %v2064_v2  ;;  %v2062_v61 = vshrl.u32 %v2061_v52, 5  ;;  %v2072_v34 = vshll.u32 %v8417_v58, %v2063_v45 }
 0x2fb   : > { %v1925_v26 = vxor.u32 2147483648, %v1924_v53  ;;  %v6414_v55 = vsub.s32 %v1797_v21, %v1800_v57  ;;  %v2075_v38 = vshll.u32 %v8418_v28, %v2063_v45  ;;  %vm1739_vm2 = vcmp.lt.s32.totalorder %v6225_v4, 0  ;;  %v513_v57 = vpop.permute.xlu1 %512 }
 0x2fc   : > { %v2068_v33 = vor.u32 %v2067_v44, %v2066_v7  ;;  %v2071_v41 = vor.u32 %v2070_v32, %v2069_v56  ;;  %v6421_v24 = vshll.u32 %v2057_v5, 8  ;;  %v2074_v47 = vor.u32 %v2073_v18, %v2072_v34 }
 0x2fd   : > { %v1926_v29 = vsel %vm1843_vm6, %v1925_v26, %v1924_v53  ;;  %v1803_v22 = vsub.s32 0, %v6414_v55  ;;  %v2077_v60 = vor.u32 %v2076_v23, %v2075_v38  ;;  %v2078_v21 = vshll.u32 %v8419_v46, %v2063_v45 }
 0x2fe   : > { %v1929_v12 = vsel %vm6367_vm9, %v6125_v17, %v1926_v29  ;;  %v2079_v52 = vshrl.u32 %v8420_v25, %v2064_v2  ;;  %v6430_v36 = vadd.f32 %v6072_v48, %v844_v39  ;;  %vm6434_vm5 = vcmp.le.f32.partialorder %v1737_v42, 0.7853982 }
 0x2ff   : > { %4818 = vcosq.f32 %v1929_v12  ;;  %v4440_v50 = vmin.u32 %v1803_v22, %v6414_v55  ;;  %vm2081_vm6 = vcmp.lt.s32.totalorder %v2062_v61, 1  ;;  %vm2084_vm7 = vcmp.lt.s32.totalorder %v2062_v61, 4 }
 0x300   : > { %4820 = vsinq.f32 %v1929_v12  ;;  %v1823_v43 = vsub.s32 4, %v1799_v35  ;;  %v2080_v16 = vor.u32 %v2079_v52, %v2078_v21  ;;  %v2089_v1 = vsel %vm2081_vm6, %v2068_v33, %v2071_v41 }
 0x301   : > { %v2090_v0 = vsel %vm2084_vm7, %v2077_v60, 920167782  ;;  %v1805_v45 = vclz %v4440_v50  ;;  %v2065_v40 = vshrl.u32 %v8415_v37, %v2064_v2  ;;  %vm2083_vm10 = vcmp.lt.s32.totalorder %v2062_v61, 3 }
 0x302   : > { %v2086_v51 = vsel %vm2084_vm7, %v2074_v47, 2102212464  ;;  %vm2082_vm8 = vcmp.lt.s32.totalorder %v2062_v61, 2  ;;  %v2091_v62 = vsel %vm2083_vm10, %v2074_v47, %v2090_v0  ;;  %v2093_v42 = vsel %vm2081_vm6, %v2071_v41, %v2074_v47 }
 0x303   : > { %v2094_v6 = vsel %vm2084_vm7, %v2080_v16, 1326507024  ;;  %vm1937_vm11 = vcmp.eq.s32.totalorder %v6405_v30, 0  ;;  %v4441_v20 = vadd.s32 4294967294, %v1805_v45  ;;  %v2085_v53 = vsel %vm2081_vm6, %v2065_v40, %v2068_v33 }
 0x304   : > { %v2092_v5 = vsel %vm2082_vm8, %v2089_v1, %v2091_v62  ;;  %v2095_v39 = vsel %vm2083_vm10, %v2077_v60, %v2094_v6  ;;  %vm1936_vm9 = vcmp.lt.s32.totalorder %v6405_v30, 2  ;;  %v2087_v7 = vsel %vm2083_vm10, %v2071_v41, %v2086_v51 }
 0x305   : > { %v2096_v2 = vsel %vm2082_vm8, %v2093_v42, %v2095_v39  ;;  %v6448_v44 = vmul.u32.u64.low %v6421_v24, %v2092_v5  ;;  %v6449_v56 = vmul.u32.u64.high %v6421_v24, %v2092_v5, %v6448_v44  ;;  %vm4442_vm12 = vcmp.lt.s32.totalorder %v4441_v20, 0 }
 0x306   : > { %v1824_v26 = vsel %vm1739_vm2, %v1823_v43, %v1799_v35  ;;  %v6455_v32 = vmul.u32.u64.low %v6421_v24, %v2096_v2  ;;  %v6456_v18 = vmul.u32.u64.high %v6421_v24, %v2096_v2, %v6455_v32  ;;  %vm1940_vm13 = vcmp.eq.s32.totalorder %v6405_v30, 2 }
 0x307   : > { %v1808_v23 = vsel %vm4442_vm12, 0, %v4441_v20  ;;  %v1948_v34 = vand.u32 2139095040, %v6430_v36  ;;  %v808_v38 = vsel %vm5510_vm3, %v513_v57, %v5470_v8  ;;  %v1793_v29 = vadd.s32 %v6361_v27, %v6376_v54 }
 0x308   : > { %v1809_v33 = vsub.s32 32, %v1808_v23  ;;  %v1813_v41 = vsub.s32 4294967266, %v1808_v23  ;;  %v2088_v35 = vsel %vm2082_vm8, %v2085_v53, %v2087_v7  ;;  %v1826_v22 = vsel %vm6434_vm5, 0, %v1824_v26 }
 0x309   : > { %v4819_v12 = vpop.eup %4818  ;;  %v2107_v47 = vadd.s32 1, %v6449_v56  ;;  %v1945_v60 = vand.u32 2147483647, %v6430_v36  ;;  %v1949_v21 = vshrl.u32 %v1948_v34, 23  ;;  %v1810_v8 = vshll.u32 %v6414_v55, %v1808_v23 }
 0x30a   : > { %v4821_v52 = vpop.eup %4820  ;;  %v1941_v50 = vxor.u32 2147483648, %v4819_v12  ;;  %v1811_v43 = vshrl.u32 %v1793_v29, %v1809_v33  ;;  %v1814_v16 = vadd.s32 127, %v1813_v41  ;;  %v2104_v54 = vmul.u32 %v6421_v24, %v2088_v35 }
 0x30b   : > { %v1938_v27 = vxor.u32 2147483648, %v4821_v52  ;;  %vm2106_vm15 = vc.u32 %v6456_v18, %v6448_v44  ;;  %v4447_v61 = vadd.s32 4294967169, %v1949_v21  ;;  %v847_v42 = vmul.f32 %v6054_v3, %v808_v38 }
 0x30c   : > { %v1942_v1 = vsel %vm1940_vm13, %v1941_v50, %v4821_v52  ;;  %v1812_v0 = vor.u32 %v1811_v43, %v1810_v8  ;;  %v1815_v45 = vshll.u32 %v1814_v16, 23  ;;  %v2108_v40 = vsel %vm2106_vm15, %v2107_v47, %v6449_v56 }
 0x30d   : > { %v1939_v55 = vsel %vm1937_vm11, %v4819_v12, %v1938_v27  ;;  %v2109_v51 = vadd.s32 %v2108_v40, %v2104_v54  ;;  %v1955_v62 = vadd.s32 1, %v4447_v61  ;;  %vm1933_vm0 = vweird.f32 %v6125_v17 }
 0x30e   : > { %v1943_v24 = vsel %vm1936_vm9, %v1939_v55, %v1942_v1  ;;  %v1816_v6 = vor.u32 4788187, %v1815_v45  ;;  %v1830_v53 = vadd.s32 3, %v1826_v22  ;;  %v1819_v57 = vcvt.s32.f32 %v1812_v0 }
 0x30f   : > { %v1944_v20 = vsel %vm1933_vm0, nan, %v1943_v24  ;;  %v2110_v5 = vadd.s32 536870912, %v2109_v51  ;;  %vm1956_vm14 = vcmp.gt.s32.totalorder %v1955_v62, 0  ;;  %v1952_v7 = vand.u32 8388607, %v1945_v60 }
 0x310   : > { %4242 = vst [vmem:[%s5813_s18 + $0x48] sm:$0xff] %v1944_v20  ;;  %v1817_v39 = vand.u32 2147483647, %v1816_v6  ;;  %v1957_v2 = vsel %vm1956_vm14, %v1955_v62, 0  ;;  %v6489_v17 = vadd.f32 %v6072_v48, %v847_v42  ;;  %v6492_v34 = vand.u32 3, %v1830_v53 }
 0x311   : > { %v6486_v56 = vshrl.u32 %v2110_v5, 30  ;;  %v1959_v3 = vand.u32 31, %v1957_v2  ;;  %v1953_v38 = vor.u32 8388608, %v1952_v7  ;;  %v1958_v33 = vshrl.u32 %v1957_v2, 5  ;;  %v509_v2 = vpop.permute.xlu0 %508 }
 0x312   : > { %v1820_v30 = vmul.f32 %v1819_v57, %v1817_v39  ;;  %v2260_v35 = vand.u32 2139095040, %v6489_v17  ;;  %vm1836_vm1 = vcmp.eq.s32.totalorder %v6492_v34, 2  ;;  %vm1833_vm7 = vcmp.eq.s32.totalorder %v6492_v34, 0 }
 0x313   : > { %v2112_v26 = vshll.u32 %v6486_v56, 30  ;;  %v1960_v32 = vsub.s32 32, %v1959_v3  ;;  %v1962_v48 = vshll.u32 %v8415_v37, %v1959_v3  ;;  %v1965_v50 = vshll.u32 %v8416_v49, %v1959_v3 }
 0x314   : > { %v1821_v23 = vxor.u32 2147483648, %v1820_v30  ;;  %v1968_v8 = vshll.u32 %v8417_v58, %v1959_v3  ;;  %v1971_v16 = vshll.u32 %v8418_v28, %v1959_v3  ;;  %v1974_v63 = vshll.u32 %v8419_v46, %v1959_v3 }
 0x315   : > { %v6494_v29 = vsub.s32 %v2109_v51, %v2112_v26  ;;  %v1963_v41 = vshrl.u32 %v8416_v49, %v1960_v32  ;;  %v1966_v22 = vshrl.u32 %v8417_v58, %v1960_v32  ;;  %v1969_v47 = vshrl.u32 %v8418_v28, %v1960_v32 }
 0x316   : > { %v1822_v12 = vsel %vm1739_vm2, %v1821_v23, %v1820_v30  ;;  %v1972_v27 = vshrl.u32 %v8419_v46, %v1960_v32  ;;  %v1975_v45 = vshrl.u32 %v8420_v25, %v1960_v32  ;;  %v6514_v40 = vshll.u32 %v1953_v38, 8 }
 0x317   : > { %v1825_v21 = vsel %vm6434_vm5, %v6225_v4, %v1822_v12  ;;  %v2115_v52 = vsub.s32 0, %v6494_v29  ;;  %v1964_v43 = vor.u32 %v1963_v41, %v1962_v48  ;;  %v1967_v61 = vor.u32 %v1966_v22, %v1965_v50 }
 0x318   : > { %4822 = vcosq.f32 %v1825_v21  ;;  %v1970_v1 = vor.u32 %v1969_v47, %v1968_v8  ;;  %v1973_v0 = vor.u32 %v1972_v27, %v1971_v16  ;;  %v1961_v51 = vshrl.u32 %v8415_v37, %v1960_v32 }
 0x319   : > { %4824 = vsinq.f32 %v1825_v21  ;;  %v4452_v54 = vmin.u32 %v2115_v52, %v6494_v29  ;;  %vm1977_vm4 = vcmp.lt.s32.totalorder %v1958_v33, 1  ;;  %v2261_v62 = vshrl.u32 %v2260_v35, 23 }
 0x31a   : > { %v1976_v42 = vor.u32 %v1975_v45, %v1974_v63  ;;  %vm1978_vm2 = vcmp.lt.s32.totalorder %v1958_v33, 2  ;;  %vm1979_vm5 = vcmp.lt.s32.totalorder %v1958_v33, 3  ;;  %vm1980_vm6 = vcmp.lt.s32.totalorder %v1958_v33, 4 }
 0x31b   : > { %v2117_v55 = vclz %v4452_v54  ;;  %v1982_v6 = vsel %vm1980_vm6, %v1970_v1, 2102212464  ;;  %v1985_v20 = vsel %vm1977_vm4, %v1964_v43, %v1967_v61  ;;  %v1986_v53 = vsel %vm1980_vm6, %v1973_v0, 920167782 }
 0x31c   : > { %vm1832_vm10 = vcmp.lt.s32.totalorder %v6492_v34, 2  ;;  %v1981_v5 = vsel %vm1977_vm4, %v1961_v51, %v1964_v43  ;;  %v1987_v39 = vsel %vm1979_vm5, %v1970_v1, %v1986_v53  ;;  %v1989_v57 = vsel %vm1977_vm4, %v1967_v61, %v1970_v1 }
 0x31d   : > { %v4453_v24 = vadd.s32 4294967294, %v2117_v55  ;;  %v1990_v7 = vsel %vm1980_vm6, %v1976_v42, 1326507024  ;;  %vm1829_vm8 = vweird.f32 %v6225_v4  ;;  %vm2051_vm11 = vcmp.lt.s32.totalorder %v6323_v19, 0 }
 0x31e   : > { %v1983_v3 = vsel %vm1979_vm5, %v1967_v61, %v1982_v6  ;;  %v1988_v30 = vsel %vm1978_vm2, %v1985_v20, %v1987_v39  ;;  %v1991_v26 = vsel %vm1979_vm5, %v1973_v0, %v1990_v7  ;;  %v2105_v35 = vadd.s32 %v6448_v44, %v6456_v18 }
 0x31f   : > { %vm4454_vm9 = vcmp.lt.s32.totalorder %v4453_v24, 0  ;;  %v1992_v23 = vsel %vm1978_vm2, %v1989_v57, %v1991_v26  ;;  %v6528_v38 = vmul.u32.u64.low %v6514_v40, %v1988_v30  ;;  %v6529_v41 = vmul.u32.u64.high %v6514_v40, %v1988_v30, %v6528_v38  ;;  %v6581_v26 = vld [vmem:[%s8366_s4] ss:$0 sm:$0xff] }
 0x320   : > { %v2120_v32 = vsel %vm4454_vm9, 0, %v4453_v24  ;;  %v807_v22 = vsel %vm5510_vm3, %v509_v2, %v5472_v9  ;;  %v1984_v21 = vsel %vm1978_vm2, %v1981_v5, %v1983_v3  ;;  %v4459_v8 = vadd.s32 4294967169, %v2261_v62  ;;  %v6559_v24 = vld [vmem:[%s8365_s3] ss:$0 sm:$0xff] }
 0x321   : > { %v2121_v12 = vsub.s32 32, %v2120_v32  ;;  %v2125_v48 = vsub.s32 4294967266, %v2120_v32  ;;  %v6539_v52 = vmul.u32.u64.low %v6514_v40, %v1992_v23  ;;  %v6540_v50 = vmul.u32.u64.high %v6514_v40, %v1992_v23, %v6539_v52 }
 0x322   : > { %v4823_v47 = vpop.eup %4822  ;;  %v2122_v27 = vshll.u32 %v6494_v29, %v2120_v32  ;;  %v2135_v61 = vsub.s32 4, %v6486_v56  ;;  %v2003_v1 = vadd.s32 1, %v6529_v41  ;;  %v2267_v9 = vadd.s32 1, %v4459_v8 }
 0x323   : > { %v4825_v43 = vpop.eup %4824  ;;  %v1837_v16 = vxor.u32 2147483648, %v4823_v47  ;;  %v2123_v54 = vshrl.u32 %v2105_v35, %v2121_v12  ;;  %v2126_v44 = vadd.s32 127, %v2125_v48  ;;  %v2257_v45 = vand.u32 2147483647, %v6489_v17 }
 0x324   : > { %v1834_v18 = vxor.u32 2147483648, %v4825_v43  ;;  %v2000_v29 = vmul.u32 %v6514_v40, %v1984_v21  ;;  %vm2002_vm12 = vc.u32 %v6540_v50, %v6528_v38  ;;  %vm2268_vm13 = vcmp.gt.s32.totalorder %v2267_v9, 0 }
 0x325   : > { %v1838_v33 = vsel %vm1836_vm1, %v1837_v16, %v4825_v43  ;;  %v2124_v0 = vor.u32 %v2123_v54, %v2122_v27  ;;  %v2127_v63 = vshll.u32 %v2126_v44, 23  ;;  %v2004_v42 = vsel %vm2002_vm12, %v2003_v1, %v6529_v41 }
 0x326   : > { %v1835_v55 = vsel %vm1833_vm7, %v4823_v47, %v1834_v18  ;;  %v846_v6 = vmul.f32 %v6559_v24, %v807_v22  ;;  %v2136_v20 = vsel %vm2051_vm11, %v2135_v61, %v6486_v56  ;;  %v2005_v53 = vadd.s32 %v2004_v42, %v2000_v29 }
 0x327   : > { %v1839_v51 = vsel %vm1832_vm10, %v1835_v55, %v1838_v33  ;;  %v2128_v62 = vor.u32 4788187, %v2127_v63  ;;  %v2269_v34 = vsel %vm2268_vm13, %v2267_v9, 0  ;;  %v2131_v39 = vcvt.s32.f32 %v2124_v0 }
 0x328   : > { %v1840_v40 = vsel %vm1829_vm8, nan, %v1839_v51  ;;  %v2271_v57 = vand.u32 31, %v2269_v34  ;;  %vm6570_vm15 = vcmp.le.f32.partialorder %v2049_v59, 0.7853982  ;;  %v2006_v2 = vadd.s32 536870912, %v2005_v53 }
 0x329   : > { %4241 = vst [vmem:[%s5813_s18 + $0x40] sm:$0xff] %v1840_v40  ;;  %v2129_v5 = vand.u32 2147483647, %v2128_v62  ;;  %v2264_v4 = vand.u32 8388607, %v2257_v45  ;;  %v2138_v56 = vsel %vm6570_vm15, 0, %v2136_v20  ;;  %v6584_v32 = vadd.f32 %v6581_v26, %v846_v6 }
 0x32a   : > { %v2272_v30 = vsub.s32 32, %v2271_v57  ;;  %v6586_v59 = vshrl.u32 %v2006_v2, 30  ;;  %v2270_v23 = vshrl.u32 %v2269_v34, 5  ;;  %v2274_v41 = vshll.u32 %v8415_v37, %v2271_v57 }
 0x32b   : > { %v2132_v3 = vmul.f32 %v2131_v39, %v2129_v5  ;;  %v2277_v35 = vshll.u32 %v8416_v49, %v2271_v57  ;;  %v2280_v47 = vshll.u32 %v8417_v58, %v2271_v57  ;;  %v2283_v8 = vshll.u32 %v8418_v28, %v2271_v57 }
 0x32c   : > { %v2275_v48 = vshrl.u32 %v8416_v49, %v2272_v30  ;;  %v2278_v22 = vshrl.u32 %v8417_v58, %v2272_v30  ;;  %v2008_v21 = vshll.u32 %v6586_v59, 30  ;;  %v2281_v52 = vshrl.u32 %v8418_v28, %v2272_v30 }
 0x32d   : > { %v2133_v12 = vxor.u32 2147483648, %v2132_v3  ;;  %v2284_v43 = vshrl.u32 %v8419_v46, %v2272_v30  ;;  %v2286_v54 = vshll.u32 %v8419_v46, %v2271_v57  ;;  %v2287_v44 = vshrl.u32 %v8420_v25, %v2272_v30 }
 0x32e   : > { %v2276_v27 = vor.u32 %v2275_v48, %v2274_v41  ;;  %v6604_v61 = vsub.s32 %v2005_v53, %v2008_v21  ;;  %v2279_v1 = vor.u32 %v2278_v22, %v2277_v35  ;;  %v2282_v9 = vor.u32 %v2281_v52, %v2280_v47 }
 0x32f   : > { %v2134_v16 = vsel %vm2051_vm11, %v2133_v12, %v2132_v3  ;;  %v2265_v33 = vor.u32 8388608, %v2264_v4  ;;  %v2285_v0 = vor.u32 %v2284_v43, %v2283_v8  ;;  %v2288_v63 = vor.u32 %v2287_v44, %v2286_v54 }
 0x330   : > { %v2137_v18 = vsel %vm6570_vm15, %v6323_v19, %v2134_v16  ;;  %v2142_v55 = vadd.s32 3, %v2138_v56  ;;  %vm1947_vm0 = vcmp.lt.s32.totalorder %v6430_v36, 0  ;;  %v2011_v29 = vsub.s32 0, %v6604_v61 }
 0x331   : > { %4826 = vcosq.f32 %v2137_v18  ;;  %v2273_v51 = vshrl.u32 %v8415_v37, %v2272_v30  ;;  %vm2289_vm14 = vcmp.lt.s32.totalorder %v2270_v23, 1  ;;  %vm2291_vm4 = vcmp.lt.s32.totalorder %v2270_v23, 3 }
 0x332   : > { %4828 = vsinq.f32 %v2137_v18  ;;  %vm2292_vm1 = vcmp.lt.s32.totalorder %v2270_v23, 4  ;;  %v2156_v62 = vand.u32 2139095040, %v6584_v32  ;;  %v4448_v42 = vmin.u32 %v2011_v29, %v6604_v61 }
 0x333   : > { %v2293_v6 = vsel %vm2289_vm14, %v2273_v51, %v2276_v27  ;;  %v2294_v40 = vsel %vm2292_vm1, %v2282_v9, 2102212464  ;;  %v2297_v20 = vsel %vm2289_vm14, %v2276_v27, %v2279_v1  ;;  %v2298_v34 = vsel %vm2292_vm1, %v2285_v0, 920167782 }
 0x334   : > { %v2295_v53 = vsel %vm2291_vm4, %v2279_v1, %v2294_v40  ;;  %v2301_v5 = vsel %vm2289_vm14, %v2279_v1, %v2282_v9  ;;  %v2302_v39 = vsel %vm2292_vm1, %v2288_v63, 1326507024  ;;  %v2143_v57 = vand.u32 3, %v2142_v55 }
 0x335   : > { %v2013_v7 = vclz %v4448_v42  ;;  %v2031_v2 = vsub.s32 4, %v6586_v59  ;;  %v2305_v4 = vshll.u32 %v2265_v33, 8  ;;  %vm2290_vm2 = vcmp.lt.s32.totalorder %v2270_v23, 2 }
 0x336   : > { %v2299_v3 = vsel %vm2291_vm4, %v2282_v9, %v2298_v34  ;;  %v2303_v56 = vsel %vm2291_vm4, %v2285_v0, %v2302_v39  ;;  %v2157_v30 = vshrl.u32 %v2156_v62, 23  ;;  %vm2141_vm5 = vweird.f32 %v6323_v19  ;;  %v524_v0 = vpop.permute.xlu1 %523 }
 0x337   : > { %vm6618_vm6 = vcmp.le.f32.partialorder %v1945_v60, 0.7853982  ;;  %v4449_v35 = vadd.s32 4294967294, %v2013_v7  ;;  %v2296_v12 = vsel %vm2290_vm2, %v2293_v6, %v2295_v53  ;;  %v2300_v48 = vsel %vm2290_vm2, %v2297_v20, %v2299_v3 }
 0x338   : > { %v2304_v22 = vsel %vm2290_vm2, %v2301_v5, %v2303_v56  ;;  %v6625_v52 = vmul.u32.u64.low %v2305_v4, %v2300_v48  ;;  %v6626_v8 = vmul.u32.u64.high %v2305_v4, %v2300_v48, %v6625_v52  ;;  %vm2145_vm7 = vcmp.eq.s32.totalorder %v2143_v57, 0 }
 0x339   : > { %v6622_v47 = vmul.u32.u64.low %v2305_v4, %v2304_v22  ;;  %v6623_v21 = vmul.u32.u64.high %v2305_v4, %v2304_v22, %v6622_v47  ;;  %vm2148_vm10 = vcmp.eq.s32.totalorder %v2143_v57, 2  ;;  %vm4450_vm8 = vcmp.lt.s32.totalorder %v4449_v35, 0 }
 0x33a   : > { %v4455_v23 = vadd.s32 4294967169, %v2157_v30  ;;  %v2001_v60 = vadd.s32 %v6528_v38, %v6540_v50  ;;  %v2016_v16 = vsel %vm4450_vm8, 0, %v4449_v35  ;;  %v2032_v27 = vsel %vm1947_vm0, %v2031_v2, %v6586_v59 }
 0x33b   : > { %v4827_v43 = vpop.eup %4826  ;;  %v2153_v54 = vand.u32 2147483647, %v6584_v32  ;;  %v2017_v1 = vsub.s32 32, %v2016_v16  ;;  %v2021_v9 = vsub.s32 4294967266, %v2016_v16  ;;  %v2312_v33 = vmul.u32 %v2305_v4, %v2296_v12 }
 0x33c   : > { %v4829_v44 = vpop.eup %4828  ;;  %v2149_v18 = vxor.u32 2147483648, %v4827_v43  ;;  %v2018_v55 = vshll.u32 %v6604_v61, %v2016_v16  ;;  %vm2314_vm11 = vc.u32 %v6623_v21, %v6625_v52  ;;  %v2315_v38 = vadd.s32 1, %v6626_v8 }
 0x33d   : > { %v2146_v63 = vxor.u32 2147483648, %v4829_v44  ;;  %v2019_v59 = vshrl.u32 %v2001_v60, %v2017_v1  ;;  %v2022_v29 = vadd.s32 127, %v2021_v9  ;;  %v2163_v51 = vadd.s32 1, %v4455_v23 }
 0x33e   : > { %v2150_v50 = vsel %vm2148_vm10, %v2149_v18, %v4829_v44  ;;  %vm2144_vm9 = vcmp.lt.s32.totalorder %v2143_v57, 2  ;;  %v2316_v42 = vsel %vm2314_vm11, %v2315_v38, %v6626_v8  ;;  %v810_v61 = vsel %vm5510_vm3, %v524_v0, %v5474_v10 }
 0x33f   : > { %v2147_v62 = vsel %vm2145_vm7, %v4827_v43, %v2146_v63  ;;  %v2020_v40 = vor.u32 %v2019_v59, %v2018_v55  ;;  %v2023_v20 = vshll.u32 %v2022_v29, 23  ;;  %v2317_v53 = vadd.s32 %v2316_v42, %v2312_v33 }
 0x340   : > { %v2151_v6 = vsel %vm2144_vm9, %v2147_v62, %v2150_v50  ;;  %v2034_v5 = vsel %vm6618_vm6, 0, %v2032_v27  ;;  %v2160_v39 = vand.u32 8388607, %v2153_v54  ;;  %vm2164_vm12 = vcmp.gt.s32.totalorder %v2163_v51, 0 }
 0x341   : > { %v2152_v34 = vsel %vm2141_vm5, nan, %v2151_v6  ;;  %v2024_v57 = vor.u32 4788187, %v2023_v20  ;;  %v2318_v7 = vadd.s32 536870912, %v2317_v53  ;;  %v2165_v2 = vsel %vm2164_vm12, %v2163_v51, 0 }
 0x342   : > { %4244 = vst [vmem:[%s5813_s18 + $0x58] sm:$0xff] %v2152_v34  ;;  %v849_v10 = vmul.f32 %v6559_v24, %v810_v61  ;;  %v2167_v4 = vand.u32 31, %v2165_v2  ;;  %v2027_v56 = vcvt.s32.f32 %v2020_v40  ;;  %v2038_v19 = vadd.s32 3, %v2034_v5 }
 0x343   : > { %v2025_v3 = vand.u32 2147483647, %v2024_v57  ;;  %v6653_v30 = vshrl.u32 %v2318_v7, 30  ;;  %v2161_v35 = vor.u32 8388608, %v2160_v39  ;;  %v2166_v33 = vshrl.u32 %v2165_v2, 5 }
 0x344   : > { %v2168_v12 = vsub.s32 32, %v2167_v4  ;;  %v2170_v47 = vshll.u32 %v8415_v37, %v2167_v4  ;;  %v6658_v8 = vadd.f32 %v6581_v26, %v849_v10  ;;  %v2173_v43 = vshll.u32 %v8416_v49, %v2167_v4 }
 0x345   : > { %v2028_v48 = vmul.f32 %v2027_v56, %v2025_v3  ;;  %v2320_v22 = vshll.u32 %v6653_v30, 30  ;;  %v2176_v18 = vshll.u32 %v8417_v58, %v2167_v4  ;;  %v6668_v9 = vand.u32 3, %v2038_v19 }
 0x346   : > { %v2171_v23 = vshrl.u32 %v8416_v49, %v2168_v12  ;;  %v2174_v60 = vshrl.u32 %v8417_v58, %v2168_v12  ;;  %v2177_v16 = vshrl.u32 %v8418_v28, %v2168_v12  ;;  %v2180_v1 = vshrl.u32 %v8419_v46, %v2168_v12 }
 0x347   : > { %v2029_v27 = vxor.u32 2147483648, %v2028_v48  ;;  %v6664_v44 = vsub.s32 %v2317_v53, %v2320_v22  ;;  %v2179_v63 = vshll.u32 %v8418_v28, %v2167_v4  ;;  %vm2259_vm13 = vcmp.lt.s32.totalorder %v6489_v17, 0 }
 0x348   : > { %v2172_v0 = vor.u32 %v2171_v23, %v2170_v47  ;;  %v2175_v50 = vor.u32 %v2174_v60, %v2173_v43  ;;  %v2178_v59 = vor.u32 %v2177_v16, %v2176_v18  ;;  %v2182_v62 = vshll.u32 %v8419_v46, %v2167_v4 }
 0x349   : > { %v2030_v55 = vsel %vm1947_vm0, %v2029_v27, %v2028_v48  ;;  %v2323_v38 = vsub.s32 0, %v6664_v44  ;;  %v2181_v51 = vor.u32 %v2180_v1, %v2179_v63  ;;  %v2183_v42 = vshrl.u32 %v8420_v25, %v2168_v12 }
 0x34a   : > { %v2033_v29 = vsel %vm6618_vm6, %v6430_v36, %v2030_v55  ;;  %v6681_v6 = vshll.u32 %v2161_v35, 8  ;;  %v2468_v40 = vand.u32 2139095040, %v6658_v8  ;;  %v2343_v20 = vsub.s32 4, %v6653_v30 }
 0x34b   : > { %4830 = vcosq.f32 %v2033_v29  ;;  %v4460_v61 = vmin.u32 %v2323_v38, %v6664_v44  ;;  %v2169_v41 = vshrl.u32 %v8415_v37, %v2168_v12  ;;  %v2184_v53 = vor.u32 %v2183_v42, %v2182_v62 }
 0x34c   : > { %4832 = vsinq.f32 %v2033_v29  ;;  %vm6688_vm15 = vcmp.le.f32.partialorder %v2257_v45, 0.7853982  ;;  %vm2185_vm0 = vcmp.lt.s32.totalorder %v2166_v33, 1  ;;  %vm2186_vm14 = vcmp.lt.s32.totalorder %v2166_v33, 2 }
 0x34d   : > { %v2325_v5 = vclz %v4460_v61  ;;  %vm2188_vm4 = vcmp.lt.s32.totalorder %v2166_v33, 4  ;;  %vm2187_vm1 = vcmp.lt.s32.totalorder %v2166_v33, 3  ;;  %v2193_v57 = vsel %vm2185_vm0, %v2172_v0, %v2175_v50  ;;  %v520_v33 = vpop.permute.xlu0 %519 }
 0x34e   : > { %v2190_v39 = vsel %vm2188_vm4, %v2178_v59, 2102212464  ;;  %v2194_v7 = vsel %vm2188_vm4, %v2181_v51, 920167782  ;;  %vm2044_vm2 = vcmp.eq.s32.totalorder %v6668_v9, 2  ;;  %v2189_v10 = vsel %vm2185_vm0, %v2169_v41, %v2172_v0 }
 0x34f   : > { %v4461_v2 = vadd.s32 4294967294, %v2325_v5  ;;  %v2195_v4 = vsel %vm2187_vm1, %v2178_v59, %v2194_v7  ;;  %v2197_v3 = vsel %vm2185_vm0, %v2175_v50, %v2178_v59  ;;  %v2191_v56 = vsel %vm2187_vm1, %v2175_v50, %v2190_v39 }
 0x350   : > { %v2196_v45 = vsel %vm2186_vm14, %v2193_v57, %v2195_v4  ;;  %v2198_v19 = vsel %vm2188_vm4, %v2184_v53, 1326507024  ;;  %v2469_v35 = vshrl.u32 %v2468_v40, 23  ;;  %vm2040_vm5 = vcmp.lt.s32.totalorder %v6668_v9, 2 }
 0x351   : > { %vm4462_vm6 = vcmp.lt.s32.totalorder %v4461_v2, 0  ;;  %v2199_v12 = vsel %vm2187_vm1, %v2181_v51, %v2198_v19  ;;  %v6696_v48 = vmul.u32.u64.low %v6681_v6, %v2196_v45  ;;  %v6697_v22 = vmul.u32.u64.high %v6681_v6, %v2196_v45, %v6696_v48 }
 0x352   : > { %vm2037_vm7 = vweird.f32 %v6430_v36  ;;  %v2328_v47 = vsel %vm4462_vm6, 0, %v4461_v2  ;;  %v2200_v23 = vsel %vm2186_vm14, %v2197_v3, %v2199_v12  ;;  %v2465_v43 = vand.u32 2147483647, %v6658_v8 }
 0x353   : > { %v4467_v60 = vadd.s32 4294967169, %v2469_v35  ;;  %v2313_v16 = vadd.s32 %v6625_v52, %v6623_v21  ;;  %v2329_v27 = vsub.s32 32, %v2328_v47  ;;  %v2333_v18 = vsub.s32 4294967266, %v2328_v47 }
 0x354   : > { %v2344_v1 = vsel %vm2259_vm13, %v2343_v20, %v6653_v30  ;;  %v2192_v0 = vsel %vm2186_vm14, %v2189_v10, %v2191_v56  ;;  %v6710_v63 = vmul.u32.u64.low %v6681_v6, %v2200_v23  ;;  %v6711_v55 = vmul.u32.u64.high %v6681_v6, %v2200_v23, %v6710_v63 }
 0x355   : > { %v2475_v38 = vadd.s32 1, %v4467_v60  ;;  %v4831_v50 = vpop.eup %4830  ;;  %v2330_v59 = vshll.u32 %v6664_v44, %v2328_v47  ;;  %v2331_v29 = vshrl.u32 %v2313_v16, %v2329_v27  ;;  %v2334_v51 = vadd.s32 127, %v2333_v18 }
 0x356   : > { %v2211_v21 = vadd.s32 1, %v6697_v22  ;;  %v4833_v52 = vpop.eup %4832  ;;  %v2045_v62 = vxor.u32 2147483648, %v4831_v50  ;;  %v2346_v42 = vsel %vm6688_vm15, 0, %v2344_v1  ;;  %v2472_v30 = vand.u32 8388607, %v2465_v43 }
 0x357   : > { %vm2476_vm10 = vcmp.gt.s32.totalorder %v2475_v38, 0  ;;  %v2042_v61 = vxor.u32 2147483648, %v4833_v52  ;;  %v2332_v40 = vor.u32 %v2331_v29, %v2330_v59  ;;  %v2335_v20 = vshll.u32 %v2334_v51, 23 }
 0x358   : > { %v2477_v41 = vsel %vm2476_vm10, %v2475_v38, 0  ;;  %vm2041_vm8 = vcmp.eq.s32.totalorder %v6668_v9, 0  ;;  %v2046_v44 = vsel %vm2044_vm2, %v2045_v62, %v4833_v52  ;;  %v2208_v53 = vmul.u32 %v6681_v6, %v2192_v0 }
 0x359   : > { %vm2210_vm11 = vc.u32 %v6711_v55, %v6696_v48  ;;  %v2043_v5 = vsel %vm2041_vm8, %v4831_v50, %v2042_v61  ;;  %v2336_v39 = vor.u32 4788187, %v2335_v20  ;;  %v809_v7 = vsel %vm5510_vm3, %v520_v33, %v5476_v11 }
 0x35a   : > { %v2212_v57 = vsel %vm2210_vm11, %v2211_v21, %v6697_v22  ;;  %v2047_v2 = vsel %vm2040_vm5, %v2043_v5, %v2046_v44  ;;  %v2350_v10 = vadd.s32 3, %v2346_v42  ;;  %v2479_v3 = vand.u32 31, %v2477_v41 }
 0x35b   : > { %v2213_v4 = vadd.s32 %v2212_v57, %v2208_v53  ;;  %v2048_v6 = vsel %vm2037_vm7, nan, %v2047_v2  ;;  %v2337_v56 = vand.u32 2147483647, %v2336_v39  ;;  %v2339_v45 = vcvt.s32.f32 %v2332_v40 }
 0x35c   : > { %v2473_v19 = vor.u32 8388608, %v2472_v30  ;;  %4243 = vst [vmem:[%s5813_s18 + $0x50] sm:$0xff] %v2048_v6  ;;  %v2478_v12 = vshrl.u32 %v2477_v41, 5  ;;  %v2480_v22 = vsub.s32 32, %v2479_v3  ;;  %v848_v47 = vmul.f32 %v6559_v24, %v809_v7 }
 0x35d   : > { %v2214_v35 = vadd.s32 536870912, %v2213_v4  ;;  %v2340_v23 = vmul.f32 %v2339_v45, %v2337_v56  ;;  %v2482_v11 = vshll.u32 %v8415_v37, %v2479_v3  ;;  %v2485_v9 = vshll.u32 %v8416_v49, %v2479_v3 }
 0x35e   : > { %v2488_v60 = vshll.u32 %v8417_v58, %v2479_v3  ;;  %v2483_v36 = vshrl.u32 %v8416_v49, %v2480_v22  ;;  %v2486_v27 = vshrl.u32 %v8417_v58, %v2480_v22  ;;  %v2491_v18 = vshll.u32 %v8418_v28, %v2479_v3 }
 0x35f   : > { %v2215_v16 = vshrl.u32 %v2214_v35, 30  ;;  %v2341_v1 = vxor.u32 2147483648, %v2340_v23  ;;  %v2489_v0 = vshrl.u32 %v8418_v28, %v2480_v22  ;;  %v2492_v63 = vshrl.u32 %v8419_v46, %v2480_v22 }
 0x360   : > { %v2495_v38 = vshrl.u32 %v8420_v25, %v2480_v22  ;;  %v6744_v50 = vand.u32 3, %v2350_v10  ;;  %v2484_v29 = vor.u32 %v2483_v36, %v2482_v11  ;;  %v2494_v51 = vshll.u32 %v8419_v46, %v2479_v3 }
 0x361   : > { %v2216_v59 = vshll.u32 %v2215_v16, 30  ;;  %v2342_v21 = vsel %vm2259_vm13, %v2341_v1, %v2340_v23  ;;  %v2487_v52 = vor.u32 %v2486_v27, %v2485_v9  ;;  %v2490_v62 = vor.u32 %v2489_v0, %v2488_v60 }
 0x362   : > { %v2493_v42 = vor.u32 %v2492_v63, %v2491_v18  ;;  %v2345_v30 = vsel %vm6688_vm15, %v6489_v17, %v2342_v21  ;;  %v2496_v61 = vor.u32 %v2495_v38, %v2494_v51  ;;  %v2513_v40 = vshll.u32 %v2473_v19, 8  ;;  %v535_v19 = vpop.permute.xlu1 %534 }
 0x363   : > { %v6752_v33 = vsub.s32 %v2213_v4, %v2216_v59  ;;  %4834 = vcosq.f32 %v2345_v30  ;;  %vm2497_vm9 = vcmp.lt.s32.totalorder %v2478_v12, 1  ;;  %vm2500_vm12 = vcmp.lt.s32.totalorder %v2478_v12, 4 }
 0x364   : > { %v6755_v20 = vadd.f32 %v6581_v26, %v848_v47  ;;  %4836 = vsinq.f32 %v2345_v30  ;;  %vm2498_vm13 = vcmp.lt.s32.totalorder %v2478_v12, 2  ;;  %v2502_v44 = vsel %vm2500_vm12, %v2490_v62, 2102212464 }
 0x365   : > { %v2219_v41 = vsub.s32 0, %v6752_v33  ;;  %v2481_v53 = vshrl.u32 %v8415_v37, %v2480_v22  ;;  %vm2499_vm0 = vcmp.lt.s32.totalorder %v2478_v12, 3  ;;  %v2505_v34 = vsel %vm2497_vm9, %v2484_v29, %v2487_v52 }
 0x366   : > { %v2506_v5 = vsel %vm2500_vm12, %v2493_v42, 920167782  ;;  %v2509_v7 = vsel %vm2497_vm9, %v2487_v52, %v2490_v62  ;;  %v2510_v2 = vsel %vm2500_vm12, %v2496_v61, 1326507024  ;;  %v2503_v4 = vsel %vm2499_vm0, %v2487_v52, %v2502_v44 }
 0x367   : > { %v4456_v39 = vmin.u32 %v2219_v41, %v6752_v33  ;;  %v2507_v57 = vsel %vm2499_vm0, %v2490_v62, %v2506_v5  ;;  %v2501_v10 = vsel %vm2497_vm9, %v2481_v53, %v2484_v29  ;;  %v2511_v6 = vsel %vm2499_vm0, %v2493_v42, %v2510_v2 }
 0x368   : > { %v2508_v3 = vsel %vm2498_vm13, %v2505_v34, %v2507_v57  ;;  %vm2155_vm15 = vcmp.lt.s32.totalorder %v6584_v32, 0  ;;  %v2239_v45 = vsub.s32 4, %v2215_v16  ;;  %vm6764_vm14 = vcmp.le.f32.partialorder %v2153_v54, 0.7853982 }
 0x369   : > { %v2221_v56 = vclz %v4456_v39  ;;  %v2512_v22 = vsel %vm2498_vm13, %v2509_v7, %v2511_v6  ;;  %v6769_v47 = vmul.u32.u64.low %v2513_v40, %v2508_v3  ;;  %v6770_v23 = vmul.u32.u64.high %v2513_v40, %v2508_v3, %v6769_v47 }
 0x36a   : > { %v2504_v9 = vsel %vm2498_vm13, %v2501_v10, %v2503_v4  ;;  %v6773_v60 = vmul.u32.u64.low %v2513_v40, %v2512_v22  ;;  %v6774_v36 = vmul.u32.u64.high %v2513_v40, %v2512_v22, %v6773_v60  ;;  %vm2352_vm4 = vcmp.lt.s32.totalorder %v6744_v50, 2 }
 0x36b   : > { %v4457_v11 = vadd.s32 4294967294, %v2221_v56  ;;  %vm2353_vm1 = vcmp.eq.s32.totalorder %v6744_v50, 0  ;;  %v2364_v54 = vand.u32 2139095040, %v6755_v20  ;;  %v812_v27 = vsel %vm5510_vm3, %v535_v19, %v5478_v13 }
 0x36c   : > { %vm2356_vm2 = vcmp.eq.s32.totalorder %v6744_v50, 2  ;;  %v2209_v18 = vadd.s32 %v6696_v48, %v6711_v55  ;;  %v2240_v12 = vsel %vm2155_vm15, %v2239_v45, %v2215_v16  ;;  %v2520_v63 = vmul.u32 %v2513_v40, %v2504_v9 }
 0x36d   : > { %vm4458_vm5 = vcmp.lt.s32.totalorder %v4457_v11, 0  ;;  %v4835_v1 = vpop.eup %4834  ;;  %v2523_v38 = vadd.s32 1, %v6770_v23  ;;  %v2365_v59 = vshrl.u32 %v2364_v54, 23  ;;  %v2361_v13 = vand.u32 2147483647, %v6755_v20 }
 0x36e   : > { %v2224_v0 = vsel %vm4458_vm5, 0, %v4457_v11  ;;  %v4837_v29 = vpop.eup %4836  ;;  %v2357_v51 = vxor.u32 2147483648, %v4835_v1  ;;  %vm2522_vm6 = vc.u32 %v6774_v36, %v6769_v47  ;;  %v2242_v41 = vsel %vm6764_vm14, 0, %v2240_v12 }
 0x36f   : > { %v2225_v21 = vsub.s32 32, %v2224_v0  ;;  %v2229_v52 = vsub.s32 4294967266, %v2224_v0  ;;  %v2354_v62 = vxor.u32 2147483648, %v4837_v29  ;;  %v2226_v42 = vshll.u32 %v6752_v33, %v2224_v0 }
 0x370   : > { %v4463_v48 = vadd.s32 4294967169, %v2365_v59  ;;  %v2358_v55 = vsel %vm2356_vm2, %v2357_v51, %v4837_v29  ;;  %v2524_v61 = vsel %vm2522_vm6, %v2523_v38, %v6770_v23  ;;  %vm2349_vm7 = vweird.f32 %v6489_v17 }
 0x371   : > { %v2227_v16 = vshrl.u32 %v2209_v18, %v2225_v21  ;;  %v2230_v30 = vadd.s32 127, %v2229_v52  ;;  %v2355_v40 = vsel %vm2353_vm1, %v4835_v1, %v2354_v62  ;;  %v2525_v44 = vadd.s32 %v2524_v61, %v2520_v63 }
 0x372   : > { %v2371_v53 = vadd.s32 1, %v4463_v48  ;;  %v2359_v33 = vsel %vm2352_vm4, %v2355_v40, %v2358_v55  ;;  %v851_v7 = vmul.f32 %v6559_v24, %v812_v27  ;;  %v2246_v10 = vadd.s32 3, %v2242_v41 }
 0x373   : > { %v2228_v34 = vor.u32 %v2227_v16, %v2226_v42  ;;  %v2231_v5 = vshll.u32 %v2230_v30, 23  ;;  %v2360_v39 = vsel %vm2349_vm7, nan, %v2359_v33  ;;  %v2526_v57 = vadd.s32 536870912, %v2525_v44 }
 0x374   : > { %vm2372_vm10 = vcmp.gt.s32.totalorder %v2371_v53, 0  ;;  %4246 = vst [vmem:[%s5813_s18 + $0x68] sm:$0xff] %v2360_v39  ;;  %v2368_v4 = vand.u32 8388607, %v2361_v13  ;;  %vm2467_vm8 = vcmp.lt.s32.totalorder %v6658_v8, 0  ;;  %v6806_v23 = vand.u32 3, %v2246_v10 }
 0x375   : > { %v2232_v2 = vor.u32 4788187, %v2231_v5  ;;  %v2373_v3 = vsel %vm2372_vm10, %v2371_v53, 0  ;;  %v2527_v6 = vshrl.u32 %v2526_v57, 30  ;;  %v2235_v45 = vcvt.s32.f32 %v2228_v34 }
 0x376   : > { %v2375_v56 = vand.u32 31, %v2373_v3  ;;  %v2369_v11 = vor.u32 8388608, %v2368_v4  ;;  %v6809_v9 = vadd.f32 %v6581_v26, %v851_v7  ;;  %v2521_v60 = vadd.s32 %v6769_v47, %v6774_v36 }
 0x377   : > { %v2233_v17 = vand.u32 2147483647, %v2232_v2  ;;  %v2528_v50 = vshll.u32 %v2527_v6, 30  ;;  %v6814_v27 = vshrl.u32 %v2373_v3, 5  ;;  %v2551_v51 = vsub.s32 4, %v2527_v6 }
 0x378   : > { %v2376_v19 = vsub.s32 32, %v2375_v56  ;;  %v2378_v1 = vshll.u32 %v8415_v37, %v2375_v56  ;;  %v2381_v59 = vshll.u32 %v8416_v49, %v2375_v56  ;;  %v2384_v29 = vshll.u32 %v8417_v58, %v2375_v56 }
 0x379   : > { %v2236_v22 = vmul.f32 %v2235_v45, %v2233_v17  ;;  %v6812_v54 = vsub.s32 %v2525_v44, %v2528_v50  ;;  %v2387_v52 = vshll.u32 %v8418_v28, %v2375_v56  ;;  %v2390_v30 = vshll.u32 %v8419_v46, %v2375_v56 }
 0x37a   : > { %v2379_v18 = vshrl.u32 %v8416_v49, %v2376_v19  ;;  %v2382_v0 = vshrl.u32 %v8417_v58, %v2376_v19  ;;  %v2385_v63 = vshrl.u32 %v8418_v28, %v2376_v19  ;;  %v2388_v47 = vshrl.u32 %v8419_v46, %v2376_v19 }
 0x37b   : > { %v2237_v12 = vxor.u32 2147483648, %v2236_v22  ;;  %v2531_v38 = vsub.s32 0, %v6812_v54  ;;  %v2391_v61 = vshrl.u32 %v8420_v25, %v2376_v19  ;;  %vm6835_vm11 = vcmp.le.f32.partialorder %v2465_v43, 0.7853982 }
 0x37c   : > { %v2380_v21 = vor.u32 %v2379_v18, %v2378_v1  ;;  %v2383_v48 = vor.u32 %v2382_v0, %v2381_v59  ;;  %v2386_v55 = vor.u32 %v2385_v63, %v2384_v29  ;;  %v2389_v16 = vor.u32 %v2388_v47, %v2387_v52 }
 0x37d   : > { %v2238_v36 = vsel %vm2155_vm15, %v2237_v12, %v2236_v22  ;;  %v4468_v42 = vmin.u32 %v2531_v38, %v6812_v54  ;;  %v6839_v35 = vshll.u32 %v2369_v11, 8  ;;  %v2676_v44 = vand.u32 2139095040, %v6809_v9  ;;  %v531_v11 = vpop.permute.xlu0 %530 }
 0x37e   : > { %v2241_v62 = vsel %vm6764_vm14, %v6584_v32, %v2238_v36  ;;  %v2552_v53 = vsel %vm2467_vm8, %v2551_v51, %v2527_v6  ;;  %v2377_v33 = vshrl.u32 %v8415_v37, %v2376_v19  ;;  %v2392_v34 = vor.u32 %v2391_v61, %v2390_v30 }
 0x37f   : > { %4838 = vcosq.f32 %v2241_v62  ;;  %v2533_v41 = vclz %v4468_v42  ;;  %vm2393_vm9 = vcmp.lt.s32.totalorder %v6814_v27, 1  ;;  %vm2395_vm12 = vcmp.lt.s32.totalorder %v6814_v27, 3 }
 0x380   : > { %4840 = vsinq.f32 %v2241_v62  ;;  %vm2396_vm13 = vcmp.lt.s32.totalorder %v6814_v27, 4  ;;  %v2401_v43 = vsel %vm2393_vm9, %v2380_v21, %v2383_v48  ;;  %v2405_v7 = vsel %vm2393_vm9, %v2383_v48, %v2386_v55 }
 0x381   : > { %v4469_v5 = vadd.s32 4294967294, %v2533_v41  ;;  %v2398_v39 = vsel %vm2396_vm13, %v2386_v55, 2102212464  ;;  %v2402_v57 = vsel %vm2396_vm13, %v2389_v16, 920167782  ;;  %vm2249_vm0 = vcmp.eq.s32.totalorder %v6806_v23, 0 }
 0x382   : > { %v2406_v2 = vsel %vm2396_vm13, %v2392_v34, 1326507024  ;;  %vm2394_vm14 = vcmp.lt.s32.totalorder %v6814_v27, 2  ;;  %v2403_v10 = vsel %vm2395_vm12, %v2386_v55, %v2402_v57  ;;  %vm2248_vm4 = vcmp.lt.s32.totalorder %v6806_v23, 2 }
 0x383   : > { %vm4470_vm15 = vcmp.lt.s32.totalorder %v4469_v5, 0  ;;  %v2407_v4 = vsel %vm2395_vm12, %v2389_v16, %v2406_v2  ;;  %v2397_v6 = vsel %vm2393_vm9, %v2377_v33, %v2380_v21  ;;  %v2404_v56 = vsel %vm2394_vm14, %v2401_v43, %v2403_v10  ;;  %v6894_v33 = vpop.permute.xlu1 %545 }
 0x384   : > { %v2536_v3 = vsel %vm4470_vm15, 0, %v4469_v5  ;;  %v2408_v17 = vsel %vm2394_vm14, %v2405_v7, %v2407_v4  ;;  %vm2245_vm1 = vweird.f32 %v6584_v32  ;;  %v2399_v19 = vsel %vm2395_vm12, %v2383_v48, %v2398_v39 }
 0x385   : > { %v2537_v45 = vsub.s32 32, %v2536_v3  ;;  %v2541_v50 = vsub.s32 4294967266, %v2536_v3  ;;  %v2677_v22 = vshrl.u32 %v2676_v44, 23  ;;  %v2538_v63 = vshll.u32 %v6812_v54, %v2536_v3 }
 0x386   : > { %v6869_v18 = vmul.u32.u64.low %v6839_v35, %v2408_v17  ;;  %v6870_v12 = vmul.u32.u64.high %v6839_v35, %v2408_v17, %v6869_v18  ;;  %v6873_v1 = vmul.u32.u64.low %v6839_v35, %v2404_v56  ;;  %v6874_v0 = vmul.u32.u64.high %v6839_v35, %v2404_v56, %v6873_v1 }
 0x387   : > { %v2539_v38 = vshrl.u32 %v2521_v60, %v2537_v45  ;;  %v2542_v59 = vadd.s32 127, %v2541_v50  ;;  %v4475_v29 = vadd.s32 4294967169, %v2677_v22  ;;  %vm2252_vm2 = vcmp.eq.s32.totalorder %v6806_v23, 2 }
 0x388   : > { %v2554_v36 = vsel %vm6835_vm11, 0, %v2552_v53  ;;  %v2400_v51 = vsel %vm2394_vm14, %v2397_v6, %v2399_v19  ;;  %v811_v21 = vsel %vm5510_vm3, %v531_v11, %v5480_v14  ;;  %vm2418_vm5 = vc.u32 %v6870_v12, %v6873_v1 }
 0x389   : > { %v4839_v47 = vpop.eup %4838  ;;  %v2540_v42 = vor.u32 %v2539_v38, %v2538_v63  ;;  %v2543_v54 = vshll.u32 %v2542_v59, 23  ;;  %v2683_v60 = vadd.s32 1, %v4475_v29  ;;  %v2419_v55 = vadd.s32 1, %v6874_v0 }
 0x38a   : > { %v4841_v52 = vpop.eup %4840  ;;  %v2253_v62 = vxor.u32 2147483648, %v4839_v47  ;;  %v2673_v16 = vand.u32 2147483647, %v6809_v9  ;;  %v2416_v61 = vmul.u32 %v6839_v35, %v2400_v51  ;;  %v2558_v41 = vadd.s32 3, %v2554_v36 }
 0x38b   : > { %v2250_v48 = vxor.u32 2147483648, %v4841_v52  ;;  %v2544_v30 = vor.u32 4788187, %v2543_v54  ;;  %vm2684_vm6 = vcmp.gt.s32.totalorder %v2683_v60, 0  ;;  %v2420_v44 = vsel %vm2418_vm5, %v2419_v55, %v6874_v0 }
 0x38c   : > { %v2254_v27 = vsel %vm2252_vm2, %v2253_v62, %v4841_v52  ;;  %v2685_v53 = vsel %vm2684_vm6, %v2683_v60, 0  ;;  %v2547_v43 = vcvt.s32.f32 %v2540_v42  ;;  %v2421_v39 = vadd.s32 %v2420_v44, %v2416_v61 }
 0x38d   : > { %v2251_v14 = vsel %vm2249_vm0, %v4839_v47, %v2250_v48  ;;  %v2545_v5 = vand.u32 2147483647, %v2544_v30  ;;  %v2687_v35 = vand.u32 31, %v2685_v53  ;;  %v2680_v10 = vand.u32 8388607, %v2673_v16 }
 0x38e   : > { %v2255_v34 = vsel %vm2248_vm4, %v2251_v14, %v2254_v27  ;;  %v2422_v2 = vadd.s32 536870912, %v2421_v39  ;;  %v814_v4 = vsel %vm5510_vm3, %v6894_v33, %v5482_v15  ;;  %v6907_v23 = vand.u32 3, %v2558_v41 }
 0x38f   : > { %v2256_v57 = vsel %vm2245_vm1, nan, %v2255_v34  ;;  %v2548_v7 = vmul.f32 %v2547_v43, %v2545_v5  ;;  %v2686_v3 = vshrl.u32 %v2685_v53, 5  ;;  %v2688_v6 = vsub.s32 32, %v2687_v35 }
 0x390   : > { %4245 = vst [vmem:[%s5813_s18 + $0x60] sm:$0xff] %v2256_v57  ;;  %v850_v56 = vmul.f32 %v6559_v24, %v811_v21  ;;  %v6910_v17 = vshrl.u32 %v2422_v2, 30  ;;  %v2690_v45 = vshll.u32 %v8415_v37, %v2687_v35  ;;  %v2693_v50 = vshll.u32 %v8416_v49, %v2687_v35 }
 0x391   : > { %v2549_v32 = vxor.u32 2147483648, %v2548_v7  ;;  %v2691_v19 = vshrl.u32 %v8416_v49, %v2688_v6  ;;  %v2694_v22 = vshrl.u32 %v8417_v58, %v2688_v6  ;;  %v2696_v11 = vshll.u32 %v8417_v58, %v2687_v35 }
 0x392   : > { %v2697_v18 = vshrl.u32 %v8418_v28, %v2688_v6  ;;  %v2424_v63 = vshll.u32 %v6910_v17, 30  ;;  %v2699_v38 = vshll.u32 %v8418_v28, %v2687_v35  ;;  %v2700_v59 = vshrl.u32 %v8419_v46, %v2688_v6 }
 0x393   : > { %v2550_v0 = vsel %vm2467_vm8, %v2549_v32, %v2548_v7  ;;  %v2692_v47 = vor.u32 %v2691_v19, %v2690_v45  ;;  %v2695_v36 = vor.u32 %v2694_v22, %v2693_v50  ;;  %v2681_v52 = vor.u32 8388608, %v2680_v10 }
 0x394   : > { %v2553_v29 = vsel %vm6835_vm11, %v6658_v8, %v2550_v0  ;;  %v2698_v51 = vor.u32 %v2697_v18, %v2696_v11  ;;  %v6926_v21 = vsub.s32 %v2421_v39, %v2424_v63  ;;  %v2701_v62 = vor.u32 %v2700_v59, %v2699_v38 }
 0x395   : > { %4842 = vcosq.f32 %v2553_v29  ;;  %v2702_v42 = vshll.u32 %v8419_v46, %v2687_v35  ;;  %v2703_v54 = vshrl.u32 %v8420_v25, %v2688_v6  ;;  %v6931_v60 = vadd.f32 %v6581_v26, %v850_v56 }
 0x396   : > { %4844 = vsinq.f32 %v2553_v29  ;;  %vm2363_vm7 = vcmp.lt.s32.totalorder %v6755_v20, 0  ;;  %v2427_v40 = vsub.s32 0, %v6926_v21  ;;  %vm2705_vm10 = vcmp.lt.s32.totalorder %v2686_v3, 1 }
 0x397   : > { %vm2707_vm8 = vcmp.lt.s32.totalorder %v2686_v3, 3  ;;  %vm2708_vm11 = vcmp.lt.s32.totalorder %v2686_v3, 4  ;;  %v2704_v48 = vor.u32 %v2703_v54, %v2702_v42  ;;  %v2713_v27 = vsel %vm2705_vm10, %v2692_v47, %v2695_v36 }
 0x398   : > { %v2710_v55 = vsel %vm2708_vm11, %v2698_v51, 2102212464  ;;  %v2714_v30 = vsel %vm2708_vm11, %v2701_v62, 920167782  ;;  %v4464_v61 = vmin.u32 %v2427_v40, %v6926_v21  ;;  %v2689_v14 = vshrl.u32 %v8415_v37, %v2688_v6 }
 0x399   : > { %vm2706_vm9 = vcmp.lt.s32.totalorder %v2686_v3, 2  ;;  %v2715_v26 = vsel %vm2707_vm8, %v2698_v51, %v2714_v30  ;;  %v2717_v44 = vsel %vm2705_vm10, %v2695_v36, %v2698_v51  ;;  %v2718_v53 = vsel %vm2708_vm11, %v2704_v48, 1326507024 }
 0x39a   : > { %v2716_v41 = vsel %vm2706_vm9, %v2713_v27, %v2715_v26  ;;  %v2721_v34 = vshll.u32 %v2681_v52, 8  ;;  %vm2560_vm12 = vcmp.lt.s32.totalorder %v6907_v23, 2  ;;  %vm2561_vm13 = vcmp.eq.s32.totalorder %v6907_v23, 0  ;;  %v542_v27 = vpop.permute.xlu0 %541 }
 0x39b   : > { %vm6945_vm0 = vcmp.le.f32.partialorder %v2361_v13, 0.7853982  ;;  %v2429_v43 = vclz %v4464_v61  ;;  %v2709_v39 = vsel %vm2705_vm10, %v2689_v14, %v2692_v47  ;;  %v2711_v57 = vsel %vm2707_vm8, %v2695_v36, %v2710_v55 }
 0x39c   : > { %vm2557_vm15 = vweird.f32 %v6658_v8  ;;  %v2447_v35 = vsub.s32 4, %v6910_v17  ;;  %v2719_v7 = vsel %vm2707_vm8, %v2701_v62, %v2718_v53  ;;  %vm2564_vm14 = vcmp.eq.s32.totalorder %v6907_v23, 2  ;;  %v6998_v8 = vld [vmem:[%s8366_s4] ss:$0 sm:$0xff] }
 0x39d   : > { %v6954_v2 = vmul.u32.u64.low %v2721_v34, %v2716_v41  ;;  %v6955_v10 = vmul.u32.u64.high %v2721_v34, %v2716_v41, %v6954_v2  ;;  %v4465_v13 = vadd.s32 4294967294, %v2429_v43  ;;  %v2720_v6 = vsel %vm2706_vm9, %v2717_v44, %v2719_v7 }
 0x39e   : > { %v2572_v56 = vand.u32 2139095040, %v6931_v60  ;;  %v2712_v32 = vsel %vm2706_vm9, %v2709_v39, %v2711_v57  ;;  %v6961_v45 = vmul.u32.u64.low %v2721_v34, %v2720_v6  ;;  %v6962_v50 = vmul.u32.u64.high %v2721_v34, %v2720_v6, %v6961_v45 }
 0x39f   : > { %v853_v19 = vmul.f32 %v6559_v24, %v814_v4  ;;  %v4843_v22 = vpop.eup %4842  ;;  %v2417_v11 = vadd.s32 %v6873_v1, %v6870_v12  ;;  %vm4466_vm4 = vcmp.lt.s32.totalorder %v4465_v13, 0  ;;  %v2569_v18 = vand.u32 2147483647, %v6931_v60 }
 0x3a0   : > { %v2573_v0 = vshrl.u32 %v2572_v56, 23  ;;  %v4845_v3 = vpop.eup %4844  ;;  %v2565_v63 = vxor.u32 2147483648, %v4843_v22  ;;  %v2432_v38 = vsel %vm4466_vm4, 0, %v4465_v13  ;;  %v2448_v59 = vsel %vm2363_vm7, %v2447_v35, %v6910_v17  ;;  %v7012_v56 = vld [vmem:[%s8365_s3] ss:$0 sm:$0xff] }
 0x3a1   : > { %v2731_v29 = vadd.s32 1, %v6955_v10  ;;  %v2562_v15 = vxor.u32 2147483648, %v4845_v3  ;;  %v2433_v33 = vsub.s32 32, %v2432_v38  ;;  %v2437_v24 = vsub.s32 4294967266, %v2432_v38 }
 0x3a2   : > { %v2728_v4 = vmul.u32 %v2721_v34, %v2712_v32  ;;  %v2566_v12 = vsel %vm2564_vm14, %v2565_v63, %v4845_v3  ;;  %v2434_v1 = vshll.u32 %v6926_v21, %v2432_v38  ;;  %vm2730_vm1 = vc.u32 %v6962_v50, %v6954_v2  ;;  %v8459_v34 = vld [vmem:[#allocation13_spill] sm:$0xff] }
 0x3a3   : > { %v4471_v47 = vadd.s32 4294967169, %v2573_v0  ;;  %v2563_v36 = vsel %vm2561_vm13, %v4843_v22, %v2562_v15  ;;  %v2435_v51 = vshrl.u32 %v2417_v11, %v2433_v33  ;;  %v2438_v17 = vadd.s32 127, %v2437_v24 }
 0x3a4   : > { %v2732_v52 = vsel %vm2730_vm1, %v2731_v29, %v6955_v10  ;;  %v2567_v62 = vsel %vm2560_vm12, %v2563_v36, %v2566_v12  ;;  %v2450_v42 = vsel %vm6945_vm0, 0, %v2448_v59  ;;  %v2576_v23 = vand.u32 8388607, %v2569_v18 }
 0x3a5   : > { %v2733_v54 = vadd.s32 %v2732_v52, %v2728_v4  ;;  %v2579_v40 = vadd.s32 1, %v4471_v47  ;;  %v2568_v21 = vsel %vm2557_vm15, nan, %v2567_v62  ;;  %v2436_v48 = vor.u32 %v2435_v51, %v2434_v1 }
 0x3a6   : > { %v2439_v55 = vshll.u32 %v2438_v17, 23  ;;  %4248 = vst [vmem:[%s5813_s18 + $0x78] sm:$0xff] %v2568_v21  ;;  %v2454_v14 = vadd.s32 3, %v2450_v42  ;;  %v7001_v53 = vadd.f32 %v6998_v8, %v853_v19  ;;  %v813_v43 = vsel %vm5510_vm3, %v542_v27, %v8459_v34 }
 0x3a7   : > { %v2734_v30 = vadd.s32 536870912, %v2733_v54  ;;  %vm2580_vm2 = vcmp.gt.s32.totalorder %v2579_v40, 0  ;;  %v2443_v57 = vcvt.s32.f32 %v2436_v48  ;;  %v2577_v6 = vor.u32 8388608, %v2576_v23 }
 0x3a8   : > { %v2440_v61 = vor.u32 4788187, %v2439_v55  ;;  %v2581_v26 = vsel %vm2580_vm2, %v2579_v40, 0  ;;  %v7007_v13 = vand.u32 3, %v2454_v14  ;;  %v7015_v32 = vmul.f32 %v7012_v56, %v813_v43 }
 0x3a9   : > { %v6993_v41 = vshrl.u32 %v2734_v30, 30  ;;  %v2583_v44 = vand.u32 31, %v2581_v26  ;;  %v2729_v45 = vadd.s32 %v6954_v2, %v6962_v50  ;;  %v2884_v11 = vand.u32 2139095040, %v7001_v53 }
 0x3aa   : > { %v2441_v39 = vand.u32 2147483647, %v2440_v61  ;;  %v2582_v33 = vshrl.u32 %v2581_v26, 5  ;;  %vm2675_vm5 = vcmp.lt.s32.totalorder %v6809_v9, 0  ;;  %v7039_v42 = vshll.u32 %v2577_v6, 8 }
 0x3ab   : > { %v2736_v35 = vshll.u32 %v6993_v41, 30  ;;  %v2584_v7 = vsub.s32 32, %v2583_v44  ;;  %v2586_v3 = vshll.u32 %v8415_v37, %v2583_v44  ;;  %v2589_v29 = vshll.u32 %v8416_v49, %v2583_v44 }
 0x3ac   : > { %v2444_v10 = vmul.f32 %v2443_v57, %v2441_v39  ;;  %v2592_v15 = vshll.u32 %v8417_v58, %v2583_v44  ;;  %v2595_v4 = vshll.u32 %v8418_v28, %v2583_v44  ;;  %v2598_v17 = vshll.u32 %v8419_v46, %v2583_v44 }
 0x3ad   : > { %v7018_v19 = vsub.s32 %v2733_v54, %v2736_v35  ;;  %v2587_v22 = vshrl.u32 %v8416_v49, %v2584_v7  ;;  %v2590_v63 = vshrl.u32 %v8417_v58, %v2584_v7  ;;  %v2593_v38 = vshrl.u32 %v8418_v28, %v2584_v7 }
 0x3ae   : > { %v2445_v0 = vxor.u32 2147483648, %v2444_v10  ;;  %v2596_v2 = vshrl.u32 %v8419_v46, %v2584_v7  ;;  %v2599_v52 = vshrl.u32 %v8420_v25, %v2584_v7  ;;  %v2885_v54 = vshrl.u32 %v2884_v11, 23 }
 0x3af   : > { %v2739_v59 = vsub.s32 0, %v7018_v19  ;;  %v2588_v24 = vor.u32 %v2587_v22, %v2586_v3  ;;  %v2591_v47 = vor.u32 %v2590_v63, %v2589_v29  ;;  %v2594_v36 = vor.u32 %v2593_v38, %v2592_v15 }
 0x3b0   : > { %v2446_v50 = vsel %vm2363_vm7, %v2445_v0, %v2444_v10  ;;  %v2597_v51 = vor.u32 %v2596_v2, %v2595_v4  ;;  %v2759_v5 = vsub.s32 4, %v6993_v41  ;;  %v2585_v40 = vshrl.u32 %v8415_v37, %v2584_v7 }
 0x3b1   : > { %v2449_v12 = vsel %vm6945_vm0, %v6755_v20, %v2446_v50  ;;  %v4476_v1 = vmin.u32 %v2739_v59, %v7018_v19  ;;  %v2600_v21 = vor.u32 %v2599_v52, %v2598_v17  ;;  %vm2601_vm6 = vcmp.lt.s32.totalorder %v2582_v33, 1 }
 0x3b2   : > { %4846 = vcosq.f32 %v2449_v12  ;;  %vm2603_vm7 = vcmp.lt.s32.totalorder %v2582_v33, 3  ;;  %vm2604_vm10 = vcmp.lt.s32.totalorder %v2582_v33, 4  ;;  %v2609_v55 = vsel %vm2601_vm6, %v2588_v24, %v2591_v47 }
 0x3b3   : > { %4848 = vsinq.f32 %v2449_v12  ;;  %v2741_v62 = vclz %v4476_v1  ;;  %v2606_v27 = vsel %vm2604_vm10, %v2594_v36, 2102212464  ;;  %v2610_v30 = vsel %vm2604_vm10, %v2597_v51, 920167782 }
 0x3b4   : > { %v2613_v61 = vsel %vm2601_vm6, %v2591_v47, %v2594_v36  ;;  %v2614_v14 = vsel %vm2604_vm10, %v2600_v21, 1326507024  ;;  %vm7047_vm8 = vcmp.le.f32.partialorder %v2673_v16, 0.7853982  ;;  %vm2602_vm9 = vcmp.lt.s32.totalorder %v2582_v33, 2 }
 0x3b5   : > { %v4477_v48 = vadd.s32 4294967294, %v2741_v62  ;;  %v2611_v26 = vsel %vm2603_vm7, %v2594_v36, %v2610_v30  ;;  %v2615_v44 = vsel %vm2603_vm7, %v2597_v51, %v2614_v14  ;;  %vm2456_vm12 = vcmp.lt.s32.totalorder %v7007_v13, 2 }
 0x3b6   : > { %v2605_v43 = vsel %vm2601_vm6, %v2585_v40, %v2588_v24  ;;  %v2612_v39 = vsel %vm2602_vm9, %v2609_v55, %v2611_v26  ;;  %v2616_v57 = vsel %vm2602_vm9, %v2613_v61, %v2615_v44  ;;  %vm2453_vm13 = vweird.f32 %v6755_v20 }
 0x3b7   : > { %vm4478_vm11 = vcmp.lt.s32.totalorder %v4477_v48, 0  ;;  %v2607_v7 = vsel %vm2603_vm7, %v2591_v47, %v2606_v27  ;;  %v4483_v10 = vadd.s32 4294967169, %v2885_v54  ;;  %vm2457_vm0 = vcmp.eq.s32.totalorder %v7007_v13, 0 }
 0x3b8   : > { %v2744_v34 = vsel %vm4478_vm11, 0, %v4477_v48  ;;  %v7060_v6 = vmul.u32.u64.low %v7039_v42, %v2616_v57  ;;  %v7061_v22 = vmul.u32.u64.high %v7039_v42, %v2616_v57, %v7060_v6  ;;  %vm2460_vm15 = vcmp.eq.s32.totalorder %v7007_v13, 2 }
 0x3b9   : > { %v2745_v16 = vsub.s32 32, %v2744_v34  ;;  %v2749_v35 = vsub.s32 4294967266, %v2744_v34  ;;  %v7064_v11 = vmul.u32.u64.low %v7039_v42, %v2612_v39  ;;  %v7065_v0 = vmul.u32.u64.high %v7039_v42, %v2612_v39, %v7064_v11 }
 0x3ba   : > { %v2746_v3 = vshll.u32 %v7018_v19, %v2744_v34  ;;  %v2891_v59 = vadd.s32 1, %v4483_v10  ;;  %v2760_v15 = vsel %vm2675_vm5, %v2759_v5, %v6993_v41  ;;  %v2608_v2 = vsel %vm2602_vm9, %v2605_v43, %v2607_v7 }
 0x3bb   : > { %v2747_v63 = vshrl.u32 %v2729_v45, %v2745_v16  ;;  %v2750_v38 = vadd.s32 127, %v2749_v35  ;;  %vm2626_vm4 = vc.u32 %v7061_v22, %v7064_v11  ;;  %v2627_v45 = vadd.s32 1, %v7065_v0 }
 0x3bc   : > { %v4847_v29 = vpop.eup %4846  ;;  %vm2892_vm14 = vcmp.gt.s32.totalorder %v2891_v59, 0  ;;  %v2881_v1 = vand.u32 2147483647, %v7001_v53  ;;  %v2624_v41 = vmul.u32 %v7039_v42, %v2608_v2  ;;  %v2762_v17 = vsel %vm7047_vm8, 0, %v2760_v15 }
 0x3bd   : > { %v4849_v50 = vpop.eup %4848  ;;  %v2461_v24 = vxor.u32 2147483648, %v4847_v29  ;;  %v2748_v4 = vor.u32 %v2747_v63, %v2746_v3  ;;  %v2751_v12 = vshll.u32 %v2750_v38, 23  ;;  %v2893_v33 = vsel %vm2892_vm14, %v2891_v59, 0 }
 0x3be   : > { %v2458_v19 = vxor.u32 2147483648, %v4849_v50  ;;  %v2628_v52 = vsel %vm2626_vm4, %v2627_v45, %v7065_v0  ;;  %v2895_v62 = vand.u32 31, %v2893_v33  ;;  %v2888_v42 = vand.u32 8388607, %v2881_v1 }
 0x3bf   : > { %v2462_v47 = vsel %vm2460_vm15, %v2461_v24, %v4849_v50  ;;  %v2752_v36 = vor.u32 4788187, %v2751_v12  ;;  %v2755_v40 = vcvt.s32.f32 %v2748_v4  ;;  %v2629_v21 = vadd.s32 %v2628_v52, %v2624_v41 }
 0x3c0   : > { %v2459_v51 = vsel %vm2457_vm0, %v4847_v29, %v2458_v19  ;;  %v2896_v55 = vsub.s32 32, %v2895_v62  ;;  %v7093_v27 = vadd.f32 %v6998_v8, %v7015_v32  ;;  %v2766_v61 = vadd.s32 3, %v2762_v17 }
 0x3c1   : > { %v2463_v54 = vsel %vm2456_vm12, %v2459_v51, %v2462_v47  ;;  %v2753_v5 = vand.u32 2147483647, %v2752_v36  ;;  %v2630_v14 = vadd.s32 536870912, %v2629_v21  ;;  %v2894_v13 = vshrl.u32 %v2893_v33, 5 }
 0x3c2   : > { %v2464_v48 = vsel %vm2453_vm13, nan, %v2463_v54  ;;  %v2898_v26 = vshll.u32 %v8415_v37, %v2895_v62  ;;  %v2899_v44 = vshrl.u32 %v8416_v49, %v2896_v55  ;;  %v2902_v20 = vshrl.u32 %v8417_v58, %v2896_v55 }
 0x3c3   : > { %4247 = vst [vmem:[%s5813_s18 + $0x70] sm:$0xff] %v2464_v48  ;;  %v2756_v30 = vmul.f32 %v2755_v40, %v2753_v5  ;;  %v2905_v34 = vshrl.u32 %v8418_v28, %v2896_v55  ;;  %v2631_v39 = vshrl.u32 %v2630_v14, 30  ;;  %v2901_v57 = vshll.u32 %v8416_v49, %v2895_v62 }
 0x3c4   : > { %v2908_v32 = vshrl.u32 %v8419_v46, %v2896_v55  ;;  %v2904_v16 = vshll.u32 %v8417_v58, %v2895_v62  ;;  %v2907_v35 = vshll.u32 %v8418_v28, %v2895_v62  ;;  %v2910_v7 = vshll.u32 %v8419_v46, %v2895_v62 }
 0x3c5   : > { %v2757_v43 = vxor.u32 2147483648, %v2756_v30  ;;  %v2911_v10 = vshrl.u32 %v8420_v25, %v2896_v55  ;;  %v2632_v0 = vshll.u32 %v2631_v39, 30  ;;  %v2900_v3 = vor.u32 %v2899_v44, %v2898_v26 }
 0x3c6   : > { %v2903_v63 = vor.u32 %v2902_v20, %v2901_v57  ;;  %v2906_v59 = vor.u32 %v2905_v34, %v2904_v16  ;;  %v2909_v29 = vor.u32 %v2908_v32, %v2907_v35  ;;  %v7111_v2 = vand.u32 3, %v2766_v61 }
 0x3c7   : > { %v2758_v6 = vsel %vm2675_vm5, %v2757_v43, %v2756_v30  ;;  %v2912_v15 = vor.u32 %v2911_v10, %v2910_v7  ;;  %v7113_v50 = vsub.s32 %v2629_v21, %v2632_v0  ;;  %v2777_v24 = vand.u32 2147483647, %v7093_v27 }
 0x3c8   : > { %v2761_v38 = vsel %vm7047_vm8, %v6809_v9, %v2758_v6  ;;  %vm2571_vm1 = vcmp.lt.s32.totalorder %v6931_v60, 0  ;;  %v2889_v4 = vor.u32 8388608, %v2888_v42  ;;  %vm2913_vm2 = vcmp.lt.s32.totalorder %v2894_v13, 1 }
 0x3c9   : > { %4850 = vcosq.f32 %v2761_v38  ;;  %v2780_v12 = vand.u32 2139095040, %v7093_v27  ;;  %v2635_v23 = vsub.s32 0, %v7113_v50  ;;  %vm2915_vm5 = vcmp.lt.s32.totalorder %v2894_v13, 3 }
 0x3ca   : > { %4852 = vsinq.f32 %v2761_v38  ;;  %vm2916_vm6 = vcmp.lt.s32.totalorder %v2894_v13, 4  ;;  %v2921_v19 = vsel %vm2913_vm2, %v2900_v3, %v2903_v63  ;;  %v2897_v45 = vshrl.u32 %v8415_v37, %v2896_v55 }
 0x3cb   : > { %v2918_v47 = vsel %vm2916_vm6, %v2906_v59, 2102212464  ;;  %v2922_v36 = vsel %vm2916_vm6, %v2909_v29, 920167782  ;;  %v2926_v41 = vsel %vm2916_vm6, %v2912_v15, 1326507024  ;;  %v4472_v33 = vmin.u32 %v2635_v23, %v7113_v50 }
 0x3cc   : > { %vm2914_vm7 = vcmp.lt.s32.totalorder %v2894_v13, 2  ;;  %v2923_v51 = vsel %vm2915_vm5, %v2906_v59, %v2922_v36  ;;  %v2925_v17 = vsel %vm2913_vm2, %v2903_v63, %v2906_v59  ;;  %v2927_v62 = vsel %vm2915_vm5, %v2909_v29, %v2926_v41  ;;  %v557_v59 = vpop.permute.xlu1 %556 }
 0x3cd   : > { %v2924_v52 = vsel %vm2914_vm7, %v2921_v19, %v2923_v51  ;;  %v2929_v54 = vshll.u32 %v2889_v4, 8  ;;  %v2781_v5 = vshrl.u32 %v2780_v12, 23  ;;  %v2637_v40 = vclz %v4472_v33 }
 0x3ce   : > { %v2655_v21 = vsub.s32 4, %v2631_v39  ;;  %v2917_v48 = vsel %vm2913_vm2, %v2897_v45, %v2900_v3  ;;  %v2919_v42 = vsel %vm2915_vm5, %v2903_v63, %v2918_v47  ;;  %vm2765_vm10 = vweird.f32 %v6809_v9  ;;  %v8462_v47 = vld [vmem:[#allocation14_spill] sm:$0xff] }
 0x3cf   : > { %v2928_v55 = vsel %vm2914_vm7, %v2925_v17, %v2927_v62  ;;  %v7130_v30 = vmul.u32.u64.low %v2929_v54, %v2924_v52  ;;  %v7131_v61 = vmul.u32.u64.high %v2929_v54, %v2924_v52, %v7130_v30  ;;  %v4479_v14 = vadd.s32 4294967169, %v2781_v5 }
 0x3d0   : > { %vm2768_vm8 = vcmp.lt.s32.totalorder %v7111_v2, 2  ;;  %v4473_v26 = vadd.s32 4294967294, %v2637_v40  ;;  %v7135_v44 = vmul.u32.u64.low %v2929_v54, %v2928_v55  ;;  %v7136_v20 = vmul.u32.u64.high %v2929_v54, %v2928_v55, %v7135_v44 }
 0x3d1   : > { %vm2769_vm11 = vcmp.eq.s32.totalorder %v7111_v2, 0  ;;  %vm2772_vm9 = vcmp.eq.s32.totalorder %v7111_v2, 2  ;;  %v2920_v34 = vsel %vm2914_vm7, %v2917_v48, %v2919_v42  ;;  %v2787_v43 = vadd.s32 1, %v4479_v14 }
 0x3d2   : > { %v2625_v32 = vadd.s32 %v7064_v11, %v7061_v22  ;;  %vm4474_vm12 = vcmp.lt.s32.totalorder %v4473_v26, 0  ;;  %v2656_v16 = vsel %vm2571_vm1, %v2655_v21, %v2631_v39  ;;  %v2784_v35 = vand.u32 8388607, %v2777_v24 }
 0x3d3   : > { %v4851_v57 = vpop.eup %4850  ;;  %v2640_v6 = vsel %vm4474_vm12, 0, %v4473_v26  ;;  %v2939_v0 = vadd.s32 1, %v7131_v61  ;;  %vm2788_vm13 = vcmp.gt.s32.totalorder %v2787_v43, 0  ;;  %v2936_v38 = vmul.u32 %v2929_v54, %v2920_v34 }
 0x3d4   : > { %v4853_v7 = vpop.eup %4852  ;;  %v2773_v10 = vxor.u32 2147483648, %v4851_v57  ;;  %v2641_v3 = vsub.s32 32, %v2640_v6  ;;  %v2645_v63 = vsub.s32 4294967266, %v2640_v6  ;;  %v2642_v11 = vshll.u32 %v7113_v50, %v2640_v6 }
 0x3d5   : > { %v2770_v13 = vxor.u32 2147483648, %v4853_v7  ;;  %vm2938_vm0 = vc.u32 %v7136_v20, %v7130_v30  ;;  %v2789_v39 = vsel %vm2788_vm13, %v2787_v43, 0  ;;  %v816_v50 = vsel %vm5510_vm3, %v557_v59, %v8462_v47 }
 0x3d6   : > { %v2774_v22 = vsel %vm2772_vm9, %v2773_v10, %v4853_v7  ;;  %v2643_v15 = vshrl.u32 %v2625_v32, %v2641_v3  ;;  %v2646_v4 = vadd.s32 127, %v2645_v63  ;;  %v2940_v12 = vsel %vm2938_vm0, %v2939_v0, %v7131_v61 }
 0x3d7   : > { %v2771_v29 = vsel %vm2769_vm11, %v4851_v57, %v2770_v13  ;;  %v2941_v19 = vadd.s32 %v2940_v12, %v2936_v38  ;;  %v2791_v45 = vand.u32 31, %v2789_v39  ;;  %vm7165_vm15 = vcmp.le.f32.partialorder %v2569_v18, 0.7853982 }
 0x3d8   : > { %v2775_v23 = vsel %vm2768_vm8, %v2771_v29, %v2774_v22  ;;  %v2644_v33 = vor.u32 %v2643_v15, %v2642_v11  ;;  %v2647_v51 = vshll.u32 %v2646_v4, 23  ;;  %v2658_v2 = vsel %vm7165_vm15, 0, %v2656_v16 }
 0x3d9   : > { %v2776_v36 = vsel %vm2765_vm10, nan, %v2775_v23  ;;  %v2942_v17 = vadd.s32 536870912, %v2941_v19  ;;  %v2792_v52 = vsub.s32 32, %v2791_v45  ;;  %v2785_v54 = vor.u32 8388608, %v2784_v35 }
 0x3da   : > { %4250 = vst [vmem:[%s5813_s18 + $0x88] sm:$0xff] %v2776_v36  ;;  %v2648_v62 = vor.u32 4788187, %v2647_v51  ;;  %v2790_v5 = vshrl.u32 %v2789_v39, 5  ;;  %v855_v9 = vmul.f32 %v7012_v56, %v816_v50  ;;  %v2651_v40 = vcvt.s32.f32 %v2644_v33  ;;  %v553_v36 = vpop.permute.xlu0 %552 }
 0x3db   : > { %v7173_v21 = vshrl.u32 %v2942_v17, 30  ;;  %v2795_v18 = vshrl.u32 %v8416_v49, %v2792_v52  ;;  %v2798_v48 = vshrl.u32 %v8417_v58, %v2792_v52  ;;  %v2801_v55 = vshrl.u32 %v8418_v28, %v2792_v52 }
 0x3dc   : > { %v2649_v42 = vand.u32 2147483647, %v2648_v62  ;;  %v2803_v61 = vshll.u32 %v8418_v28, %v2791_v45  ;;  %v2804_v14 = vshrl.u32 %v8419_v46, %v2792_v52  ;;  %v2794_v44 = vshll.u32 %v8415_v37, %v2791_v45 }
 0x3dd   : > { %v2944_v26 = vshll.u32 %v7173_v21, 30  ;;  %v2797_v34 = vshll.u32 %v8416_v49, %v2791_v45  ;;  %v2800_v43 = vshll.u32 %v8417_v58, %v2791_v45  ;;  %v2807_v16 = vshrl.u32 %v8420_v25, %v2792_v52 }
 0x3de   : > { %v2652_v57 = vmul.f32 %v2651_v40, %v2649_v42  ;;  %v2805_v32 = vor.u32 %v2804_v14, %v2803_v61  ;;  %v2796_v7 = vor.u32 %v2795_v18, %v2794_v44  ;;  %v2662_v13 = vadd.s32 3, %v2658_v2 }
 0x3df   : > { %v7185_v35 = vsub.s32 %v2941_v19, %v2944_v26  ;;  %v2799_v10 = vor.u32 %v2798_v48, %v2797_v34  ;;  %v2802_v6 = vor.u32 %v2801_v55, %v2800_v43  ;;  %v2806_v3 = vshll.u32 %v8419_v46, %v2791_v45  ;;  %v8465_v48 = vld [vmem:[#allocation15_spill] sm:$0xff] }
 0x3e0   : > { %v2653_v0 = vxor.u32 2147483648, %v2652_v57  ;;  %v7188_v63 = vshll.u32 %v2785_v54, 8  ;;  %vm2809_vm14 = vcmp.lt.s32.totalorder %v2790_v5, 1  ;;  %vm2812_vm4 = vcmp.lt.s32.totalorder %v2790_v5, 4 }
 0x3e1   : > { %v2947_v38 = vsub.s32 0, %v7185_v35  ;;  %v7192_v59 = vadd.f32 %v6998_v8, %v855_v9  ;;  %vm2883_vm2 = vcmp.lt.s32.totalorder %v7001_v53, 0  ;;  %v2808_v11 = vor.u32 %v2807_v16, %v2806_v3 }
 0x3e2   : > { %v2654_v22 = vsel %vm2571_vm1, %v2653_v0, %v2652_v57  ;;  %vm2811_vm5 = vcmp.lt.s32.totalorder %v2790_v5, 3  ;;  %v2818_v39 = vsel %vm2812_vm4, %v2805_v32, 920167782  ;;  %v2814_v4 = vsel %vm2812_vm4, %v2802_v6, 2102212464 }
 0x3e3   : > { %v2657_v29 = vsel %vm7165_vm15, %v6931_v60, %v2654_v22  ;;  %v4484_v15 = vmin.u32 %v2947_v38, %v7185_v35  ;;  %v2817_v12 = vsel %vm2809_vm14, %v2796_v7, %v2799_v10  ;;  %v2967_v23 = vsub.s32 4, %v7173_v21 }
 0x3e4   : > { %4854 = vcosq.f32 %v2657_v29  ;;  %v2793_v19 = vshrl.u32 %v8415_v37, %v2792_v52  ;;  %v2819_v45 = vsel %vm2811_vm5, %v2802_v6, %v2818_v39  ;;  %vm2810_vm1 = vcmp.lt.s32.totalorder %v2790_v5, 2 }
 0x3e5   : > { %4856 = vsinq.f32 %v2657_v29  ;;  %v2949_v47 = vclz %v4484_v15  ;;  %v2821_v50 = vsel %vm2809_vm14, %v2799_v10, %v2802_v6  ;;  %v2815_v33 = vsel %vm2811_vm5, %v2799_v10, %v2814_v4 }
 0x3e6   : > { %v2813_v41 = vsel %vm2809_vm14, %v2793_v19, %v2796_v7  ;;  %v2820_v51 = vsel %vm2810_vm1, %v2817_v12, %v2819_v45  ;;  %v2822_v2 = vsel %vm2812_vm4, %v2808_v11, 1326507024  ;;  %v2663_v9 = vand.u32 3, %v2662_v13 }
 0x3e7   : > { %v4485_v17 = vadd.s32 4294967294, %v2949_v47  ;;  %v2823_v62 = vsel %vm2811_vm5, %v2805_v32, %v2822_v2  ;;  %v7213_v52 = vmul.u32.u64.low %v7188_v63, %v2820_v51  ;;  %v7214_v54 = vmul.u32.u64.high %v7188_v63, %v2820_v51, %v7213_v52 }
 0x3e8   : > { %v2824_v40 = vsel %vm2810_vm1, %v2821_v50, %v2823_v62  ;;  %v3092_v18 = vand.u32 2139095040, %v7192_v59  ;;  %v815_v42 = vsel %vm5510_vm3, %v553_v36, %v8465_v48  ;;  %v2816_v55 = vsel %vm2810_vm1, %v2813_v41, %v2815_v33  ;;  %v7252_v36 = vpop.permute.xlu1 %567  ;;  %v8468_v48 = vld [vmem:[#allocation16_spill] sm:$0xff] }
 0x3e9   : > { %vm4486_vm6 = vcmp.lt.s32.totalorder %v4485_v17, 0  ;;  %v7222_v61 = vmul.u32.u64.low %v7188_v63, %v2824_v40  ;;  %v7223_v14 = vmul.u32.u64.high %v7188_v63, %v2824_v40, %v7222_v61  ;;  %vm7227_vm7 = vcmp.le.f32.partialorder %v2881_v1, 0.7853982 }
 0x3ea   : > { %v2937_v26 = vadd.s32 %v7130_v30, %v7136_v20  ;;  %v2952_v44 = vsel %vm4486_vm6, 0, %v4485_v17  ;;  %v3093_v34 = vshrl.u32 %v3092_v18, 23  ;;  %vm2661_vm10 = vweird.f32 %v6931_v60 }
 0x3eb   : > { %v2953_v43 = vsub.s32 32, %v2952_v44  ;;  %v2957_v57 = vsub.s32 4294967266, %v2952_v44  ;;  %v2968_v32 = vsel %vm2883_vm2, %v2967_v23, %v7173_v21  ;;  %v2835_v16 = vadd.s32 1, %v7214_v54 }
 0x3ec   : > { %vm2664_vm8 = vcmp.lt.s32.totalorder %v2663_v9, 2  ;;  %v2832_v1 = vmul.u32 %v7188_v63, %v2816_v55  ;;  %v4491_v7 = vadd.s32 4294967169, %v3093_v34  ;;  %v854_v10 = vmul.f32 %v7012_v56, %v815_v42 }
 0x3ed   : > { %v2954_v30 = vshll.u32 %v7185_v35, %v2952_v44  ;;  %v2955_v20 = vshrl.u32 %v2937_v26, %v2953_v43  ;;  %v2958_v6 = vadd.s32 127, %v2957_v57  ;;  %vm2834_vm11 = vc.u32 %v7223_v14, %v7213_v52 }
 0x3ee   : > { %v4855_v0 = vpop.eup %4854  ;;  %v2970_v13 = vsel %vm7227_vm7, 0, %v2968_v32  ;;  %v2836_v21 = vsel %vm2834_vm11, %v2835_v16, %v7214_v54  ;;  %v3089_v3 = vand.u32 2147483647, %v7192_v59  ;;  %v3099_v38 = vadd.s32 1, %v4491_v7 }
 0x3ef   : > { %v4857_v63 = vpop.eup %4856  ;;  %v2669_v22 = vxor.u32 2147483648, %v4855_v0  ;;  %v2956_v11 = vor.u32 %v2955_v20, %v2954_v30  ;;  %v2959_v39 = vshll.u32 %v2958_v6, 23  ;;  %v2837_v29 = vadd.s32 %v2836_v21, %v2832_v1 }
 0x3f0   : > { %vm2665_vm9 = vcmp.eq.s32.totalorder %v2663_v9, 0  ;;  %v2666_v35 = vxor.u32 2147483648, %v4857_v63  ;;  %vm2668_vm12 = vcmp.eq.s32.totalorder %v2663_v9, 2  ;;  %vm3100_vm13 = vcmp.gt.s32.totalorder %v3099_v38, 0 }
 0x3f1   : > { %v2670_v15 = vsel %vm2668_vm12, %v2669_v22, %v4857_v63  ;;  %v2960_v4 = vor.u32 4788187, %v2959_v39  ;;  %v2974_v12 = vadd.s32 3, %v2970_v13  ;;  %v2838_v23 = vadd.s32 536870912, %v2837_v29 }
 0x3f2   : > { %v2667_v19 = vsel %vm2665_vm9, %v4855_v0, %v2666_v35  ;;  %v3096_v45 = vand.u32 8388607, %v3089_v3  ;;  %v3101_v47 = vsel %vm3100_vm13, %v3099_v38, 0  ;;  %v7250_v50 = vadd.f32 %v6998_v8, %v854_v10 }
 0x3f3   : > { %v2671_v41 = vsel %vm2664_vm8, %v2667_v19, %v2670_v15  ;;  %v2961_v33 = vand.u32 2147483647, %v2960_v4  ;;  %v2963_v51 = vcvt.s32.f32 %v2956_v11  ;;  %v2839_v2 = vshrl.u32 %v2838_v23, 30 }
 0x3f4   : > { %v2672_v17 = vsel %vm2661_vm10, nan, %v2671_v41  ;;  %v3103_v62 = vand.u32 31, %v3101_v47  ;;  %v7258_v40 = vand.u32 3, %v2974_v12  ;;  %vm2779_vm0 = vcmp.lt.s32.totalorder %v7093_v27, 0 }
 0x3f5   : > { %4249 = vst [vmem:[%s5813_s18 + $0x80] sm:$0xff] %v2672_v17  ;;  %v2964_v54 = vmul.f32 %v2963_v51, %v2961_v33  ;;  %v2840_v18 = vshll.u32 %v2839_v2, 30  ;;  %v818_v9 = vsel %vm5510_vm3, %v7252_v36, %v8468_v48  ;;  %v7267_v42 = vadd.s32 %v7213_v52, %v7223_v14 }
 0x3f6   : > { %v3097_v55 = vor.u32 8388608, %v3096_v45  ;;  %v3104_v60 = vsub.s32 32, %v3103_v62  ;;  %v2988_v61 = vand.u32 2139095040, %v7250_v50  ;;  %v2863_v34 = vsub.s32 4, %v2839_v2 }
 0x3f7   : > { %v2965_v26 = vxor.u32 2147483648, %v2964_v54  ;;  %v7270_v44 = vsub.s32 %v2837_v29, %v2840_v18  ;;  %v7272_v43 = vshrl.u32 %v3101_v47, 5  ;;  %v3106_v57 = vshll.u32 %v8415_v37, %v3103_v62 }
 0x3f8   : > { %v3107_v32 = vshrl.u32 %v8416_v49, %v3104_v60  ;;  %v3109_v16 = vshll.u32 %v8416_v49, %v3103_v62  ;;  %v3110_v1 = vshrl.u32 %v8417_v58, %v3104_v60  ;;  %v3112_v7 = vshll.u32 %v8417_v58, %v3103_v62 }
 0x3f9   : > { %v2966_v52 = vsel %vm2883_vm2, %v2965_v26, %v2964_v54  ;;  %v2843_v14 = vsub.s32 0, %v7270_v44  ;;  %v3113_v10 = vshrl.u32 %v8418_v28, %v3104_v60  ;;  %v3115_v6 = vshll.u32 %v8418_v28, %v3103_v62 }
 0x3fa   : > { %v2969_v30 = vsel %vm7227_vm7, %v7001_v53, %v2966_v52  ;;  %v3108_v20 = vor.u32 %v3107_v32, %v3106_v57  ;;  %v3116_v0 = vshrl.u32 %v8419_v46, %v3104_v60  ;;  %v3111_v21 = vor.u32 %v3110_v1, %v3109_v16 }
 0x3fb   : > { %4858 = vcosq.f32 %v2969_v30  ;;  %v4480_v13 = vmin.u32 %v2843_v14, %v7270_v44  ;;  %v3114_v38 = vor.u32 %v3113_v10, %v3112_v7  ;;  %v3118_v22 = vshll.u32 %v8419_v46, %v3103_v62 }
 0x3fc   : > { %4860 = vsinq.f32 %v2969_v30  ;;  %v3117_v63 = vor.u32 %v3116_v0, %v3115_v6  ;;  %v3119_v11 = vshrl.u32 %v8420_v25, %v3104_v60  ;;  %v7291_v29 = vshll.u32 %v3097_v55, 8 }
 0x3fd   : > { %v2845_v39 = vclz %v4480_v13  ;;  %v2985_v5 = vand.u32 2147483647, %v7250_v50  ;;  %v2989_v35 = vshrl.u32 %v2988_v61, 23  ;;  %v2864_v15 = vsel %vm2779_vm0, %v2863_v34, %v2839_v2 }
 0x3fe   : > { %v3105_v4 = vshrl.u32 %v8415_v37, %v3104_v60  ;;  %v3120_v12 = vor.u32 %v3119_v11, %v3118_v22  ;;  %vm3121_vm15 = vcmp.lt.s32.totalorder %v7272_v43, 1  ;;  %vm7300_vm14 = vcmp.le.f32.partialorder %v2777_v24, 0.7853982 }
 0x3ff   : > { %v4481_v19 = vadd.s32 4294967294, %v2845_v39  ;;  %vm3123_vm4 = vcmp.lt.s32.totalorder %v7272_v43, 3  ;;  %vm3124_vm2 = vcmp.lt.s32.totalorder %v7272_v43, 4  ;;  %v3129_v45 = vsel %vm3121_vm15, %v3108_v20, %v3111_v21 }
 0x400   : > { %vm2977_vm5 = vcmp.eq.s32.totalorder %v7258_v40, 0  ;;  %v3126_v47 = vsel %vm3124_vm2, %v3114_v38, 2102212464  ;;  %v3130_v41 = vsel %vm3124_vm2, %v3117_v63, 920167782  ;;  %v3133_v33 = vsel %vm3121_vm15, %v3111_v21, %v3114_v38 }
 0x401   : > { %v3134_v51 = vsel %vm3124_vm2, %v3120_v12, 1326507024  ;;  %vm2976_vm1 = vcmp.lt.s32.totalorder %v7258_v40, 2  ;;  %vm4482_vm6 = vcmp.lt.s32.totalorder %v4481_v19, 0  ;;  %vm3122_vm7 = vcmp.lt.s32.totalorder %v7272_v43, 2 }
 0x402   : > { %v3131_v24 = vsel %vm3123_vm4, %v3114_v38, %v3130_v41  ;;  %v3135_v2 = vsel %vm3123_vm4, %v3117_v63, %v3134_v51  ;;  %v2848_v17 = vsel %vm4482_vm6, 0, %v4481_v19  ;;  %v3125_v62 = vsel %vm3121_vm15, %v3105_v4, %v3108_v20 }
 0x403   : > { %v3132_v54 = vsel %vm3122_vm7, %v3129_v45, %v3131_v24  ;;  %v3136_v18 = vsel %vm3122_vm7, %v3133_v33, %v3135_v2  ;;  %v2849_v55 = vsub.s32 32, %v2848_v17  ;;  %v2853_v60 = vsub.s32 4294967266, %v2848_v17 }
 0x404   : > { %v3127_v61 = vsel %vm3123_vm4, %v3111_v21, %v3126_v47  ;;  %v4487_v26 = vadd.s32 4294967169, %v2989_v35  ;;  %v7326_v34 = vmul.u32.u64.low %v7291_v29, %v3136_v18  ;;  %v7327_v57 = vmul.u32.u64.high %v7291_v29, %v3136_v18, %v7326_v34 }
 0x405   : > { %v7330_v32 = vmul.u32.u64.low %v7291_v29, %v3132_v54  ;;  %v7331_v16 = vmul.u32.u64.high %v7291_v29, %v3132_v54, %v7330_v32  ;;  %v4859_v1 = vpop.eup %4858  ;;  %v2850_v52 = vshll.u32 %v7270_v44, %v2848_v17  ;;  %v2851_v14 = vshrl.u32 %v7267_v42, %v2849_v55 }
 0x406   : > { %v2854_v7 = vadd.s32 127, %v2853_v60  ;;  %v2995_v10 = vadd.s32 1, %v4487_v26  ;;  %v4861_v30 = vpop.eup %4860  ;;  %vm2980_vm10 = vcmp.eq.s32.totalorder %v7258_v40, 2  ;;  %v2981_v20 = vxor.u32 2147483648, %v4859_v1 }
 0x407   : > { %v3128_v6 = vsel %vm3122_vm7, %v3125_v62, %v3127_v61  ;;  %v2992_v0 = vand.u32 8388607, %v2985_v5  ;;  %v2978_v13 = vxor.u32 2147483648, %v4861_v30  ;;  %v2852_v21 = vor.u32 %v2851_v14, %v2850_v52 }
 0x408   : > { %v2855_v38 = vshll.u32 %v2854_v7, 23  ;;  %vm2996_vm8 = vcmp.gt.s32.totalorder %v2995_v10, 0  ;;  %v2982_v63 = vsel %vm2980_vm10, %v2981_v20, %v4861_v30  ;;  %v2866_v42 = vsel %vm7300_vm14, 0, %v2864_v15 }
 0x409   : > { %vm3146_vm11 = vc.u32 %v7327_v57, %v7330_v32  ;;  %v3147_v44 = vadd.s32 1, %v7331_v16  ;;  %v2979_v43 = vsel %vm2977_vm5, %v4859_v1, %v2978_v13  ;;  %v3144_v11 = vmul.u32 %v7291_v29, %v3128_v6 }
 0x40a   : > { %v2856_v22 = vor.u32 4788187, %v2855_v38  ;;  %v2997_v39 = vsel %vm2996_vm8, %v2995_v10, 0  ;;  %vm2973_vm9 = vweird.f32 %v7001_v53  ;;  %v2983_v35 = vsel %vm2976_vm1, %v2979_v43, %v2982_v63 }
 0x40b   : > { %v3148_v4 = vsel %vm3146_vm11, %v3147_v44, %v7331_v16  ;;  %v2999_v15 = vand.u32 31, %v2997_v39  ;;  %v2984_v12 = vsel %vm2973_vm9, nan, %v2983_v35  ;;  %v2859_v45 = vcvt.s32.f32 %v2852_v21 }
 0x40c   : > { %v2857_v19 = vand.u32 2147483647, %v2856_v22  ;;  %v3149_v47 = vadd.s32 %v3148_v4, %v3144_v11  ;;  %4252 = vst [vmem:[%s5813_s18 + $0x98] sm:$0xff] %v2984_v12  ;;  %v2870_v41 = vadd.s32 3, %v2866_v42  ;;  %v2993_v33 = vor.u32 8388608, %v2992_v0 }
 0x40d   : > { %v3000_v51 = vsub.s32 32, %v2999_v15  ;;  %v857_v53 = vmul.f32 %v7012_v56, %v818_v9  ;;  %v3002_v24 = vshll.u32 %v8415_v37, %v2999_v15  ;;  %v3005_v2 = vshll.u32 %v8416_v49, %v2999_v15 }
 0x40e   : > { %v2860_v40 = vmul.f32 %v2859_v45, %v2857_v19  ;;  %v3150_v29 = vadd.s32 536870912, %v3149_v47  ;;  %v3008_v54 = vshll.u32 %v8417_v58, %v2999_v15  ;;  %v2998_v9 = vshrl.u32 %v2997_v39, 5 }
 0x40f   : > { %v3003_v17 = vshrl.u32 %v8416_v49, %v3000_v51  ;;  %v3006_v62 = vshrl.u32 %v8417_v58, %v3000_v51  ;;  %v3009_v18 = vshrl.u32 %v8418_v28, %v3000_v51  ;;  %v3012_v36 = vshrl.u32 %v8419_v46, %v3000_v51 }
 0x410   : > { %v2861_v55 = vxor.u32 2147483648, %v2860_v40  ;;  %v3151_v60 = vshrl.u32 %v3150_v29, 30  ;;  %v3015_v48 = vshrl.u32 %v8420_v25, %v3000_v51  ;;  %v3011_v26 = vshll.u32 %v8418_v28, %v2999_v15 }
 0x411   : > { %v3004_v61 = vor.u32 %v3003_v17, %v3002_v24  ;;  %v3014_v34 = vshll.u32 %v8419_v46, %v2999_v15  ;;  %v3007_v52 = vor.u32 %v3006_v62, %v3005_v2  ;;  %v3010_v14 = vor.u32 %v3009_v18, %v3008_v54  ;;  %v8473_v2 = vld [vmem:[#allocation17_spill] sm:$0xff] }
 0x412   : > { %v2862_v16 = vsel %vm2779_vm0, %v2861_v55, %v2860_v40  ;;  %v3152_v1 = vshll.u32 %v3151_v60, 30  ;;  %v7375_v10 = vand.u32 3, %v2870_v41  ;;  %v3013_v30 = vor.u32 %v3012_v36, %v3011_v26 }
 0x413   : > { %v2865_v7 = vsel %vm7300_vm14, %v7093_v27, %v2862_v16  ;;  %v3016_v20 = vor.u32 %v3015_v48, %v3014_v34  ;;  %v7379_v0 = vshll.u32 %v2993_v33, 8  ;;  %v7382_v13 = vadd.f32 %v6998_v8, %v857_v53 }
 0x414   : > { %4862 = vcosq.f32 %v2865_v7  ;;  %v7377_v6 = vsub.s32 %v3149_v47, %v3152_v1  ;;  %v3001_v21 = vshrl.u32 %v8415_v37, %v3000_v51  ;;  %vm3017_vm12 = vcmp.lt.s32.totalorder %v2998_v9, 1  ;;  %v564_v47 = vpop.permute.xlu0 %563 }
 0x415   : > { %4864 = vsinq.f32 %v2865_v7  ;;  %vm3020_vm13 = vcmp.lt.s32.totalorder %v2998_v9, 4  ;;  %v3175_v38 = vsub.s32 4, %v3151_v60  ;;  %v3025_v42 = vsel %vm3017_vm12, %v3004_v61, %v3007_v52 }
 0x416   : > { %v3155_v23 = vsub.s32 0, %v7377_v6  ;;  %v3022_v63 = vsel %vm3020_vm13, %v3010_v14, 2102212464  ;;  %vm3019_vm0 = vcmp.lt.s32.totalorder %v2998_v9, 3  ;;  %v3026_v44 = vsel %vm3020_vm13, %v3013_v30, 920167782 }
 0x417   : > { %v3029_v43 = vsel %vm3017_vm12, %v3007_v52, %v3010_v14  ;;  %v3030_v22 = vsel %vm3020_vm13, %v3016_v20, 1326507024  ;;  %vm3018_vm15 = vcmp.lt.s32.totalorder %v2998_v9, 2  ;;  %v3027_v39 = vsel %vm3019_vm0, %v3010_v14, %v3026_v44 }
 0x418   : > { %v4492_v11 = vmin.u32 %v3155_v23, %v7377_v6  ;;  %v3031_v8 = vsel %vm3019_vm0, %v3013_v30, %v3030_v22  ;;  %v3021_v35 = vsel %vm3017_vm12, %v3001_v21, %v3004_v61  ;;  %v3023_v4 = vsel %vm3019_vm0, %v3007_v52, %v3022_v63 }
 0x419   : > { %v3028_v15 = vsel %vm3018_vm15, %v3025_v42, %v3027_v39  ;;  %v3032_v12 = vsel %vm3018_vm15, %v3029_v43, %v3031_v8  ;;  %vm7389_vm14 = vcmp.le.f32.partialorder %v3089_v3, 0.7853982  ;;  %vm3091_vm4 = vcmp.lt.s32.totalorder %v7192_v59, 0  ;;  %v7442_v39 = vpop.permute.xlu1 %578 }
 0x41a   : > { %v3157_v45 = vclz %v4492_v11  ;;  %v7395_v41 = vmul.u32.u64.low %v7379_v0, %v3032_v12  ;;  %v7396_v33 = vmul.u32.u64.high %v7379_v0, %v3032_v12, %v7395_v41  ;;  %v3176_v3 = vsel %vm3091_vm4, %v3175_v38, %v3151_v60 }
 0x41b   : > { %v7399_v51 = vmul.u32.u64.low %v7379_v0, %v3028_v15  ;;  %v7400_v53 = vmul.u32.u64.high %v7379_v0, %v3028_v15, %v7399_v51  ;;  %v3024_v29 = vsel %vm3018_vm15, %v3021_v35, %v3023_v4  ;;  %v3300_v24 = vand.u32 2139095040, %v7382_v13  ;;  %v8474_v41 = vld [vmem:[#allocation18_spill] sm:$0xff] }
 0x41c   : > { %v4493_v40 = vadd.s32 4294967294, %v3157_v45  ;;  %vm2872_vm2 = vcmp.lt.s32.totalorder %v7375_v10, 2  ;;  %vm2873_vm5 = vcmp.eq.s32.totalorder %v7375_v10, 0  ;;  %vm2876_vm1 = vcmp.eq.s32.totalorder %v7375_v10, 2 }
 0x41d   : > { %v817_v17 = vsel %vm5510_vm3, %v564_v47, %v8473_v2  ;;  %v3145_v54 = vadd.s32 %v7330_v32, %v7327_v57  ;;  %v3297_v18 = vand.u32 2147483647, %v7382_v13  ;;  %v3301_v55 = vshrl.u32 %v3300_v24, 23 }
 0x41e   : > { %v4863_v62 = vpop.eup %4862  ;;  %vm4494_vm6 = vcmp.lt.s32.totalorder %v4493_v40, 0  ;;  %v3178_v9 = vsel %vm7389_vm14, 0, %v3176_v3  ;;  %v3040_v61 = vmul.u32 %v7379_v0, %v3024_v29  ;;  %vm3042_vm7 = vc.u32 %v7396_v33, %v7399_v51 }
 0x41f   : > { %v4865_v60 = vpop.eup %4864  ;;  %v2877_v36 = vxor.u32 2147483648, %v4863_v62  ;;  %v3160_v48 = vsel %vm4494_vm6, 0, %v4493_v40  ;;  %v3043_v32 = vadd.s32 1, %v7400_v53  ;;  %v4499_v1 = vadd.s32 4294967169, %v3301_v55 }
 0x420   : > { %v2874_v26 = vxor.u32 2147483648, %v4865_v60  ;;  %v3161_v34 = vsub.s32 32, %v3160_v48  ;;  %v3165_v16 = vsub.s32 4294967266, %v3160_v48  ;;  %v856_v52 = vmul.f32 %v7012_v56, %v817_v17 }
 0x421   : > { %v2878_v57 = vsel %vm2876_vm1, %v2877_v36, %v4865_v60  ;;  %v3162_v7 = vshll.u32 %v7377_v6, %v3160_v48  ;;  %vm2869_vm10 = vweird.f32 %v7093_v27  ;;  %v3044_v21 = vsel %vm3042_vm7, %v3043_v32, %v7400_v53  ;;  %v7437_v27 = vld [vmem:[%s8366_s4] ss:$0 sm:$0xff] }
 0x422   : > { %v2875_v14 = vsel %vm2873_vm5, %v4863_v62, %v2874_v26  ;;  %v3163_v30 = vshrl.u32 %v3145_v54, %v3161_v34  ;;  %v3166_v20 = vadd.s32 127, %v3165_v16  ;;  %v3307_v23 = vadd.s32 1, %v4499_v1 }
 0x423   : > { %v2879_v0 = vsel %vm2872_vm2, %v2875_v14, %v2878_v57  ;;  %v3045_v44 = vadd.s32 %v3044_v21, %v3040_v61  ;;  %v3182_v56 = vadd.s32 3, %v3178_v9  ;;  %v3304_v43 = vand.u32 8388607, %v3297_v18 }
 0x424   : > { %v2880_v38 = vsel %vm2869_vm10, nan, %v2879_v0  ;;  %v3164_v63 = vor.u32 %v3163_v30, %v3162_v7  ;;  %v3167_v42 = vshll.u32 %v3166_v20, 23  ;;  %vm3308_vm8 = vcmp.gt.s32.totalorder %v3307_v23, 0 }
 0x425   : > { %4251 = vst [vmem:[%s5813_s18 + $0x90] sm:$0xff] %v2880_v38  ;;  %v3046_v22 = vadd.s32 536870912, %v3045_v44  ;;  %v3309_v11 = vsel %vm3308_vm8, %v3307_v23, 0  ;;  %v7440_v10 = vadd.f32 %v7437_v27, %v856_v52  ;;  %vm2987_vm11 = vcmp.lt.s32.totalorder %v7250_v50, 0 }
 0x426   : > { %v3168_v6 = vor.u32 4788187, %v3167_v42  ;;  %v3311_v8 = vand.u32 31, %v3309_v11  ;;  %v3171_v4 = vcvt.s32.f32 %v3164_v63  ;;  %v7445_v12 = vand.u32 3, %v3182_v56 }
 0x427   : > { %v3047_v15 = vshrl.u32 %v3046_v22, 30  ;;  %v3305_v45 = vor.u32 8388608, %v3304_v43  ;;  %v820_v53 = vsel %vm5510_vm3, %v7442_v39, %v8474_v41  ;;  %v3196_v24 = vand.u32 2139095040, %v7440_v10 }
 0x428   : > { %v3169_v35 = vand.u32 2147483647, %v3168_v6  ;;  %v3312_v47 = vsub.s32 32, %v3311_v8  ;;  %v3314_v29 = vshll.u32 %v8415_v37, %v3311_v8  ;;  %v3317_v17 = vshll.u32 %v8416_v49, %v3311_v8 }
 0x429   : > { %v3048_v3 = vshll.u32 %v3047_v15, 30  ;;  %v3320_v36 = vshll.u32 %v8417_v58, %v3311_v8  ;;  %v3071_v9 = vsub.s32 4, %v3047_v15  ;;  %v3310_v61 = vshrl.u32 %v3309_v11, 5 }
 0x42a   : > { %v3172_v40 = vmul.f32 %v3171_v4, %v3169_v35  ;;  %v3315_v2 = vshrl.u32 %v8416_v49, %v3312_v47  ;;  %v3318_v62 = vshrl.u32 %v8417_v58, %v3312_v47  ;;  %v3321_v54 = vshrl.u32 %v8418_v28, %v3312_v47 }
 0x42b   : > { %v7457_v60 = vsub.s32 %v3045_v44, %v3048_v3  ;;  %v3324_v48 = vshrl.u32 %v8419_v46, %v3312_v47  ;;  %v3323_v34 = vshll.u32 %v8418_v28, %v3311_v8  ;;  %vm7470_vm9 = vcmp.le.f32.partialorder %v2985_v5, 0.7853982 }
 0x42c   : > { %v3173_v55 = vxor.u32 2147483648, %v3172_v40  ;;  %v3316_v26 = vor.u32 %v3315_v2, %v3314_v29  ;;  %v3319_v32 = vor.u32 %v3318_v62, %v3317_v17  ;;  %v3322_v1 = vor.u32 %v3321_v54, %v3320_v36 }
 0x42d   : > { %v3051_v57 = vsub.s32 0, %v7457_v60  ;;  %v3325_v7 = vor.u32 %v3324_v48, %v3323_v34  ;;  %v3326_v30 = vshll.u32 %v8419_v46, %v3311_v8  ;;  %v3327_v20 = vshrl.u32 %v8420_v25, %v3312_v47 }
 0x42e   : > { %v3174_v16 = vsel %vm3091_vm4, %v3173_v55, %v3172_v40  ;;  %v7477_v21 = vshll.u32 %v3305_v45, 8  ;;  %v3197_v23 = vshrl.u32 %v3196_v24, 23  ;;  %v3072_v19 = vsel %vm2987_vm11, %v3071_v9, %v3047_v15 }
 0x42f   : > { %v3177_v52 = vsel %vm7389_vm14, %v7192_v59, %v3174_v16  ;;  %v4488_v0 = vmin.u32 %v3051_v57, %v7457_v60  ;;  %v3313_v5 = vshrl.u32 %v8415_v37, %v3312_v47  ;;  %v3328_v38 = vor.u32 %v3327_v20, %v3326_v30 }
 0x430   : > { %4866 = vcosq.f32 %v3177_v52  ;;  %vm3329_vm12 = vcmp.lt.s32.totalorder %v3310_v61, 1  ;;  %vm3330_vm13 = vcmp.lt.s32.totalorder %v3310_v61, 2  ;;  %vm3332_vm0 = vcmp.lt.s32.totalorder %v3310_v61, 4 }
 0x431   : > { %4868 = vsinq.f32 %v3177_v52  ;;  %v3053_v63 = vclz %v4488_v0  ;;  %vm3331_vm15 = vcmp.lt.s32.totalorder %v3310_v61, 3  ;;  %v3334_v42 = vsel %vm3332_vm0, %v3322_v1, 2102212464 }
 0x432   : > { %v3337_v44 = vsel %vm3329_vm12, %v3316_v26, %v3319_v32  ;;  %v3338_v56 = vsel %vm3332_vm0, %v3325_v7, 920167782  ;;  %vm3188_vm14 = vcmp.eq.s32.totalorder %v7445_v12, 2  ;;  %v3333_v6 = vsel %vm3329_vm12, %v3313_v5, %v3316_v26 }
 0x433   : > { %v4489_v43 = vadd.s32 4294967294, %v3053_v63  ;;  %v3339_v22 = vsel %vm3331_vm15, %v3322_v1, %v3338_v56  ;;  %v3341_v11 = vsel %vm3329_vm12, %v3319_v32, %v3322_v1  ;;  %vm3185_vm4 = vcmp.eq.s32.totalorder %v7445_v12, 0 }
 0x434   : > { %v3335_v8 = vsel %vm3331_vm15, %v3319_v32, %v3334_v42  ;;  %v3340_v35 = vsel %vm3330_vm13, %v3337_v44, %v3339_v22  ;;  %v3342_v4 = vsel %vm3332_vm0, %v3328_v38, 1326507024  ;;  %v4495_v15 = vadd.s32 4294967169, %v3197_v23 }
 0x435   : > { %vm4490_vm2 = vcmp.lt.s32.totalorder %v4489_v43, 0  ;;  %v3343_v45 = vsel %vm3331_vm15, %v3325_v7, %v3342_v4  ;;  %v7486_v47 = vmul.u32.u64.low %v7477_v21, %v3340_v35  ;;  %v7487_v40 = vmul.u32.u64.high %v7477_v21, %v3340_v35, %v7486_v47 }
 0x436   : > { %vm3181_vm5 = vweird.f32 %v7192_v59  ;;  %v3041_v3 = vadd.s32 %v7399_v51, %v7396_v33  ;;  %v3056_v29 = vsel %vm4490_vm2, 0, %v4489_v43  ;;  %v3344_v24 = vsel %vm3330_vm13, %v3341_v11, %v3343_v45 }
 0x437   : > { %v3193_v2 = vand.u32 2147483647, %v7440_v10  ;;  %v3057_v17 = vsub.s32 32, %v3056_v29  ;;  %v3061_v62 = vsub.s32 4294967266, %v3056_v29  ;;  %v3074_v54 = vsel %vm7470_vm9, 0, %v3072_v19 }
 0x438   : > { %v3203_v55 = vadd.s32 1, %v4495_v15  ;;  %v3058_v36 = vshll.u32 %v7457_v60, %v3056_v29  ;;  %v3336_v48 = vsel %vm3330_vm13, %v3333_v6, %v3335_v8  ;;  %v3355_v16 = vadd.s32 1, %v7487_v40  ;;  %v7509_v60 = vld [vmem:[%s8365_s3] ss:$0 sm:$0xff] }
 0x439   : > { %v7500_v9 = vmul.u32.u64.low %v7477_v21, %v3344_v24  ;;  %v7501_v26 = vmul.u32.u64.high %v7477_v21, %v3344_v24, %v7500_v9  ;;  %v3059_v51 = vshrl.u32 %v3041_v3, %v3057_v17  ;;  %v3062_v34 = vadd.s32 127, %v3061_v62 }
 0x43a   : > { %v4867_v33 = vpop.eup %4866  ;;  %vm3204_vm1 = vcmp.gt.s32.totalorder %v3203_v55, 0  ;;  %v3200_v1 = vand.u32 8388607, %v3193_v2  ;;  %v859_v61 = vmul.f32 %v7509_v60, %v820_v53  ;;  %v3078_v0 = vadd.s32 3, %v3074_v54 }
 0x43b   : > { %v4869_v57 = vpop.eup %4868  ;;  %v3189_v32 = vxor.u32 2147483648, %v4867_v33  ;;  %v3205_v52 = vsel %vm3204_vm1, %v3203_v55, 0  ;;  %v3060_v30 = vor.u32 %v3059_v51, %v3058_v36  ;;  %v3063_v20 = vshll.u32 %v3062_v34, 23 }
 0x43c   : > { %v3186_v7 = vxor.u32 2147483648, %v4869_v57  ;;  %v3352_v19 = vmul.u32 %v7477_v21, %v3336_v48  ;;  %vm3354_vm6 = vc.u32 %v7501_v26, %v7486_v47  ;;  %v3207_v5 = vand.u32 31, %v3205_v52 }
 0x43d   : > { %v3190_v23 = vsel %vm3188_vm14, %v3189_v32, %v4869_v57  ;;  %vm3184_vm7 = vcmp.lt.s32.totalorder %v7445_v12, 2  ;;  %v3064_v41 = vor.u32 4788187, %v3063_v20  ;;  %v3356_v53 = vsel %vm3354_vm6, %v3355_v16, %v7487_v40 }
 0x43e   : > { %v3187_v39 = vsel %vm3185_vm4, %v4867_v33, %v3186_v7  ;;  %v3357_v63 = vadd.s32 %v3356_v53, %v3352_v19  ;;  %v3208_v42 = vsub.s32 32, %v3207_v5  ;;  %v7527_v44 = vadd.f32 %v7437_v27, %v859_v61 }
 0x43f   : > { %v3191_v38 = vsel %vm3184_vm7, %v3187_v39, %v3190_v23  ;;  %v3065_v56 = vand.u32 2147483647, %v3064_v41  ;;  %v3067_v43 = vcvt.s32.f32 %v3060_v30  ;;  %v7531_v6 = vand.u32 3, %v3078_v0 }
 0x440   : > { %v3192_v21 = vsel %vm3181_vm5, nan, %v3191_v38  ;;  %v3358_v22 = vadd.s32 536870912, %v3357_v63  ;;  %v3201_v12 = vor.u32 8388608, %v3200_v1  ;;  %v3211_v11 = vshrl.u32 %v8416_v49, %v3208_v42 }
 0x441   : > { %4254 = vst [vmem:[%s5813_s18 + $0xa8] sm:$0xff] %v3192_v21  ;;  %v3214_v8 = vshrl.u32 %v8417_v58, %v3208_v42  ;;  %v3068_v35 = vmul.f32 %v3067_v43, %v3065_v56  ;;  %v3206_v4 = vshrl.u32 %v3205_v52, 5  ;;  %v3217_v15 = vshrl.u32 %v8418_v28, %v3208_v42  ;;  %v575_v56 = vpop.permute.xlu0 %574 }
 0x442   : > { %v3220_v45 = vshrl.u32 %v8419_v46, %v3208_v42  ;;  %v3359_v40 = vshrl.u32 %v3358_v22, 30  ;;  %v3210_v59 = vshll.u32 %v8415_v37, %v3207_v5  ;;  %v3213_v3 = vshll.u32 %v8416_v49, %v3207_v5 }
 0x443   : > { %v3216_v29 = vshll.u32 %v8417_v58, %v3207_v5  ;;  %v3069_v24 = vxor.u32 2147483648, %v3068_v35  ;;  %vm3299_vm10 = vcmp.lt.s32.totalorder %v7382_v13, 0  ;;  %v3219_v17 = vshll.u32 %v8418_v28, %v3207_v5 }
 0x444   : > { %v3222_v62 = vshll.u32 %v8419_v46, %v3207_v5  ;;  %v3223_v54 = vshrl.u32 %v8420_v25, %v3208_v42  ;;  %v3360_v55 = vshll.u32 %v3359_v40, 30  ;;  %v3212_v36 = vor.u32 %v3211_v11, %v3210_v59  ;;  %v8479_v59 = vld [vmem:[#allocation19_spill] sm:$0xff] }
 0x445   : > { %v3215_v48 = vor.u32 %v3214_v8, %v3213_v3  ;;  %v3218_v9 = vor.u32 %v3217_v15, %v3216_v29  ;;  %v3070_v33 = vsel %vm2987_vm11, %v3069_v24, %v3068_v35  ;;  %v3221_v51 = vor.u32 %v3220_v45, %v3219_v17 }
 0x446   : > { %v3224_v34 = vor.u32 %v3223_v54, %v3222_v62  ;;  %v7547_v16 = vshll.u32 %v3201_v12, 8  ;;  %v3073_v57 = vsel %vm7470_vm9, %v7250_v50, %v3070_v33  ;;  %v7552_v32 = vsub.s32 %v3357_v63, %v3360_v55 }
 0x447   : > { %v3383_v1 = vsub.s32 4, %v3359_v40  ;;  %v3209_v52 = vshrl.u32 %v8415_v37, %v3208_v42  ;;  %4870 = vcosq.f32 %v3073_v57  ;;  %vm3225_vm8 = vcmp.lt.s32.totalorder %v3206_v4, 1 }
 0x448   : > { %vm3226_vm12 = vcmp.lt.s32.totalorder %v3206_v4, 2  ;;  %vm3228_vm13 = vcmp.lt.s32.totalorder %v3206_v4, 4  ;;  %4872 = vsinq.f32 %v3073_v57  ;;  %v3363_v61 = vsub.s32 0, %v7552_v32 }
 0x449   : > { %v3230_v7 = vsel %vm3228_vm13, %v3218_v9, 2102212464  ;;  %v3233_v30 = vsel %vm3225_vm8, %v3212_v36, %v3215_v48  ;;  %vm3227_vm11 = vcmp.lt.s32.totalorder %v3206_v4, 3  ;;  %v3234_v20 = vsel %vm3228_vm13, %v3221_v51, 920167782 }
 0x44a   : > { %v3237_v0 = vsel %vm3225_vm8, %v3215_v48, %v3218_v9  ;;  %v3238_v23 = vsel %vm3228_vm13, %v3224_v34, 1326507024  ;;  %v4500_v14 = vmin.u32 %v3363_v61, %v7552_v32  ;;  %v3229_v19 = vsel %vm3225_vm8, %v3209_v52, %v3212_v36 }
 0x44b   : > { %v3235_v5 = vsel %vm3227_vm11, %v3218_v9, %v3234_v20  ;;  %v3239_v39 = vsel %vm3227_vm11, %v3221_v51, %v3238_v23  ;;  %v3231_v41 = vsel %vm3227_vm11, %v3215_v48, %v3230_v7  ;;  %v3508_v63 = vand.u32 2139095040, %v7527_v44 }
 0x44c   : > { %v3236_v53 = vsel %vm3226_vm12, %v3233_v30, %v3235_v5  ;;  %v3240_v38 = vsel %vm3226_vm12, %v3237_v0, %v3239_v39  ;;  %v3365_v42 = vclz %v4500_v14  ;;  %v3384_v21 = vsel %vm3299_vm10, %v3383_v1, %v3359_v40  ;;  %v8480_v30 = vld [vmem:[#allocation20_spill] sm:$0xff] }
 0x44d   : > { %v7563_v43 = vmul.u32.u64.low %v7547_v16, %v3240_v38  ;;  %v7564_v22 = vmul.u32.u64.high %v7547_v16, %v3240_v38, %v7563_v43  ;;  %v7567_v12 = vmul.u32.u64.low %v7547_v16, %v3236_v53  ;;  %v7568_v11 = vmul.u32.u64.high %v7547_v16, %v3236_v53, %v7567_v12 }
 0x44e   : > { %vm3077_vm9 = vweird.f32 %v7250_v50  ;;  %v4501_v8 = vadd.s32 4294967294, %v3365_v42  ;;  %v3232_v35 = vsel %vm3226_vm12, %v3229_v19, %v3231_v41  ;;  %v3505_v15 = vand.u32 2147483647, %v7527_v44 }
 0x44f   : > { %v3509_v45 = vshrl.u32 %v3508_v63, 23  ;;  %vm3081_vm0 = vcmp.eq.s32.totalorder %v7531_v6, 0  ;;  %vm3084_vm15 = vcmp.eq.s32.totalorder %v7531_v6, 2  ;;  %vm7577_vm14 = vcmp.le.f32.partialorder %v3297_v18, 0.7853982 }
 0x450   : > { %v819_v3 = vsel %vm5510_vm3, %v575_v56, %v8479_v59  ;;  %v3353_v4 = vadd.s32 %v7486_v47, %v7501_v26  ;;  %vm4502_vm4 = vcmp.lt.s32.totalorder %v4501_v8, 0  ;;  %v3386_v29 = vsel %vm7577_vm14, 0, %v3384_v21  ;;  %v590_v26 = vpop.permute.xlu1 %589 }
 0x451   : > { %v4507_v24 = vadd.s32 4294967169, %v3509_v45  ;;  %v4871_v17 = vpop.eup %4870  ;;  %v3368_v62 = vsel %vm4502_vm4, 0, %v4501_v8  ;;  %v3248_v54 = vmul.u32 %v7547_v16, %v3232_v35  ;;  %vm3250_vm2 = vc.u32 %v7564_v22, %v7567_v12 }
 0x452   : > { %v3251_v18 = vadd.s32 1, %v7568_v11  ;;  %v4873_v55 = vpop.eup %4872  ;;  %v3085_v36 = vxor.u32 2147483648, %v4871_v17  ;;  %v3369_v48 = vsub.s32 32, %v3368_v62  ;;  %v3373_v9 = vsub.s32 4294967266, %v3368_v62 }
 0x453   : > { %v3512_v47 = vand.u32 8388607, %v3505_v15  ;;  %v3082_v33 = vxor.u32 2147483648, %v4873_v55  ;;  %v3370_v51 = vshll.u32 %v7552_v32, %v3368_v62  ;;  %v3515_v57 = vadd.s32 1, %v4507_v24 }
 0x454   : > { %v3252_v34 = vsel %vm3250_vm2, %v3251_v18, %v7568_v11  ;;  %v3086_v16 = vsel %vm3084_vm15, %v3085_v36, %v4873_v55  ;;  %v3371_v1 = vshrl.u32 %v3353_v4, %v3369_v48  ;;  %v3374_v52 = vadd.s32 127, %v3373_v9 }
 0x455   : > { %v3253_v61 = vadd.s32 %v3252_v34, %v3248_v54  ;;  %vm3080_vm5 = vcmp.lt.s32.totalorder %v7531_v6, 2  ;;  %v3083_v7 = vsel %vm3081_vm0, %v4871_v17, %v3082_v33  ;;  %vm3516_vm1 = vcmp.gt.s32.totalorder %v3515_v57, 0 }
 0x456   : > { %v822_v32 = vsel %vm5510_vm3, %v590_v26, %v8480_v30  ;;  %v3087_v20 = vsel %vm3080_vm5, %v3083_v7, %v3086_v16  ;;  %v3372_v0 = vor.u32 %v3371_v1, %v3370_v51  ;;  %v3375_v23 = vshll.u32 %v3374_v52, 23 }
 0x457   : > { %v3254_v14 = vadd.s32 536870912, %v3253_v61  ;;  %v3088_v19 = vsel %vm3077_vm9, nan, %v3087_v20  ;;  %v3390_v5 = vadd.s32 3, %v3386_v29  ;;  %v3513_v39 = vor.u32 8388608, %v3512_v47 }
 0x458   : > { %v3517_v41 = vsel %vm3516_vm1, %v3515_v57, 0  ;;  %4253 = vst [vmem:[%s5813_s18 + $0xa0] sm:$0xff] %v3088_v19  ;;  %v3376_v53 = vor.u32 4788187, %v3375_v23  ;;  %v858_v6 = vmul.f32 %v7509_v60, %v819_v3  ;;  %v861_v63 = vmul.f32 %v7509_v60, %v822_v32 }
 0x459   : > { %v3255_v38 = vshrl.u32 %v3254_v14, 30  ;;  %v3519_v42 = vand.u32 31, %v3517_v41  ;;  %v3379_v56 = vcvt.s32.f32 %v3372_v0  ;;  %v7608_v11 = vand.u32 3, %v3390_v5 }
 0x45a   : > { %v3377_v21 = vand.u32 2147483647, %v3376_v53  ;;  %v3249_v8 = vadd.s32 %v7567_v12, %v7564_v22  ;;  %v7611_v35 = vshll.u32 %v3513_v39, 8  ;;  %v7616_v4 = vadd.f32 %v7437_v27, %v858_v6 }
 0x45b   : > { %v3256_v43 = vshll.u32 %v3255_v38, 30  ;;  %v3520_v50 = vsub.s32 32, %v3519_v42  ;;  %v7619_v3 = vadd.f32 %v7437_v27, %v861_v63  ;;  %v3518_v29 = vshrl.u32 %v3517_v41, 5 }
 0x45c   : > { %v3380_v45 = vmul.f32 %v3379_v56, %v3377_v21  ;;  %v3522_v24 = vshll.u32 %v8415_v37, %v3519_v42  ;;  %vm3195_vm6 = vcmp.lt.s32.totalorder %v7440_v10, 0  ;;  %v3525_v54 = vshll.u32 %v8416_v49, %v3519_v42 }
 0x45d   : > { %v7613_v59 = vsub.s32 %v3253_v61, %v3256_v43  ;;  %v3523_v17 = vshrl.u32 %v8416_v49, %v3520_v50  ;;  %v3526_v62 = vshrl.u32 %v8417_v58, %v3520_v50  ;;  %v3529_v18 = vshrl.u32 %v8418_v28, %v3520_v50 }
 0x45e   : > { %v3381_v22 = vxor.u32 2147483648, %v3380_v45  ;;  %v3528_v36 = vshll.u32 %v8417_v58, %v3519_v42  ;;  %v3531_v48 = vshll.u32 %v8418_v28, %v3519_v42  ;;  %v3532_v9 = vshrl.u32 %v8419_v46, %v3520_v50 }
 0x45f   : > { %v3259_v12 = vsub.s32 0, %v7613_v59  ;;  %v3524_v55 = vor.u32 %v3523_v17, %v3522_v24  ;;  %v3527_v33 = vor.u32 %v3526_v62, %v3525_v54  ;;  %v3534_v51 = vshll.u32 %v8419_v46, %v3519_v42 }
 0x460   : > { %v3382_v47 = vsel %vm3299_vm10, %v3381_v22, %v3380_v45  ;;  %v3530_v57 = vor.u32 %v3529_v18, %v3528_v36  ;;  %v3533_v16 = vor.u32 %v3532_v9, %v3531_v48  ;;  %v3535_v1 = vshrl.u32 %v8420_v25, %v3520_v50 }
 0x461   : > { %v4496_v26 = vmin.u32 %v3259_v12, %v7613_v59  ;;  %v3385_v34 = vsel %vm7577_vm14, %v7382_v13, %v3382_v47  ;;  %v3279_v61 = vsub.s32 4, %v3255_v38  ;;  %v3404_v7 = vand.u32 2139095040, %v7616_v4 }
 0x462   : > { %4874 = vcosq.f32 %v3385_v34  ;;  %vm7642_vm7 = vcmp.le.f32.partialorder %v3193_v2, 0.7853982  ;;  %v3521_v32 = vshrl.u32 %v8415_v37, %v3520_v50  ;;  %v3536_v40 = vor.u32 %v3535_v1, %v3534_v51 }
 0x463   : > { %v3261_v52 = vclz %v4496_v26  ;;  %4876 = vsinq.f32 %v3385_v34  ;;  %vm3537_vm10 = vcmp.lt.s32.totalorder %v3518_v29, 1  ;;  %vm3539_vm8 = vcmp.lt.s32.totalorder %v3518_v29, 3 }
 0x464   : > { %vm3540_vm12 = vcmp.lt.s32.totalorder %v3518_v29, 4  ;;  %v3545_v0 = vsel %vm3537_vm10, %v3524_v55, %v3527_v33  ;;  %v3549_v19 = vsel %vm3537_vm10, %v3527_v33, %v3530_v57  ;;  %vm3538_vm11 = vcmp.lt.s32.totalorder %v3518_v29, 2 }
 0x465   : > { %v4497_v20 = vadd.s32 4294967294, %v3261_v52  ;;  %v3542_v23 = vsel %vm3540_vm12, %v3530_v57, 2102212464  ;;  %v3546_v14 = vsel %vm3540_vm12, %v3533_v16, 920167782  ;;  %v3280_v53 = vsel %vm3195_vm6, %v3279_v61, %v3255_v38 }
 0x466   : > { %v3550_v5 = vsel %vm3540_vm12, %v3536_v40, 1326507024  ;;  %v3547_v2 = vsel %vm3539_vm8, %v3530_v57, %v3546_v14  ;;  %vm3392_vm9 = vcmp.lt.s32.totalorder %v7608_v11, 2  ;;  %v3541_v56 = vsel %vm3537_vm10, %v3521_v32, %v3524_v55 }
 0x467   : > { %vm4498_vm13 = vcmp.lt.s32.totalorder %v4497_v20, 0  ;;  %v3551_v39 = vsel %vm3539_vm8, %v3533_v16, %v3550_v5  ;;  %v3548_v6 = vsel %vm3538_vm11, %v3545_v0, %v3547_v2  ;;  %v3543_v43 = vsel %vm3539_vm8, %v3527_v33, %v3542_v23 }
 0x468   : > { %v3264_v41 = vsel %vm4498_vm13, 0, %v4497_v20  ;;  %v3552_v63 = vsel %vm3538_vm11, %v3549_v19, %v3551_v39  ;;  %vm3389_vm0 = vweird.f32 %v7382_v13  ;;  %v3405_v12 = vshrl.u32 %v3404_v7, 23 }
 0x469   : > { %v3265_v42 = vsub.s32 32, %v3264_v41  ;;  %v3269_v21 = vsub.s32 4294967266, %v3264_v41  ;;  %v7660_v50 = vmul.u32.u64.low %v7611_v35, %v3552_v63  ;;  %v7661_v45 = vmul.u32.u64.high %v7611_v35, %v3552_v63, %v7660_v50 }
 0x46a   : > { %v7664_v38 = vmul.u32.u64.low %v7611_v35, %v3548_v6  ;;  %v7665_v24 = vmul.u32.u64.high %v7611_v35, %v3548_v6, %v7664_v38  ;;  %v3266_v17 = vshll.u32 %v7613_v59, %v3264_v41  ;;  %vm3393_vm15 = vcmp.eq.s32.totalorder %v7608_v11, 0 }
 0x46b   : > { %v3267_v62 = vshrl.u32 %v3249_v8, %v3265_v42  ;;  %v3270_v22 = vadd.s32 127, %v3269_v21  ;;  %vm3396_vm14 = vcmp.eq.s32.totalorder %v7608_v11, 2  ;;  %v3544_v54 = vsel %vm3538_vm11, %v3541_v56, %v3543_v43 }
 0x46c   : > { %v3401_v18 = vand.u32 2147483647, %v7616_v4  ;;  %v4875_v55 = vpop.eup %4874  ;;  %v3282_v9 = vsel %vm7642_vm7, 0, %v3280_v53  ;;  %v4503_v47 = vadd.s32 4294967169, %v3405_v12  ;;  %vm3562_vm4 = vc.u32 %v7661_v45, %v7664_v38 }
 0x46d   : > { %v3268_v36 = vor.u32 %v3267_v62, %v3266_v17  ;;  %v3271_v48 = vshll.u32 %v3270_v22, 23  ;;  %v4877_v26 = vpop.eup %4876  ;;  %v3397_v59 = vxor.u32 2147483648, %v4875_v55  ;;  %v3563_v8 = vadd.s32 1, %v7665_v24 }
 0x46e   : > { %v3716_v33 = vand.u32 2139095040, %v7619_v3  ;;  %v3394_v29 = vxor.u32 2147483648, %v4877_v26  ;;  %v3560_v34 = vmul.u32 %v7611_v35, %v3544_v54  ;;  %v3411_v57 = vadd.s32 1, %v4503_v47 }
 0x46f   : > { %v3272_v51 = vor.u32 4788187, %v3271_v48  ;;  %v3398_v16 = vsel %vm3396_vm14, %v3397_v59, %v4877_v26  ;;  %v3275_v1 = vcvt.s32.f32 %v3268_v36  ;;  %v3286_v52 = vadd.s32 3, %v3282_v9 }
 0x470   : > { %v3564_v61 = vsel %vm3562_vm4, %v3563_v8, %v7665_v24  ;;  %v3395_v7 = vsel %vm3393_vm15, %v4875_v55, %v3394_v29  ;;  %vm3412_vm2 = vcmp.gt.s32.totalorder %v3411_v57, 0  ;;  %v3408_v35 = vand.u32 8388607, %v3401_v18 }
 0x471   : > { %v3273_v32 = vand.u32 2147483647, %v3272_v51  ;;  %v3565_v40 = vadd.s32 %v3564_v61, %v3560_v34  ;;  %v3399_v20 = vsel %vm3392_vm9, %v3395_v7, %v3398_v16  ;;  %v3413_v0 = vsel %vm3412_vm2, %v3411_v57, 0 }
 0x472   : > { %v3717_v23 = vshrl.u32 %v3716_v33, 23  ;;  %v3400_v14 = vsel %vm3389_vm0, nan, %v3399_v20  ;;  %v3415_v2 = vand.u32 31, %v3413_v0  ;;  %v7692_v41 = vand.u32 3, %v3286_v52 }
 0x473   : > { %v3276_v19 = vmul.f32 %v3275_v1, %v3273_v32  ;;  %v3566_v5 = vadd.s32 536870912, %v3565_v40  ;;  %4256 = vst [vmem:[%s5813_s18 + $0xb8] sm:$0xff] %v3400_v14  ;;  %v3409_v6 = vor.u32 8388608, %v3408_v35  ;;  %v3713_v11 = vand.u32 2147483647, %v7619_v3 }
 0x474   : > { %v3416_v63 = vsub.s32 32, %v3415_v2  ;;  %v4515_v42 = vadd.s32 4294967169, %v3717_v23  ;;  %v7697_v43 = vshrl.u32 %v3413_v0, 5  ;;  %v3418_v13 = vshll.u32 %v8415_v37, %v3415_v2 }
 0x475   : > { %v3277_v39 = vxor.u32 2147483648, %v3276_v19  ;;  %v3567_v53 = vshrl.u32 %v3566_v5, 30  ;;  %vm3507_vm5 = vcmp.lt.s32.totalorder %v7527_v44, 0  ;;  %v3421_v17 = vshll.u32 %v8416_v49, %v3415_v2 }
 0x476   : > { %v3419_v24 = vshrl.u32 %v8416_v49, %v3416_v63  ;;  %v3422_v62 = vshrl.u32 %v8417_v58, %v3416_v63  ;;  %v3424_v12 = vshll.u32 %v8417_v58, %v3415_v2  ;;  %v3425_v54 = vshrl.u32 %v8418_v28, %v3416_v63 }
 0x477   : > { %v3278_v21 = vsel %vm3195_vm6, %v3277_v39, %v3276_v19  ;;  %v3568_v56 = vshll.u32 %v3567_v53, 30  ;;  %v3427_v30 = vshll.u32 %v8418_v28, %v3415_v2  ;;  %v7712_v36 = vshll.u32 %v3409_v6, 8 }
 0x478   : > { %v3281_v50 = vsel %vm7642_vm7, %v7440_v10, %v3278_v21  ;;  %v3420_v55 = vor.u32 %v3419_v24, %v3418_v13  ;;  %v3423_v9 = vor.u32 %v3422_v62, %v3421_v17  ;;  %v3426_v47 = vor.u32 %v3425_v54, %v3424_v12 }
 0x479   : > { %4878 = vcosq.f32 %v3281_v50  ;;  %v7707_v22 = vsub.s32 %v3565_v40, %v3568_v56  ;;  %v3428_v26 = vshrl.u32 %v8419_v46, %v3416_v63  ;;  %v3561_v59 = vadd.s32 %v7664_v38, %v7661_v45 }
 0x47a   : > { %4880 = vsinq.f32 %v3281_v50  ;;  %v3430_v8 = vshll.u32 %v8419_v46, %v3415_v2  ;;  %v3431_v33 = vshrl.u32 %v8420_v25, %v3416_v63  ;;  %v3723_v29 = vadd.s32 1, %v4515_v42 }
 0x47b   : > { %v3571_v48 = vsub.s32 0, %v7707_v22  ;;  %vm3292_vm1 = vcmp.eq.s32.totalorder %v7692_v41, 2  ;;  %vm7723_vm6 = vcmp.le.f32.partialorder %v3505_v15, 0.7853982  ;;  %v3591_v57 = vsub.s32 4, %v3567_v53 }
 0x47c   : > { %v3429_v16 = vor.u32 %v3428_v26, %v3427_v30  ;;  %vm3433_vm7 = vcmp.lt.s32.totalorder %v7697_v43, 1  ;;  %vm3289_vm10 = vcmp.eq.s32.totalorder %v7692_v41, 0  ;;  %v3417_v45 = vshrl.u32 %v8415_v37, %v3416_v63 }
 0x47d   : > { %v4508_v34 = vmin.u32 %v3571_v48, %v7707_v22  ;;  %v3432_v38 = vor.u32 %v3431_v33, %v3430_v8  ;;  %vm3434_vm8 = vcmp.lt.s32.totalorder %v7697_v43, 2  ;;  %vm3436_vm12 = vcmp.lt.s32.totalorder %v7697_v43, 4 }
 0x47e   : > { %vm3288_vm13 = vcmp.lt.s32.totalorder %v7692_v41, 2  ;;  %v3438_v1 = vsel %vm3436_vm12, %v3426_v47, 2102212464  ;;  %v3441_v52 = vsel %vm3433_vm7, %v3420_v55, %v3423_v9  ;;  %v3445_v61 = vsel %vm3433_vm7, %v3423_v9, %v3426_v47 }
 0x47f   : > { %v3573_v15 = vclz %v4508_v34  ;;  %vm3285_vm11 = vweird.f32 %v7440_v10  ;;  %vm3435_vm9 = vcmp.lt.s32.totalorder %v7697_v43, 3  ;;  %v3442_v7 = vsel %vm3436_vm12, %v3429_v16, 920167782 }
 0x480   : > { %v3446_v32 = vsel %vm3436_vm12, %v3432_v38, 1326507024  ;;  %vm3724_vm0 = vcmp.gt.s32.totalorder %v3723_v29, 0  ;;  %v7742_v20 = vsel %vm3507_vm5, %v3591_v57, %v3567_v53  ;;  %v3443_v35 = vsel %vm3435_vm9, %v3426_v47, %v3442_v7 }
 0x481   : > { %v4509_v40 = vadd.s32 4294967294, %v3573_v15  ;;  %v3447_v0 = vsel %vm3435_vm9, %v3429_v16, %v3446_v32  ;;  %v3437_v23 = vsel %vm3433_vm7, %v3417_v45, %v3420_v55  ;;  %v3439_v14 = vsel %vm3435_vm9, %v3423_v9, %v3438_v1  ;;  %v586_v32 = vpop.permute.xlu0 %585 }
 0x482   : > { %v3444_v19 = vsel %vm3434_vm8, %v3441_v52, %v3443_v35  ;;  %v3448_v5 = vsel %vm3434_vm8, %v3445_v61, %v3447_v0  ;;  %v3725_v53 = vsel %vm3724_vm0, %v3723_v29, 0  ;;  %v7761_v62 = vand.u32 8388607, %v3713_v11 }
 0x483   : > { %v4879_v2 = vpop.eup %4878  ;;  %vm4510_vm15 = vcmp.lt.s32.totalorder %v4509_v40, 0  ;;  %v7751_v39 = vmul.u32.u64.low %v7712_v36, %v3448_v5  ;;  %v7752_v6 = vmul.u32.u64.high %v7712_v36, %v3448_v5, %v7751_v39  ;;  %v3594_v54 = vsel %vm7723_vm6, 0, %v7742_v20 }
 0x484   : > { %v4881_v63 = vpop.eup %4880  ;;  %v3293_v42 = vxor.u32 2147483648, %v4879_v2  ;;  %v3576_v21 = vsel %vm4510_vm15, 0, %v4509_v40  ;;  %v7755_v56 = vmul.u32.u64.low %v7712_v36, %v3444_v19  ;;  %v7756_v13 = vmul.u32.u64.high %v7712_v36, %v3444_v19, %v7755_v56 }
 0x485   : > { %v3290_v50 = vxor.u32 2147483648, %v4881_v63  ;;  %v3577_v24 = vsub.s32 32, %v3576_v21  ;;  %v3581_v17 = vsub.s32 4294967266, %v3576_v21  ;;  %v3440_v55 = vsel %vm3434_vm8, %v3437_v23, %v3439_v14 }
 0x486   : > { %v3294_v12 = vsel %vm3292_vm1, %v3293_v42, %v4881_v63  ;;  %v3727_v30 = vand.u32 31, %v3725_v53  ;;  %v3578_v9 = vshll.u32 %v7707_v22, %v3576_v21  ;;  %vm3458_vm14 = vc.u32 %v7752_v6, %v7755_v56  ;;  %v8485_v63 = vld [vmem:[#allocation21_spill] sm:$0xff] }
 0x487   : > { %v3291_v48 = vsel %vm3289_vm10, %v4879_v2, %v3290_v50  ;;  %v3579_v47 = vshrl.u32 %v3561_v59, %v3577_v24  ;;  %v3582_v26 = vadd.s32 127, %v3581_v17  ;;  %v3459_v33 = vadd.s32 1, %v7756_v13 }
 0x488   : > { %v3295_v8 = vsel %vm3288_vm13, %v3291_v48, %v3294_v12  ;;  %v3728_v29 = vsub.s32 32, %v3727_v30  ;;  %v3456_v16 = vmul.u32 %v7712_v36, %v3440_v55  ;;  %v3726_v59 = vshrl.u32 %v3725_v53, 5 }
 0x489   : > { %v3296_v43 = vsel %vm3285_vm11, nan, %v3295_v8  ;;  %v3580_v34 = vor.u32 %v3579_v47, %v3578_v9  ;;  %v3583_v57 = vshll.u32 %v3582_v26, 23  ;;  %v3460_v22 = vsel %vm3458_vm14, %v3459_v33, %v7756_v13 }
 0x48a   : > { %4255 = vst [vmem:[%s5813_s18 + $0xb0] sm:$0xff] %v3296_v43  ;;  %v3730_v41 = vshll.u32 %v8415_v37, %v3727_v30  ;;  %v3731_v45 = vshrl.u32 %v8416_v49, %v3728_v29  ;;  %v3461_v15 = vadd.s32 %v3460_v22, %v3456_v16  ;;  %v3733_v1 = vshll.u32 %v8416_v49, %v3727_v30 }
 0x48b   : > { %v3584_v38 = vor.u32 4788187, %v3583_v57  ;;  %v3734_v52 = vshrl.u32 %v8417_v58, %v3728_v29  ;;  %v3587_v10 = vcvt.s32.f32 %v3580_v34  ;;  %v3736_v7 = vshll.u32 %v8417_v58, %v3727_v30 }
 0x48c   : > { %v3732_v61 = vor.u32 %v3731_v45, %v3730_v41  ;;  %v3737_v36 = vshrl.u32 %v8418_v28, %v3728_v29  ;;  %v3462_v20 = vadd.s32 536870912, %v3461_v15  ;;  %v3739_v35 = vshll.u32 %v8418_v28, %v3727_v30 }
 0x48d   : > { %v3585_v40 = vand.u32 2147483647, %v3584_v38  ;;  %v3740_v0 = vshrl.u32 %v8419_v46, %v3728_v29  ;;  %v3735_v23 = vor.u32 %v3734_v52, %v3733_v1  ;;  %v3742_v19 = vshll.u32 %v8419_v46, %v3727_v30  ;;  %v601_v38 = vpop.permute.xlu1 %600 }
 0x48e   : > { %v3738_v14 = vor.u32 %v3737_v36, %v3736_v7  ;;  %v3743_v5 = vshrl.u32 %v8420_v25, %v3728_v29  ;;  %v3463_v39 = vshrl.u32 %v3462_v20, 30  ;;  %v821_v42 = vsel %vm5510_vm3, %v586_v32, %v8485_v63  ;;  %v8486_v20 = vld [vmem:[#allocation22_spill] sm:$0xff] }
 0x48f   : > { %v3588_v2 = vmul.f32 %v3587_v10, %v3585_v40  ;;  %v3741_v53 = vor.u32 %v3740_v0, %v3739_v35  ;;  %v3598_v21 = vadd.s32 3, %v3594_v54  ;;  %v3721_v13 = vor.u32 8388608, %v7761_v62 }
 0x490   : > { %v3744_v50 = vor.u32 %v3743_v5, %v3742_v19  ;;  %vm3745_vm4 = vcmp.lt.s32.totalorder %v3726_v59, 1  ;;  %v3464_v17 = vshll.u32 %v3463_v39, 30  ;;  %vm3747_vm2 = vcmp.lt.s32.totalorder %v3726_v59, 3 }
 0x491   : > { %v3589_v24 = vxor.u32 2147483648, %v3588_v2  ;;  %vm3748_vm1 = vcmp.lt.s32.totalorder %v3726_v59, 4  ;;  %v3753_v12 = vsel %vm3745_vm4, %v3732_v61, %v3735_v23  ;;  %v3757_v30 = vsel %vm3745_vm4, %v3735_v23, %v3738_v14 }
 0x492   : > { %v3754_v55 = vsel %vm3748_vm1, %v3741_v53, 920167782  ;;  %v3758_v48 = vsel %vm3748_vm1, %v3744_v50, 1326507024  ;;  %v7801_v47 = vsub.s32 %v3461_v15, %v3464_v17  ;;  %vm3746_vm7 = vcmp.lt.s32.totalorder %v3726_v59, 2 }
 0x493   : > { %v3590_v9 = vsel %vm3507_vm5, %v3589_v24, %v3588_v2  ;;  %v3755_v62 = vsel %vm3747_vm2, %v3738_v14, %v3754_v55  ;;  %v3729_v26 = vshrl.u32 %v8415_v37, %v3728_v29  ;;  %v3750_v8 = vsel %vm3748_vm1, %v3738_v14, 2102212464 }
 0x494   : > { %v3593_v54 = vsel %vm7723_vm6, %v7527_v44, %v3590_v9  ;;  %v3759_v33 = vsel %vm3747_vm2, %v3741_v53, %v3758_v48  ;;  %v3467_v43 = vsub.s32 0, %v7801_v47  ;;  %v3756_v34 = vsel %vm3746_vm7, %v3753_v12, %v3755_v62 }
 0x495   : > { %4882 = vcosq.f32 %v3593_v54  ;;  %v3760_v57 = vsel %vm3746_vm7, %v3757_v30, %v3759_v33  ;;  %v3761_v16 = vshll.u32 %v3721_v13, 8  ;;  %v860_v22 = vmul.f32 %v7509_v60, %v821_v42 }
 0x496   : > { %4884 = vsinq.f32 %v3593_v54  ;;  %v3599_v41 = vand.u32 3, %v3598_v21  ;;  %v4504_v51 = vmin.u32 %v3467_v43, %v7801_v47  ;;  %v3749_v45 = vsel %vm3745_vm4, %v3729_v26, %v3732_v61 }
 0x497   : > { %v3751_v29 = vsel %vm3747_vm2, %v3735_v23, %v3750_v8  ;;  %v7816_v15 = vmul.u32.u64.low %v3761_v16, %v3760_v57  ;;  %v7817_v1 = vmul.u32.u64.high %v3761_v16, %v3760_v57, %v7816_v15  ;;  %v3487_v36 = vsub.s32 4, %v3463_v39 }
 0x498   : > { %v7819_v52 = vmul.u32.u64.low %v3761_v16, %v3756_v34  ;;  %v7820_v10 = vmul.u32.u64.high %v3761_v16, %v3756_v34, %v7819_v52  ;;  %v3469_v7 = vclz %v4504_v51  ;;  %v3752_v32 = vsel %vm3746_vm7, %v3749_v45, %v3751_v29  ;;  %v7871_v15 = vpop.permute.xlu0 %596 }
 0x499   : > { %v7825_v40 = vadd.f32 %v7437_v27, %v860_v22  ;;  %v824_v61 = vsel %vm5510_vm3, %v601_v38, %v8486_v20  ;;  %vm3600_vm5 = vcmp.lt.s32.totalorder %v3599_v41, 2  ;;  %vm7832_vm6 = vcmp.le.f32.partialorder %v3401_v18, 0.7853982 }
 0x49a   : > { %vm3403_vm10 = vcmp.lt.s32.totalorder %v7616_v4, 0  ;;  %v4505_v0 = vadd.s32 4294967294, %v3469_v7  ;;  %vm3601_vm8 = vcmp.eq.s32.totalorder %v3599_v41, 0  ;;  %vm3604_vm12 = vcmp.eq.s32.totalorder %v3599_v41, 2 }
 0x49b   : > { %vm3770_vm13 = vc.u32 %v7817_v1, %v7819_v52  ;;  %v3771_v27 = vadd.s32 1, %v7820_v10  ;;  %v3488_v59 = vsel %vm3403_vm10, %v3487_v36, %v3463_v39  ;;  %v3768_v23 = vmul.u32 %v3761_v16, %v3752_v32 }
 0x49c   : > { %vm4506_vm11 = vcmp.lt.s32.totalorder %v4505_v0, 0  ;;  %v3612_v18 = vand.u32 2139095040, %v7825_v40  ;;  %v3609_v5 = vand.u32 2147483647, %v7825_v40  ;;  %v863_v2 = vmul.f32 %v7509_v60, %v824_v61 }
 0x49d   : > { %v3472_v14 = vsel %vm4506_vm11, 0, %v4505_v0  ;;  %v3772_v19 = vsel %vm3770_vm13, %v3771_v27, %v7820_v10  ;;  %v3457_v63 = vadd.s32 %v7755_v56, %v7752_v6  ;;  %v3490_v17 = vsel %vm7832_vm6, 0, %v3488_v59  ;;  %v7857_v56 = vld [vmem:[%s8366_s4] ss:$0 sm:$0xff] }
 0x49e   : > { %v3473_v42 = vsub.s32 32, %v3472_v14  ;;  %v3477_v21 = vsub.s32 4294967266, %v3472_v14  ;;  %v3773_v13 = vadd.s32 %v3772_v19, %v3768_v23  ;;  %v3474_v39 = vshll.u32 %v7801_v47, %v3472_v14  ;;  %v8489_v0 = vld [vmem:[#allocation23_spill] sm:$0xff] }
 0x49f   : > { %v4883_v53 = vpop.eup %4882  ;;  %v3613_v12 = vshrl.u32 %v3612_v18, 23  ;;  %v3616_v6 = vand.u32 8388607, %v3609_v5  ;;  %v7860_v47 = vadd.f32 %v7857_v56, %v863_v2  ;;  %vm3597_vm9 = vweird.f32 %v7527_v44 }
 0x4a0   : > { %v4885_v50 = vpop.eup %4884  ;;  %v3605_v24 = vxor.u32 2147483648, %v4883_v53  ;;  %v3475_v30 = vshrl.u32 %v3457_v63, %v3473_v42  ;;  %v3478_v48 = vadd.s32 127, %v3477_v21  ;;  %v3774_v9 = vadd.s32 536870912, %v3773_v13 }
 0x4a1   : > { %v3602_v55 = vxor.u32 2147483648, %v4885_v50  ;;  %v4511_v62 = vadd.s32 4294967169, %v3613_v12  ;;  %v3494_v22 = vadd.s32 3, %v3490_v17  ;;  %v3617_v45 = vor.u32 8388608, %v3616_v6 }
 0x4a2   : > { %v3606_v60 = vsel %vm3604_vm12, %v3605_v24, %v4885_v50  ;;  %v3476_v26 = vor.u32 %v3475_v30, %v3474_v39  ;;  %v3479_v8 = vshll.u32 %v3478_v48, 23  ;;  %v7863_v33 = vshrl.u32 %v3774_v9, 30 }
 0x4a3   : > { %v3603_v54 = vsel %vm3601_vm8, %v4883_v53, %v3602_v55  ;;  %v3619_v34 = vadd.s32 1, %v4511_v62  ;;  %v3921_v29 = vand.u32 2147483647, %v7860_v47  ;;  %v3924_v38 = vand.u32 2139095040, %v7860_v47 }
 0x4a4   : > { %v3607_v43 = vsel %vm3600_vm5, %v3603_v54, %v3606_v60  ;;  %v3480_v16 = vor.u32 4788187, %v3479_v8  ;;  %v3776_v51 = vshll.u32 %v7863_v33, 30  ;;  %v3483_v7 = vcvt.s32.f32 %v3476_v26 }
 0x4a5   : > { %v3608_v57 = vsel %vm3597_vm9, nan, %v3607_v43  ;;  %vm3620_vm0 = vcmp.gt.s32.totalorder %v3619_v34, 0  ;;  %v7875_v20 = vand.u32 3, %v3494_v22  ;;  %v823_v27 = vsel %vm5510_vm3, %v7871_v15, %v8489_v0 }
 0x4a6   : > { %4258 = vst [vmem:[%s5813_s18 + $0xc8] sm:$0xff] %v3608_v57  ;;  %v3481_v10 = vand.u32 2147483647, %v3480_v16  ;;  %v7873_v44 = vsub.s32 %v3773_v13, %v3776_v51  ;;  %v3621_v41 = vsel %vm3620_vm0, %v3619_v34, 0  ;;  %v3769_v59 = vadd.s32 %v7819_v52, %v7817_v1 }
 0x4a7   : > { %v3623_v36 = vand.u32 31, %v3621_v41  ;;  %v3799_v23 = vsub.s32 4, %v7863_v33  ;;  %v7885_v14 = vshll.u32 %v3617_v45, 8  ;;  %v3925_v53 = vshrl.u32 %v3924_v38, 23 }
 0x4a8   : > { %v3484_v32 = vmul.f32 %v3483_v7, %v3481_v10  ;;  %v3779_v61 = vsub.s32 0, %v7873_v44  ;;  %v7890_v63 = vand.u32 8388607, %v3921_v29  ;;  %v7892_v42 = vshrl.u32 %v3621_v41, 5 }
 0x4a9   : > { %v3624_v18 = vsub.s32 32, %v3623_v36  ;;  %v3626_v21 = vshll.u32 %v8415_v37, %v3623_v36  ;;  %v3629_v12 = vshll.u32 %v8416_v49, %v3623_v36  ;;  %v3632_v55 = vshll.u32 %v8417_v58, %v3623_v36 }
 0x4aa   : > { %v3485_v19 = vxor.u32 2147483648, %v3484_v32  ;;  %v4516_v2 = vmin.u32 %v3779_v61, %v7873_v44  ;;  %v3635_v30 = vshll.u32 %v8418_v28, %v3623_v36  ;;  %v4523_v60 = vadd.s32 4294967169, %v3925_v53 }
 0x4ab   : > { %v3627_v13 = vshrl.u32 %v8416_v49, %v3624_v18  ;;  %v3630_v1 = vshrl.u32 %v8417_v58, %v3624_v18  ;;  %v3633_v24 = vshrl.u32 %v8418_v28, %v3624_v18  ;;  %v3636_v39 = vshrl.u32 %v8419_v46, %v3624_v18 }
 0x4ac   : > { %v3486_v52 = vsel %vm3403_vm10, %v3485_v19, %v3484_v32  ;;  %v3781_v50 = vclz %v4516_v2  ;;  %vm3715_vm15 = vcmp.lt.s32.totalorder %v7619_v3, 0  ;;  %v3625_v35 = vshrl.u32 %v8415_v37, %v3624_v18 }
 0x4ad   : > { %v3489_v17 = vsel %vm7832_vm6, %v7616_v4, %v3486_v52  ;;  %v3628_v9 = vor.u32 %v3627_v13, %v3626_v21  ;;  %v3631_v62 = vor.u32 %v3630_v1, %v3629_v12  ;;  %v3634_v6 = vor.u32 %v3633_v24, %v3632_v55 }
 0x4ae   : > { %4886 = vcosq.f32 %v3489_v17  ;;  %v4517_v48 = vadd.s32 4294967294, %v3781_v50  ;;  %v3637_v54 = vor.u32 %v3636_v39, %v3635_v30  ;;  %v3638_v26 = vshll.u32 %v8419_v46, %v3623_v36 }
 0x4af   : > { %4888 = vsinq.f32 %v3489_v17  ;;  %v3639_v8 = vshrl.u32 %v8420_v25, %v3624_v18  ;;  %vm3641_vm4 = vcmp.lt.s32.totalorder %v7892_v42, 1  ;;  %vm3642_vm2 = vcmp.lt.s32.totalorder %v7892_v42, 2 }
 0x4b0   : > { %vm4518_vm14 = vcmp.lt.s32.totalorder %v4517_v48, 0  ;;  %vm3643_vm1 = vcmp.lt.s32.totalorder %v7892_v42, 3  ;;  %vm3500_vm7 = vcmp.eq.s32.totalorder %v7875_v20, 2  ;;  %vm7917_vm5 = vcmp.le.f32.partialorder %v3713_v11, 0.7853982 }
 0x4b1   : > { %v3784_v43 = vsel %vm4518_vm14, 0, %v4517_v48  ;;  %v3640_v22 = vor.u32 %v3639_v8, %v3638_v26  ;;  %vm3644_vm6 = vcmp.lt.s32.totalorder %v7892_v42, 4  ;;  %vm3497_vm10 = vcmp.eq.s32.totalorder %v7875_v20, 0  ;;  %v7975_v8 = vpop.permute.xlu1 %611 }
 0x4b2   : > { %v3785_v57 = vsub.s32 32, %v3784_v43  ;;  %v3789_v16 = vsub.s32 4294967266, %v3784_v43  ;;  %v3786_v51 = vshll.u32 %v7873_v44, %v3784_v43  ;;  %v3646_v45 = vsel %vm3644_vm6, %v3634_v6, 2102212464 }
 0x4b3   : > { %v3649_v38 = vsel %vm3641_vm4, %v3628_v9, %v3631_v62  ;;  %v3650_v10 = vsel %vm3644_vm6, %v3637_v54, 920167782  ;;  %vm3496_vm8 = vcmp.lt.s32.totalorder %v7875_v20, 2  ;;  %v3653_v36 = vsel %vm3641_vm4, %v3631_v62, %v3634_v6 }
 0x4b4   : > { %v3787_v11 = vshrl.u32 %v3769_v59, %v3785_v57  ;;  %v3790_v7 = vadd.s32 127, %v3789_v16  ;;  %v3651_v41 = vsel %vm3643_vm1, %v3634_v6, %v3650_v10  ;;  %vm3493_vm12 = vweird.f32 %v7616_v4 }
 0x4b5   : > { %v3645_v44 = vsel %vm3641_vm4, %v3625_v35, %v3628_v9  ;;  %v3652_v32 = vsel %vm3642_vm2, %v3649_v38, %v3651_v41  ;;  %v3654_v61 = vsel %vm3644_vm6, %v3640_v22, 1326507024  ;;  %v3931_v18 = vadd.s32 1, %v4523_v60  ;;  %v7961_v9 = vld [vmem:[%s8365_s3] ss:$0 sm:$0xff] }
 0x4b6   : > { %v3788_v19 = vor.u32 %v3787_v11, %v3786_v51  ;;  %v3791_v2 = vshll.u32 %v3790_v7, 23  ;;  %v3647_v59 = vsel %vm3643_vm1, %v3631_v62, %v3646_v45  ;;  %v3655_v53 = vsel %vm3643_vm1, %v3637_v54, %v3654_v61 }
 0x4b7   : > { %v3656_v21 = vsel %vm3642_vm2, %v3653_v36, %v3655_v53  ;;  %v7943_v13 = vmul.u32.u64.low %v7885_v14, %v3652_v32  ;;  %v7944_v1 = vmul.u32.u64.high %v7885_v14, %v3652_v32, %v7943_v13  ;;  %vm3932_vm13 = vcmp.gt.s32.totalorder %v3931_v18, 0 }
 0x4b8   : > { %v4887_v52 = vpop.eup %4886  ;;  %v3792_v50 = vor.u32 4788187, %v3791_v2  ;;  %v3800_v24 = vsel %vm3715_vm15, %v3799_v23, %v7863_v33  ;;  %v7953_v39 = vmul.u32.u64.low %v7885_v14, %v3656_v21  ;;  %v7954_v17 = vmul.u32.u64.high %v7885_v14, %v3656_v21, %v7953_v39 }
 0x4b9   : > { %v4889_v12 = vpop.eup %4888  ;;  %v3501_v55 = vxor.u32 2147483648, %v4887_v52  ;;  %v3648_v30 = vsel %vm3642_vm2, %v3645_v44, %v3647_v59  ;;  %v3933_v48 = vsel %vm3932_vm13, %v3931_v18, 0  ;;  %v862_v33 = vmul.f32 %v7961_v9, %v823_v27 }
 0x4ba   : > { %v3498_v23 = vxor.u32 2147483648, %v4889_v12  ;;  %v3793_v60 = vand.u32 2147483647, %v3792_v50  ;;  %v3795_v62 = vcvt.s32.f32 %v3788_v19  ;;  %v3935_v6 = vand.u32 31, %v3933_v48  ;;  %v8003_v19 = vpop.permute.xlu1 %787 }
 0x4bb   : > { %v3502_v42 = vsel %vm3500_vm7, %v3501_v55, %v4889_v12  ;;  %v3802_v54 = vsel %vm7917_vm5, 0, %v3800_v24  ;;  %v3667_v35 = vadd.s32 1, %v7944_v1  ;;  %v3929_v26 = vor.u32 8388608, %v7890_v63 }
 0x4bc   : > { %v3499_v15 = vsel %vm3497_vm10, %v4887_v52, %v3498_v23  ;;  %v3796_v0 = vmul.f32 %v3795_v62, %v3793_v60  ;;  %v3664_v27 = vmul.u32 %v7885_v14, %v3648_v30  ;;  %vm3666_vm11 = vc.u32 %v7954_v17, %v7943_v13 }
 0x4bd   : > { %v3503_v43 = vsel %vm3496_vm8, %v3499_v15, %v3502_v42  ;;  %v3668_v57 = vsel %vm3666_vm11, %v3667_v35, %v7944_v1  ;;  %v7985_v16 = vshrl.u32 %v3933_v48, 5  ;;  %v3936_v22 = vsub.s32 32, %v3935_v6 }
 0x4be   : > { %v3504_v63 = vsel %vm3493_vm12, nan, %v3503_v43  ;;  %v3797_v51 = vxor.u32 2147483648, %v3796_v0  ;;  %v3669_v45 = vadd.s32 %v3668_v57, %v3664_v27  ;;  %v3938_v38 = vshll.u32 %v8415_v37, %v3935_v6 }
 0x4bf   : > { %4257 = vst [vmem:[%s5813_s18 + $0xc0] sm:$0xff] %v3504_v63  ;;  %v3939_v14 = vshrl.u32 %v8416_v49, %v3936_v22  ;;  %v3941_v10 = vshll.u32 %v8416_v49, %v3935_v6  ;;  %v3942_v20 = vshrl.u32 %v8417_v58, %v3936_v22  ;;  %v3944_v11 = vshll.u32 %v8417_v58, %v3935_v6 }
 0x4c0   : > { %v3798_v7 = vsel %vm3715_vm15, %v3797_v51, %v3796_v0  ;;  %v3670_v41 = vadd.s32 536870912, %v3669_v45  ;;  %v3945_v4 = vshrl.u32 %v8418_v28, %v3936_v22  ;;  %v3947_v36 = vshll.u32 %v8418_v28, %v3935_v6 }
 0x4c1   : > { %v3801_v44 = vsel %vm7917_vm5, %v7619_v3, %v3798_v7  ;;  %v3940_v32 = vor.u32 %v3939_v14, %v3938_v38  ;;  %v3943_v61 = vor.u32 %v3942_v20, %v3941_v10  ;;  %v3948_v18 = vshrl.u32 %v8419_v46, %v3936_v22 }
 0x4c2   : > { %4890 = vcosq.f32 %v3801_v44  ;;  %v3806_v2 = vadd.s32 3, %v3802_v54  ;;  %v3671_v59 = vshrl.u32 %v3670_v41, 30  ;;  %v3946_v53 = vor.u32 %v3945_v4, %v3944_v11 }
 0x4c3   : > { %4892 = vsinq.f32 %v3801_v44  ;;  %v3949_v21 = vor.u32 %v3948_v18, %v3947_v36  ;;  %v3950_v1 = vshll.u32 %v8419_v46, %v3935_v6  ;;  %v3951_v52 = vshrl.u32 %v8420_v25, %v3936_v22 }
 0x4c4   : > { %v3672_v50 = vshll.u32 %v3671_v59, 30  ;;  %vm3953_vm9 = vcmp.lt.s32.totalorder %v7985_v16, 1  ;;  %v826_v34 = vsel %vm5510_vm3, %v7975_v8, %v8003_v19  ;;  %vm3611_vm0 = vcmp.lt.s32.totalorder %v7825_v40, 0 }
 0x4c5   : > { %v3952_v24 = vor.u32 %v3951_v52, %v3950_v1  ;;  %vm3956_vm15 = vcmp.lt.s32.totalorder %v7985_v16, 4  ;;  %v3961_v39 = vsel %vm3953_vm9, %v3940_v32, %v3943_v61  ;;  %v3807_v12 = vand.u32 3, %v3806_v2  ;;  %v8072_v1 = vpop.permute.xlu0 %607 }
 0x4c6   : > { %v8016_v55 = vsub.s32 %v3669_v45, %v3672_v50  ;;  %vm3955_vm14 = vcmp.lt.s32.totalorder %v7985_v16, 3  ;;  %v3962_v30 = vsel %vm3956_vm15, %v3949_v21, 920167782  ;;  %vm3954_vm4 = vcmp.lt.s32.totalorder %v7985_v16, 2 }
 0x4c7   : > { %v3963_v48 = vsel %vm3955_vm14, %v3946_v53, %v3962_v30  ;;  %v3969_v23 = vshll.u32 %v3929_v26, 8  ;;  %v8025_v60 = vadd.f32 %v7857_v56, %v862_v33  ;;  %v3695_v6 = vsub.s32 4, %v3671_v59 }
 0x4c8   : > { %v3675_v62 = vsub.s32 0, %v8016_v55  ;;  %v3964_v42 = vsel %vm3954_vm4, %v3961_v39, %v3963_v48  ;;  %v3965_v54 = vsel %vm3953_vm9, %v3943_v61, %v3946_v53  ;;  %vm3805_vm2 = vweird.f32 %v7619_v3 }
 0x4c9   : > { %v3958_v35 = vsel %vm3956_vm15, %v3946_v53, 2102212464  ;;  %v3966_v26 = vsel %vm3956_vm15, %v3952_v24, 1326507024  ;;  %v8037_v15 = vmul.u32.u64.low %v3969_v23, %v3964_v42  ;;  %v8038_v33 = vmul.u32.u64.high %v3969_v23, %v3964_v42, %v8037_v15 }
 0x4ca   : > { %vm8043_vm1 = vcmp.le.f32.partialorder %v3609_v5, 0.7853982  ;;  %v4512_v27 = vmin.u32 %v3675_v62, %v8016_v55  ;;  %v3937_v43 = vshrl.u32 %v8415_v37, %v3936_v22  ;;  %v3967_v57 = vsel %vm3955_vm14, %v3949_v21, %v3966_v26 }
 0x4cb   : > { %vm3808_vm7 = vcmp.lt.s32.totalorder %v3807_v12, 2  ;;  %vm3809_vm5 = vcmp.eq.s32.totalorder %v3807_v12, 0  ;;  %v3968_v63 = vsel %vm3954_vm4, %v3965_v54, %v3967_v57  ;;  %v3820_v51 = vand.u32 2139095040, %v8025_v60 }
 0x4cc   : > { %v4891_v45 = vpop.eup %4890  ;;  %v3677_v38 = vclz %v4512_v27  ;;  %v3957_v5 = vsel %vm3953_vm9, %v3937_v43, %v3940_v32  ;;  %v3959_v14 = vsel %vm3955_vm14, %v3943_v61, %v3958_v35  ;;  %v3817_v22 = vand.u32 2147483647, %v8025_v60  ;;  %v8090_v43 = vpop.permute.xlu0 %783 }
 0x4cd   : > { %v4893_v10 = vpop.eup %4892  ;;  %v3813_v20 = vxor.u32 2147483648, %v4891_v45  ;;  %v3696_v11 = vsel %vm3611_vm0, %v3695_v6, %v3671_v59  ;;  %v8061_v7 = vmul.u32.u64.low %v3969_v23, %v3968_v63  ;;  %v8062_v41 = vmul.u32.u64.high %v3969_v23, %v3968_v63, %v8061_v7 }
 0x4ce   : > { %v3810_v4 = vxor.u32 2147483648, %v4893_v10  ;;  %vm3812_vm6 = vcmp.eq.s32.totalorder %v3807_v12, 2  ;;  %v4513_v36 = vadd.s32 4294967294, %v3677_v38  ;;  %v3821_v44 = vshrl.u32 %v3820_v51, 23 }
 0x4cf   : > { %v3814_v18 = vsel %vm3812_vm6, %v3813_v20, %v4893_v10  ;;  %v3665_v32 = vadd.s32 %v7943_v13, %v7954_v17  ;;  %v3960_v61 = vsel %vm3954_vm4, %v3957_v5, %v3959_v14  ;;  %v3979_v2 = vadd.s32 1, %v8038_v33 }
 0x4d0   : > { %v3811_v53 = vsel %vm3809_vm5, %v4891_v45, %v3810_v4  ;;  %vm4514_vm10 = vcmp.lt.s32.totalorder %v4513_v36, 0  ;;  %v3698_v59 = vsel %vm8043_vm1, 0, %v3696_v11  ;;  %v4519_v21 = vadd.s32 4294967169, %v3821_v44 }
 0x4d1   : > { %v3815_v52 = vsel %vm3808_vm7, %v3811_v53, %v3814_v18  ;;  %v3680_v50 = vsel %vm4514_vm10, 0, %v4513_v36  ;;  %vm3978_vm8 = vc.u32 %v8062_v41, %v8037_v15  ;;  %v3824_v13 = vand.u32 8388607, %v3817_v22 }
 0x4d2   : > { %v3816_v17 = vsel %vm3805_vm2, nan, %v3815_v52  ;;  %v3681_v16 = vsub.s32 32, %v3680_v50  ;;  %v3685_v24 = vsub.s32 4294967266, %v3680_v50  ;;  %v3976_v39 = vmul.u32 %v3969_v23, %v3960_v61 }
 0x4d3   : > { %4260 = vst [vmem:[%s5813_s18 + $0xd8] sm:$0xff] %v3816_v17  ;;  %v3980_v30 = vsel %vm3978_vm8, %v3979_v2, %v8038_v33  ;;  %v3827_v48 = vadd.s32 1, %v4519_v21  ;;  %v865_v12 = vmul.f32 %v7961_v9, %v826_v34  ;;  %v3682_v62 = vshll.u32 %v8016_v55, %v3680_v50 }
 0x4d4   : > { %v3683_v6 = vshrl.u32 %v3665_v32, %v3681_v16  ;;  %v3686_v42 = vadd.s32 127, %v3685_v24  ;;  %v3981_v3 = vadd.s32 %v3980_v30, %v3976_v39  ;;  %v3702_v54 = vadd.s32 3, %v3698_v59 }
 0x4d5   : > { %v3825_v35 = vor.u32 8388608, %v3824_v13  ;;  %vm3828_vm12 = vcmp.gt.s32.totalorder %v3827_v48, 0  ;;  %v8093_v63 = vadd.f32 %v7857_v56, %v865_v12  ;;  %v825_v51 = vsel %vm5510_vm3, %v8072_v1, %v8090_v43 }
 0x4d6   : > { %v3684_v23 = vor.u32 %v3683_v6, %v3682_v62  ;;  %v3687_v26 = vshll.u32 %v3686_v42, 23  ;;  %v3982_v27 = vadd.s32 536870912, %v3981_v3  ;;  %v3829_v33 = vsel %vm3828_vm12, %v3827_v48, 0 }
 0x4d7   : > { %v3831_v57 = vand.u32 31, %v3829_v33  ;;  %v8097_v34 = vand.u32 3, %v3702_v54  ;;  %v8104_v14 = vshll.u32 %v3825_v35, 8  ;;  %v4132_v7 = vand.u32 2139095040, %v8093_v63 }
 0x4d8   : > { %v3688_v8 = vor.u32 4788187, %v3687_v26  ;;  %v8095_v19 = vshrl.u32 %v3982_v27, 30  ;;  %v3691_v38 = vcvt.s32.f32 %v3684_v23  ;;  %v3977_v32 = vadd.s32 %v8037_v15, %v8062_v41 }
 0x4d9   : > { %v3832_v55 = vsub.s32 32, %v3831_v57  ;;  %v3834_v44 = vshll.u32 %v8415_v37, %v3831_v57  ;;  %v3830_v61 = vshrl.u32 %v3829_v33, 5  ;;  %v3837_v2 = vshll.u32 %v8416_v49, %v3831_v57 }
 0x4da   : > { %v3689_v45 = vand.u32 2147483647, %v3688_v8  ;;  %v3984_v5 = vshll.u32 %v8095_v19, 30  ;;  %v3840_v53 = vshll.u32 %v8417_v58, %v3831_v57  ;;  %v3843_v50 = vshll.u32 %v8418_v28, %v3831_v57 }
 0x4db   : > { %v3835_v10 = vshrl.u32 %v8416_v49, %v3832_v55  ;;  %v3838_v20 = vshrl.u32 %v8417_v58, %v3832_v55  ;;  %v3841_v11 = vshrl.u32 %v8418_v28, %v3832_v55  ;;  %v3844_v18 = vshrl.u32 %v8419_v46, %v3832_v55 }
 0x4dc   : > { %v3692_v4 = vmul.f32 %v3691_v38, %v3689_v45  ;;  %v8110_v36 = vsub.s32 %v3981_v3, %v3984_v5  ;;  %v3846_v16 = vshll.u32 %v8419_v46, %v3831_v57  ;;  %v3847_v24 = vshrl.u32 %v8420_v25, %v3832_v55 }
 0x4dd   : > { %v3836_v52 = vor.u32 %v3835_v10, %v3834_v44  ;;  %v3839_v13 = vor.u32 %v3838_v20, %v3837_v2  ;;  %v3842_v17 = vor.u32 %v3841_v11, %v3840_v53  ;;  %v3845_v39 = vor.u32 %v3844_v18, %v3843_v50 }
 0x4de   : > { %v3693_v59 = vxor.u32 2147483648, %v3692_v4  ;;  %v3987_v21 = vsub.s32 0, %v8110_v36  ;;  %v4133_v30 = vshrl.u32 %v4132_v7, 23  ;;  %v4007_v12 = vsub.s32 4, %v8095_v19 }
 0x4df   : > { %v3833_v62 = vshrl.u32 %v8415_v37, %v3832_v55  ;;  %v3848_v6 = vor.u32 %v3847_v24, %v3846_v16  ;;  %vm3923_vm13 = vcmp.lt.s32.totalorder %v7860_v47, 0  ;;  %vm3849_vm11 = vcmp.lt.s32.totalorder %v3830_v61, 1 }
 0x4e0   : > { %v3694_v15 = vsel %vm3611_vm0, %v3693_v59, %v3692_v4  ;;  %v4524_v41 = vmin.u32 %v3987_v21, %v8110_v36  ;;  %vm3852_vm9 = vcmp.lt.s32.totalorder %v3830_v61, 4  ;;  %vm3850_vm0 = vcmp.lt.s32.totalorder %v3830_v61, 2 }
 0x4e1   : > { %v3697_v48 = vsel %vm8043_vm1, %v7825_v40, %v3694_v15  ;;  %v3854_v3 = vsel %vm3852_vm9, %v3842_v17, 2102212464  ;;  %v3857_v54 = vsel %vm3849_vm11, %v3836_v52, %v3839_v13  ;;  %vm3851_vm15 = vcmp.lt.s32.totalorder %v3830_v61, 3 }
 0x4e2   : > { %4894 = vcosq.f32 %v3697_v48  ;;  %v3989_v42 = vclz %v4524_v41  ;;  %v3858_v23 = vsel %vm3852_vm9, %v3845_v39, 920167782  ;;  %v3861_v0 = vsel %vm3849_vm11, %v3839_v13, %v3842_v17 }
 0x4e3   : > { %4896 = vsinq.f32 %v3697_v48  ;;  %vm8133_vm14 = vcmp.le.f32.partialorder %v3921_v29, 0.7853982  ;;  %v3853_v27 = vsel %vm3849_vm11, %v3833_v62, %v3836_v52  ;;  %v3859_v33 = vsel %vm3851_vm15, %v3842_v17, %v3858_v23 }
 0x4e4   : > { %v4525_v35 = vadd.s32 4294967294, %v3989_v42  ;;  %v3862_v57 = vsel %vm3852_vm9, %v3848_v6, 1326507024  ;;  %v4531_v8 = vadd.s32 4294967169, %v4133_v30  ;;  %v3855_v55 = vsel %vm3851_vm15, %v3839_v13, %v3854_v3 }
 0x4e5   : > { %v3860_v45 = vsel %vm3850_vm0, %v3857_v54, %v3859_v33  ;;  %v3863_v38 = vsel %vm3851_vm15, %v3845_v39, %v3862_v57  ;;  %vm3704_vm2 = vcmp.lt.s32.totalorder %v8097_v34, 2  ;;  %v4129_v4 = vand.u32 2147483647, %v8093_v63 }
 0x4e6   : > { %vm4526_vm4 = vcmp.lt.s32.totalorder %v4525_v35, 0  ;;  %v3864_v10 = vsel %vm3850_vm0, %v3861_v0, %v3863_v38  ;;  %v8140_v20 = vmul.u32.u64.low %v8104_v14, %v3860_v45  ;;  %v8141_v11 = vmul.u32.u64.high %v8104_v14, %v3860_v45, %v8140_v20 }
 0x4e7   : > { %v3992_v5 = vsel %vm4526_vm4, 0, %v4525_v35  ;;  %v4139_v44 = vadd.s32 1, %v4531_v8  ;;  %vm3701_vm1 = vweird.f32 %v7825_v40  ;;  %v3856_v18 = vsel %vm3850_vm0, %v3853_v27, %v3855_v55 }
 0x4e8   : > { %v3993_v29 = vsub.s32 32, %v3992_v5  ;;  %v3997_v7 = vsub.s32 4294967266, %v3992_v5  ;;  %v8149_v2 = vmul.u32.u64.low %v8104_v14, %v3864_v10  ;;  %v8150_v53 = vmul.u32.u64.high %v8104_v14, %v3864_v10, %v8149_v2 }
 0x4e9   : > { %v864_v59 = vmul.f32 %v7961_v9, %v825_v51  ;;  %v3994_v21 = vshll.u32 %v8110_v36, %v3992_v5  ;;  %vm4140_vm7 = vcmp.gt.s32.totalorder %v4139_v44, 0  ;;  %vm3708_vm5 = vcmp.eq.s32.totalorder %v8097_v34, 2 }
 0x4ea   : > { %v3995_v52 = vshrl.u32 %v3977_v32, %v3993_v29  ;;  %v3998_v50 = vadd.s32 127, %v3997_v7  ;;  %v4008_v61 = vsel %vm3923_vm13, %v4007_v12, %v8095_v19  ;;  %v3875_v13 = vadd.s32 1, %v8141_v11 }
 0x4eb   : > { %v4141_v17 = vsel %vm4140_vm7, %v4139_v44, 0  ;;  %v4136_v9 = vand.u32 8388607, %v4129_v4  ;;  %v3872_v36 = vmul.u32 %v8104_v14, %v3856_v18  ;;  %vm3874_vm3 = vc.u32 %v8150_v53, %v8140_v20 }
 0x4ec   : > { %v4895_v31 = vpop.eup %4894  ;;  %v3996_v16 = vor.u32 %v3995_v52, %v3994_v21  ;;  %v3999_v24 = vshll.u32 %v3998_v50, 23  ;;  %v4143_v1 = vand.u32 31, %v4141_v17  ;;  %v8170_v32 = vadd.f32 %v7857_v56, %v864_v59 }
 0x4ed   : > { %v4897_v43 = vpop.eup %4896  ;;  %v3709_v51 = vxor.u32 2147483648, %v4895_v31  ;;  %v4010_v41 = vsel %vm8133_vm14, 0, %v4008_v61  ;;  %v3876_v39 = vsel %vm3874_vm3, %v3875_v13, %v8141_v11  ;;  %vm3705_vm6 = vcmp.eq.s32.totalorder %v8097_v34, 0 }
 0x4ee   : > { %v3706_v19 = vxor.u32 2147483648, %v4897_v43  ;;  %v4000_v15 = vor.u32 4788187, %v3999_v24  ;;  %v3877_v14 = vadd.s32 %v3876_v39, %v3872_v36  ;;  %v4144_v48 = vsub.s32 32, %v4143_v1 }
 0x4ef   : > { %v3710_v30 = vsel %vm3708_vm5, %v3709_v51, %v4897_v43  ;;  %v4003_v6 = vcvt.s32.f32 %v3996_v16  ;;  %v4137_v56 = vor.u32 8388608, %v4136_v9  ;;  %v4014_v3 = vadd.s32 3, %v4010_v41 }
 0x4f0   : > { %v3707_v12 = vsel %vm3705_vm6, %v4895_v31, %v3706_v19  ;;  %v4001_v62 = vand.u32 2147483647, %v4000_v15  ;;  %v3878_v54 = vadd.s32 536870912, %v3877_v14  ;;  %v4147_v35 = vshrl.u32 %v8416_v49, %v4144_v48 }
 0x4f1   : > { %v3711_v42 = vsel %vm3704_vm2, %v3707_v12, %v3710_v30  ;;  %v4150_v27 = vshrl.u32 %v8417_v58, %v4144_v48  ;;  %v4028_v33 = vand.u32 2139095040, %v8170_v32  ;;  %v4146_v8 = vshll.u32 %v8415_v37, %v4143_v1 }
 0x4f2   : > { %v3712_v23 = vsel %vm3701_vm1, nan, %v3711_v42  ;;  %v4004_v0 = vmul.f32 %v4003_v6, %v4001_v62  ;;  %v8186_v57 = vshrl.u32 %v3878_v54, 30  ;;  %v4153_v34 = vshrl.u32 %v8418_v28, %v4144_v48 }
 0x4f3   : > { %4259 = vst [vmem:[%s5813_s18 + $0xd0] sm:$0xff] %v3712_v23  ;;  %v4156_v55 = vshrl.u32 %v8419_v46, %v4144_v48  ;;  %v4142_v38 = vshrl.u32 %v4141_v17, 5  ;;  %v4149_v5 = vshll.u32 %v8416_v49, %v4143_v1  ;;  %v4155_v40 = vshll.u32 %v8418_v28, %v4143_v1 }
 0x4f4   : > { %v4005_v45 = vxor.u32 2147483648, %v4004_v0  ;;  %v3880_v10 = vshll.u32 %v8186_v57, 30  ;;  %v4148_v11 = vor.u32 %v4147_v35, %v4146_v8  ;;  %v4152_v29 = vshll.u32 %v8417_v58, %v4143_v1 }
 0x4f5   : > { %v4159_v7 = vshrl.u32 %v8420_v25, %v4144_v48  ;;  %v4151_v18 = vor.u32 %v4150_v27, %v4149_v5  ;;  %v4157_v2 = vor.u32 %v4156_v55, %v4155_v40  ;;  %v4158_v59 = vshll.u32 %v8419_v46, %v4143_v1 }
 0x4f6   : > { %v4006_v44 = vsel %vm3923_vm13, %v4005_v45, %v4004_v0  ;;  %v8202_v52 = vand.u32 3, %v4014_v3  ;;  %v8204_v50 = vsub.s32 %v3877_v14, %v3880_v10  ;;  %v4154_v61 = vor.u32 %v4153_v34, %v4152_v29 }
 0x4f7   : > { %v4009_v21 = vsel %vm8133_vm14, %v7860_v47, %v4006_v44  ;;  %v4160_v13 = vor.u32 %v4159_v7, %v4158_v59  ;;  %v4177_v17 = vshll.u32 %v4137_v56, 8  ;;  %v4029_v31 = vshrl.u32 %v4028_v33, 23 }
 0x4f8   : > { %4898 = vcosq.f32 %v4009_v21  ;;  %v3883_v16 = vsub.s32 0, %v8204_v50  ;;  %vm4161_vm10 = vcmp.lt.s32.totalorder %v4142_v38, 1  ;;  %vm4164_vm8 = vcmp.lt.s32.totalorder %v4142_v38, 4 }
 0x4f9   : > { %4900 = vsinq.f32 %v4009_v21  ;;  %v4145_v24 = vshrl.u32 %v8415_v37, %v4144_v48  ;;  %vm4163_vm12 = vcmp.lt.s32.totalorder %v4142_v38, 3  ;;  %v4169_v9 = vsel %vm4161_vm10, %v4148_v11, %v4151_v18 }
 0x4fa   : > { %v4170_v26 = vsel %vm4164_vm8, %v4157_v2, 920167782  ;;  %v4520_v1 = vmin.u32 %v3883_v16, %v8204_v50  ;;  %vm4162_vm13 = vcmp.lt.s32.totalorder %v4142_v38, 2  ;;  %v4166_v43 = vsel %vm4164_vm8, %v4154_v61, 2102212464 }
 0x4fb   : > { %v4171_v51 = vsel %vm4163_vm12, %v4154_v61, %v4170_v26  ;;  %v4173_v19 = vsel %vm4161_vm10, %v4151_v18, %v4154_v61  ;;  %v4174_v15 = vsel %vm4164_vm8, %v4160_v13, 1326507024  ;;  %v4527_v41 = vadd.s32 4294967169, %v4029_v31 }
 0x4fc   : > { %v4172_v36 = vsel %vm4162_vm13, %v4169_v9, %v4171_v51  ;;  %v3885_v39 = vclz %v4520_v1  ;;  %v4165_v30 = vsel %vm4161_vm10, %v4145_v24, %v4148_v11  ;;  %v4167_v14 = vsel %vm4163_vm12, %v4151_v18, %v4166_v43 }
 0x4fd   : > { %v4175_v12 = vsel %vm4163_vm12, %v4157_v2, %v4174_v15  ;;  %v8210_v62 = vmul.u32.u64.low %v4177_v17, %v4172_v36  ;;  %v8211_v6 = vmul.u32.u64.high %v4177_v17, %v4172_v36, %v8210_v62  ;;  %v4035_v42 = vadd.s32 1, %v4527_v41 }
 0x4fe   : > { %v4521_v48 = vadd.s32 4294967294, %v3885_v39  ;;  %v4176_v56 = vsel %vm4162_vm13, %v4173_v19, %v4175_v12  ;;  %vm4013_vm11 = vweird.f32 %v7860_v47  ;;  %vm4017_vm9 = vcmp.eq.s32.totalorder %v8202_v52, 0 }
 0x4ff   : > { %v8217_v3 = vmul.u32.u64.low %v4177_v17, %v4176_v56  ;;  %v8218_v54 = vmul.u32.u64.high %v4177_v17, %v4176_v56, %v8217_v3  ;;  %vm4020_vm0 = vcmp.eq.s32.totalorder %v8202_v52, 2  ;;  %v4168_v35 = vsel %vm4162_vm13, %v4165_v30, %v4167_v14 }
 0x500   : > { %vm4522_vm15 = vcmp.lt.s32.totalorder %v4521_v48, 0  ;;  %vm4036_vm14 = vcmp.gt.s32.totalorder %v4035_v42, 0  ;;  %v3873_v0 = vadd.s32 %v8140_v20, %v8150_v53  ;;  %v4187_v33 = vadd.s32 1, %v8211_v6 }
 0x501   : > { %v3888_v27 = vsel %vm4522_vm15, 0, %v4521_v48  ;;  %v4025_v8 = vand.u32 2147483647, %v8170_v32  ;;  %vm3819_vm4 = vcmp.lt.s32.totalorder %v8025_v60, 0  ;;  %v4037_v40 = vsel %vm4036_vm14, %v4035_v42, 0 }
 0x502   : > { %v4899_v23 = vpop.eup %4898  ;;  %v3889_v45 = vsub.s32 32, %v3888_v27  ;;  %v3893_v5 = vsub.s32 4294967266, %v3888_v27  ;;  %v3890_v38 = vshll.u32 %v8204_v50, %v3888_v27  ;;  %v4184_v11 = vmul.u32 %v4177_v17, %v4168_v35 }
 0x503   : > { %v4901_v34 = vpop.eup %4900  ;;  %v4021_v55 = vxor.u32 2147483648, %v4899_v23  ;;  %vm4186_vm2 = vc.u32 %v8218_v54, %v8210_v62  ;;  %vm4016_vm1 = vcmp.lt.s32.totalorder %v8202_v52, 2  ;;  %v4039_v2 = vand.u32 31, %v4037_v40 }
 0x504   : > { %v4018_v10 = vxor.u32 2147483648, %v4901_v34  ;;  %v3891_v53 = vshrl.u32 %v3873_v0, %v3889_v45  ;;  %v3894_v29 = vadd.s32 127, %v3893_v5  ;;  %v4188_v7 = vsel %vm4186_vm2, %v4187_v33, %v8211_v6 }
 0x505   : > { %v4022_v20 = vsel %vm4020_vm0, %v4021_v55, %v4901_v34  ;;  %v4189_v18 = vadd.s32 %v4188_v7, %v4184_v11  ;;  %vm8238_vm7 = vcmp.le.f32.partialorder %v3817_v22, 0.7853982  ;;  %v3903_v17 = vsub.s32 4, %v8186_v57 }
 0x506   : > { %v4019_v44 = vsel %vm4017_vm9, %v4899_v23, %v4018_v10  ;;  %v3892_v50 = vor.u32 %v3891_v53, %v3890_v38  ;;  %v3895_v61 = vshll.u32 %v3894_v29, 23  ;;  %v4040_v16 = vsub.s32 32, %v4039_v2 }
 0x507   : > { %v4023_v59 = vsel %vm4016_vm1, %v4019_v44, %v4022_v20  ;;  %v4190_v31 = vadd.s32 536870912, %v4189_v18  ;;  %v4032_v9 = vand.u32 8388607, %v4025_v8  ;;  %v4042_v22 = vshll.u32 %v8415_v37, %v4039_v2 }
 0x508   : > { %v4024_v13 = vsel %vm4013_vm11, nan, %v4023_v59  ;;  %v3896_v52 = vor.u32 4788187, %v3895_v61  ;;  %v3899_v24 = vcvt.s32.f32 %v3892_v50  ;;  %v4043_v1 = vshrl.u32 %v8416_v49, %v4040_v16 }
 0x509   : > { %4262 = vst [vmem:[%s5813_s18 + $0xe8] sm:$0xff] %v4024_v13  ;;  %v8249_v26 = vshrl.u32 %v4190_v31, 30  ;;  %v4045_v43 = vshll.u32 %v8416_v49, %v4039_v2  ;;  %v4046_v47 = vshrl.u32 %v8417_v58, %v4040_v16  ;;  %v4049_v36 = vshrl.u32 %v8418_v28, %v4040_v16 }
 0x50a   : > { %v3897_v51 = vand.u32 2147483647, %v3896_v52  ;;  %v4051_v19 = vshll.u32 %v8418_v28, %v4039_v2  ;;  %v4052_v15 = vshrl.u32 %v8419_v46, %v4040_v16  ;;  %v3904_v41 = vsel %vm3819_vm4, %v3903_v17, %v8186_v57 }
 0x50b   : > { %v4192_v39 = vshll.u32 %v8249_v26, 30  ;;  %v4038_v30 = vshrl.u32 %v4037_v40, 5  ;;  %v4048_v14 = vshll.u32 %v8417_v58, %v4039_v2  ;;  %v4044_v49 = vor.u32 %v4043_v1, %v4042_v22 }
 0x50c   : > { %v3900_v12 = vmul.f32 %v3899_v24, %v3897_v51  ;;  %v4047_v6 = vor.u32 %v4046_v47, %v4045_v43  ;;  %v4053_v48 = vor.u32 %v4052_v15, %v4051_v19  ;;  %v4054_v3 = vshll.u32 %v8419_v46, %v4039_v2 }
 0x50d   : > { %v4193_v56 = vsub.s32 %v4189_v18, %v4192_v39  ;;  %v4050_v42 = vor.u32 %v4049_v36, %v4048_v14  ;;  %v4055_v28 = vshrl.u32 %v8420_v25, %v4040_v16  ;;  %v3906_v23 = vsel %vm8238_vm7, 0, %v3904_v41 }
 0x50e   : > { %v3901_v35 = vxor.u32 2147483648, %v3900_v12  ;;  %v4033_v57 = vor.u32 8388608, %v4032_v9  ;;  %vm4057_vm5 = vcmp.lt.s32.totalorder %v4038_v30, 1  ;;  %vm4060_vm3 = vcmp.lt.s32.totalorder %v4038_v30, 4 }
 0x50f   : > { %v4195_v0 = vsub.s32 0, %v4193_v56  ;;  %v4056_v27 = vor.u32 %v4055_v28, %v4054_v3  ;;  %v4041_v33 = vshrl.u32 %v8415_v37, %v4040_v16  ;;  %vm4059_vm6 = vcmp.lt.s32.totalorder %v4038_v30, 3 }
 0x510   : > { %v3902_v58 = vsel %vm3819_vm4, %v3901_v35, %v3900_v12  ;;  %v4066_v34 = vsel %vm4060_vm3, %v4053_v48, 920167782  ;;  %v4062_v55 = vsel %vm4060_vm3, %v4050_v42, 2102212464  ;;  %v4065_v45 = vsel %vm4057_vm5, %v4044_v49, %v4047_v6 }
 0x511   : > { %v3905_v46 = vsel %vm8238_vm7, %v8025_v60, %v3902_v58  ;;  %v4532_v25 = vmin.u32 %v4195_v0, %v4193_v56  ;;  %v4067_v5 = vsel %vm4059_vm6, %v4050_v42, %v4066_v34  ;;  %v4069_v40 = vsel %vm4057_vm5, %v4047_v6, %v4050_v42 }
 0x512   : > { %4902 = vcosq.f32 %v3905_v46  ;;  %v4070_v10 = vsel %vm4060_vm3, %v4056_v27, 1326507024  ;;  %vm4058_vm10 = vcmp.lt.s32.totalorder %v4038_v30, 2  ;;  %v4073_v37 = vshll.u32 %v4033_v57, 8 }
 0x513   : > { %4904 = vsinq.f32 %v3905_v46  ;;  %v4197_v38 = vclz %v4532_v25  ;;  %v4061_v11 = vsel %vm4057_vm5, %v4041_v33, %v4044_v49  ;;  %v4063_v20 = vsel %vm4059_vm6, %v4047_v6, %v4062_v55 }
 0x514   : > { %v4068_v53 = vsel %vm4058_vm10, %v4065_v45, %v4067_v5  ;;  %v4071_v29 = vsel %vm4059_vm6, %v4053_v48, %v4070_v10  ;;  %v3910_v59 = vadd.s32 3, %v3906_v23  ;;  %v4064_v61 = vsel %vm4058_vm10, %v4061_v11, %v4063_v20 }
 0x515   : > { %v4533_v7 = vadd.s32 4294967294, %v4197_v38  ;;  %v4072_v44 = vsel %vm4058_vm10, %v4069_v40, %v4071_v29  ;;  %v8278_v18 = vmul.u32.u64.low %v4073_v37, %v4068_v53  ;;  %v8279_v2 = vmul.u32.u64.high %v4073_v37, %v4068_v53, %v8278_v18 }
 0x516   : > { %v8281_v21 = vmul.u32.u64.low %v4073_v37, %v4072_v44  ;;  %v8282_v50 = vmul.u32.u64.high %v4073_v37, %v4072_v44, %v8281_v21  ;;  %v4185_v17 = vadd.s32 %v8210_v62, %v8218_v54  ;;  %v3911_v24 = vand.u32 3, %v3910_v59 }
 0x517   : > { %vm4534_vm8 = vcmp.lt.s32.totalorder %v4533_v7, 0  ;;  %v4083_v52 = vadd.s32 1, %v8279_v2  ;;  %v4080_v9 = vmul.u32 %v4073_v37, %v4064_v61  ;;  %vm3909_vm0 = vweird.f32 %v8025_v60 }
 0x518   : > { %v4200_v13 = vsel %vm4534_vm8, 0, %v4533_v7  ;;  %vm4082_vm12 = vc.u32 %v8282_v50, %v8278_v18  ;;  %vm3916_vm13 = vcmp.eq.s32.totalorder %v3911_v24, 2  ;;  %vm3913_vm11 = vcmp.eq.s32.totalorder %v3911_v24, 0 }
 0x519   : > { %v4201_v31 = vsub.s32 32, %v4200_v13  ;;  %v4205_v16 = vsub.s32 4294967266, %v4200_v13  ;;  %v4202_v22 = vshll.u32 %v4193_v56, %v4200_v13  ;;  %v4084_v47 = vsel %vm4082_vm12, %v4083_v52, %v8279_v2 }
 0x51a   : > { %v4085_v36 = vadd.s32 %v4084_v47, %v4080_v9  ;;  %vm3912_vm9 = vcmp.lt.s32.totalorder %v3911_v24, 2  ;;  %v4215_v35 = vsub.s32 4, %v8249_v26  ;;  %vm4131_vm15 = vcmp.lt.s32.totalorder %v8093_v63, 0 }
 0x51b   : > { %v4203_v1 = vshrl.u32 %v4185_v17, %v4201_v31  ;;  %v4206_v43 = vadd.s32 127, %v4205_v16  ;;  %vm4130_vm14 = vcmp.le.f32.partialorder %v4129_v4, 0.7853982  ;;  %v4081_v5 = vadd.s32 %v8278_v18, %v8282_v50 }
 0x51c   : > { %v4903_v51 = vpop.eup %4902  ;;  %v4086_v54 = vadd.s32 536870912, %v4085_v36  ;;  %v4216_v60 = vsel %vm4131_vm15, %v4215_v35, %v8249_v26  ;;  %vm4221_vm5 = vweird.f32 %v8093_v63  ;;  %vm4027_vm3 = vcmp.lt.s32.totalorder %v8170_v32, 0 }
 0x51d   : > { %v4905_v19 = vpop.eup %4904  ;;  %v3917_v15 = vxor.u32 2147483648, %v4903_v51  ;;  %v4204_v41 = vor.u32 %v4203_v1, %v4202_v22  ;;  %v4207_v39 = vshll.u32 %v4206_v43, 23  ;;  %v4218_v34 = vsel %vm4130_vm14, 0, %v4216_v60 }
 0x51e   : > { %v3914_v62 = vxor.u32 2147483648, %v4905_v19  ;;  %v4087_v49 = vshrl.u32 %v4086_v54, 30  ;;  %v4222_v55 = vadd.s32 3, %v4218_v34  ;;  %vm4026_vm6 = vcmp.le.f32.partialorder %v4025_v8, 0.7853982 }
 0x51f   : > { %v3918_v30 = vsel %vm3916_vm13, %v3917_v15, %v4905_v19  ;;  %v4208_v14 = vor.u32 4788187, %v4207_v39  ;;  %v4211_v56 = vcvt.s32.f32 %v4204_v41  ;;  %vm4117_vm13 = vweird.f32 %v8170_v32 }
 0x520   : > { %v3915_v12 = vsel %vm3913_vm11, %v4903_v51, %v3914_v62  ;;  %v4088_v3 = vshll.u32 %v4087_v49, 30  ;;  %v4223_v38 = vand.u32 3, %v4222_v55  ;;  %v4111_v31 = vsub.s32 4, %v4087_v49 }
 0x521   : > { %v3919_v6 = vsel %vm3912_vm9, %v3915_v12, %v3918_v30  ;;  %v4209_v48 = vand.u32 2147483647, %v4208_v14 }
 0x522   : > { %v3920_v42 = vsel %vm3909_vm0, nan, %v3919_v6  ;;  %v4089_v23 = vsub.s32 %v4085_v36, %v4088_v3  ;;  %vm4228_vm2 = vcmp.eq.s32.totalorder %v4223_v38, 2  ;;  %vm4225_vm1 = vcmp.eq.s32.totalorder %v4223_v38, 0 }
 0x523   : > { %4261 = vst [vmem:[%s5813_s18 + $0xe0] sm:$0xff] %v3920_v42  ;;  %v4212_v28 = vmul.f32 %v4211_v56, %v4209_v48  ;;  %vm4224_vm7 = vcmp.lt.s32.totalorder %v4223_v38, 2  ;;  %v4112_v24 = vsel %vm4027_vm3, %v4111_v31, %v4087_v49 }
 0x524   : > { %v4091_v0 = vsub.s32 0, %v4089_v23 }
 0x525   : > { %v4213_v57 = vxor.u32 2147483648, %v4212_v28 }
 0x526   : > { %v4528_v33 = vmin.u32 %v4091_v0, %v4089_v23 }
 0x527   : > { %v4214_v27 = vsel %vm4131_vm15, %v4213_v57, %v4212_v28 }
 0x528   : > { %v4217_v58 = vsel %vm4130_vm14, %v8093_v63, %v4214_v27  ;;  %v4093_v46 = vclz %v4528_v33  ;;  %v4114_v63 = vsel %vm4026_vm6, 0, %v4112_v24 }
 0x529   : > { %4906 = vcosq.f32 %v4217_v58  ;;  %v4118_v22 = vadd.s32 3, %v4114_v63 }
 0x52a   : > { %4908 = vsinq.f32 %v4217_v58  ;;  %v4529_v25 = vadd.s32 4294967294, %v4093_v46 }
 0x52b   : > { %v4119_v1 = vand.u32 3, %v4118_v22 }
 0x52c   : > { %vm4530_vm4 = vcmp.lt.s32.totalorder %v4529_v25, 0 }
 0x52d   : > { %v4096_v45 = vsel %vm4530_vm4, 0, %v4529_v25  ;;  %vm4124_vm10 = vcmp.eq.s32.totalorder %v4119_v1, 2  ;;  %vm4121_vm8 = vcmp.eq.s32.totalorder %v4119_v1, 0  ;;  %vm4120_vm12 = vcmp.lt.s32.totalorder %v4119_v1, 2 }
 0x52e   : > { %v4097_v40 = vsub.s32 32, %v4096_v45  ;;  %v4101_v10 = vsub.s32 4294967266, %v4096_v45  ;;  %v4098_v4 = vshll.u32 %v4089_v23, %v4096_v45 }
 0x530   : > { %v4099_v37 = vshrl.u32 %v4081_v5, %v4097_v40  ;;  %v4102_v11 = vadd.s32 127, %v4101_v10 }
 0x532   : > { %v4100_v29 = vor.u32 %v4099_v37, %v4098_v4  ;;  %v4103_v7 = vshll.u32 %v4102_v11, 23 }
 0x533   : > { %v4907_v26 = vpop.eup %4906 }
 0x534   : > { %v4909_v20 = vpop.eup %4908  ;;  %v4229_v53 = vxor.u32 2147483648, %v4907_v26  ;;  %v4104_v59 = vor.u32 4788187, %v4103_v7  ;;  %v4107_v61 = vcvt.s32.f32 %v4100_v29 }
 0x535   : > { %v4226_v44 = vxor.u32 2147483648, %v4909_v20 }
 0x536   : > { %v4230_v2 = vsel %vm4228_vm2, %v4229_v53, %v4909_v20  ;;  %v4105_v50 = vand.u32 2147483647, %v4104_v59 }
 0x537   : > { %v4227_v21 = vsel %vm4225_vm1, %v4907_v26, %v4226_v44 }
 0x538   : > { %v4231_v18 = vsel %vm4224_vm7, %v4227_v21, %v4230_v2  ;;  %v4108_v17 = vmul.f32 %v4107_v61, %v4105_v50 }
 0x539   : > { %v4232_v13 = vsel %vm4221_vm5, nan, %v4231_v18 }
 0x53a   : > { %4264 = vst [vmem:[%s5813_s18 + $0xf8] sm:$0xff] %v4232_v13  ;;  %v4109_v16 = vxor.u32 2147483648, %v4108_v17 }
 0x53c   : > { %v4110_v52 = vsel %vm4027_vm3, %v4109_v16, %v4108_v17 }
 0x53d   : > { %v4113_v9 = vsel %vm4026_vm6, %v8170_v32, %v4110_v52 }
 0x53e   : > { %4910 = vcosq.f32 %v4113_v9 }
 0x53f   : > { %4912 = vsinq.f32 %v4113_v9 }
 0x548   : > { %v4911_v43 = vpop.eup %4910 }
 0x549   : > { %v4913_v47 = vpop.eup %4912  ;;  %v4125_v51 = vxor.u32 2147483648, %v4911_v43 }
 0x54a   : > { %v4122_v36 = vxor.u32 2147483648, %v4913_v47 }
 0x54b   : > { %v4126_v8 = vsel %vm4124_vm10, %v4125_v51, %v4913_v47 }
 0x54c   : > { %v4123_v19 = vsel %vm4121_vm8, %v4911_v43, %v4122_v36 }
 0x54d   : > { %v4127_v15 = vsel %vm4120_vm12, %v4123_v19, %v4126_v8 }
 0x54e   : > { %v4128_v41 = vsel %vm4117_vm13, nan, %v4127_v15 }
 0x54f   : > { %4263 = vst [vmem:[%s5813_s18 + $0xf0] sm:$0xff] %v4128_v41 }
 0x550   : > { %5023 = shalt.err (!%p5020_p11)
}
 0x551   : > { %s5024_s18 = scalar_lea.hbm %s8309_s8, 4096  ;;  %s5028_s30 = scalar_lea.hbm %s8368_s6, 8192 }
 0x552   : > { %p5025_p0 = scmp.ne.s32.totalorder %s8309_s8, %s5024_s18  ;;  %p5029_p6 = scmp.lt.u32.totalorder %s8309_s8, %s8368_s6 }
 0x553   : > { %p5030_p7 = scmp.lt.u32.totalorder %s5028_s30, %s5024_s18  ;;  %p5032_p8 = scmp.lt.u32.totalorder %s5024_s18, %s8309_s8 }
 0x554   : > { %p5026_p4 = pnand %p5025_p0, %p8498_p2 }
 0x555   : > { %p5031_p12 = por %p5030_p7, %p5029_p6 }
 0x556   : > { %p5027_p13 = pneg %p5026_p4 }
 0x557   : > { %p5033_p1 = por %p5032_p8, %p5031_p12 }
 0x559   : > { %p5034_p10 = pnand %p5033_p1, %p5027_p13 }
 0x55b   : > { %5037 = shalt.err (!%p5034_p10)
}
 0x55c   : > { %s5115_s28 = smov 128   ;;  %s5116_s11 = smov 8  }
 0x55d   : > { %4696 = dma.vmem_to_hbm [thread:$0]  (%p8498_p2), %s8311_s9, 4096, %s8309_s8, %s4266_s24, %s5115_s28, %s5115_s28, %s5116_s11  }
 0x55e PF: > { %s8499_s15 = sld [smem:[#allocation12_spill]]  ;;  %s4297_s14 = sand.u32 1, %s5076_s21  }
 0x55f   : > { %p8501_p5 = scmp.ge.s32.totalorder %s5096_s26, 2  ;;  %s4298_s17 = scalar_lea.sflag [#allocation4], %s4297_s14 }
 0x564   : > { %p8500_p3 = scmp.ne.s32.totalorder %s8499_s15, 0 }
 0x566   : > { %p4710_p9 = pnand %p8501_p5, %p8500_p3 }
 0x568   : > { %5071 = dma.done.wait (!%p4710_p9), %s4298_s17, 4096  }
 0x569   : > { %5073 = vsyncadd (!%p4710_p9), %s4298_s17, 4294963200  ;;  %s23_s26 = sadd.s32 1, %s5096_s26   ;;  %s8502_s21 = smov %s5080_s22 }
 0x56a   : > { %p20_p11 = scmp.ge.s32.totalorder %s23_s26, 4   ;;  %s8503_s22 = smov %s5084_s23 }
 0x56b   : > { %s8504_s23 = smov %s5294_s13  ;;  %s8505_s24 = smov %s5092_s25 }
 0x56c   : > { %s8506_s25 = smov %s8508_s16  ;;  %22 = sbr.rel (!%p20_p11) target bundleno = 7 (0x7), region = 98 }
 0x573   :  { %4303 = vsyncpa [#allocation3], 1 }
 0x574   :  { %4305 = vsyncpa [#allocation3 + $0x1], 1 }
 0x575   :  { %4306 = vsyncpa [#allocation6], 1 }
 0x576   :  { %4307 = vsyncpa [#allocation4], 1 }
 0x577   :  { %4309 = vsyncpa [#allocation4 + $0x1], 1 }

</bundles_post_ra>
